<compile_context>
chip_gen: v7x
topology: tpu7x:2x2x1
jax: 0.10.0
libtpu: 0.0.40
codegen_flags: <defaults>
</compile_context>

<pallas_src>
import jax
import jax.numpy as jnp
from jax import lax
from jax.experimental import pallas as pl
from jax.experimental.pallas import tpu as pltpu

BN_EPS = 1e-5
LANE = 128


def _round_up(x, m):
    return (x + m - 1) // m * m


def _tpu_budget():
    """(vmem_limit_bytes, target_rows), tuned per TPU generation."""
    try:
        cap = int(pltpu.get_tpu_info().vmem_capacity_bytes)
    except Exception:
        cap = 64 << 20                      # assume the tight (v7x-like) budget
    if cap >= (100 << 20):                  # v5e / v6e: 128 MiB physical VMEM
        return 96 << 20, 2048
    return 32 << 20, 1024                   # v7x: 64 MiB physical -> stay tight


def _vmem_estimate(th, wp, cin, cout_pad, ks, kpack):
    """Rough per-step VMEM footprint (double-buffered blocks + scratch)."""
    tm = th * wp
    win_len = (th + ks - 1) * wp + ks - 1
    ktot = ks * ks * cin
    est = 2 * win_len * cin * 2            # input window, bf16, 2 buffers
    est += 2 * tm * cout_pad * 2           # conv output tile, bf16, 2 buffers
    est += 2 * 8 * cout_pad * 4            # stats block, f32, 2 buffers
    est += 2 * ktot * cout_pad * 2         # weights, bf16, 2 buffers
    if kpack:
        est += tm * ktot * 2               # in-VMEM im2col scratch (bf16)
    else:
        est += tm * cout_pad * 4           # f32 temp for per-tap accumulation
    return est


def _pick_th(ho, wp, cin, cout_pad, ks, kpack, target_rows, vmem_limit):
    divisors = [d for d in range(ho, 0, -1) if ho % d == 0]
    for th in divisors:
        if th * wp > target_rows:
            continue
        if _vmem_estimate(th, wp, cin, cout_pad, ks, kpack) <= int(0.85 * vmem_limit):
            return th
    return divisors[-1]                    # th = 1: smallest possible tile


def _stats_and_store(y, y_ref, stats_ref, tm, wp, wo):
    """Per-batch BN partial sums over real output columns + bf16 store."""
    # Mask the (wp - wo) right-edge garbage columns of each extended output
    # row.  Generated in-kernel: a few VPU ops, no extra HBM stream.
    ridx = lax.broadcasted_iota(jnp.int32, (tm, 1), 0)
    maskf = ((ridx % wp) < wo).astype(jnp.float32)
    yv = y * maskf
    stats_ref[0:1, :] = stats_ref[0:1, :] + jnp.sum(yv, axis=0, keepdims=True)
    stats_ref[1:2, :] = stats_ref[1:2, :] + jnp.sum(yv * yv, axis=0, keepdims=True)
    # Conv intermediate written as bf16 (stats above were taken in f32).
    y_ref[...] = y.astype(y_ref.dtype)


def _make_kpack_kernel(ks, th, wp, wo, cin):
    """Small-Cin path: in-VMEM im2col -> one big-K MXU matmul per tile."""
    tm = th * wp

    def kernel(xwin_ref, wk_ref, y_ref, stats_ref, col_ref):
        @pl.when(pl.program_id(1) == 0)
        def _init():
            stats_ref[...] = jnp.zeros_like(stats_ref)

        # Every tap is a static, contiguous row-slice of this tile's input
        # window (offsets are compile-time constants; dx=0 taps are aligned).
        for t in range(ks * ks):
            dy, dx = divmod(t, ks)
            col_ref[:, t * cin:(t + 1) * cin] = (
                xwin_ref[0, pl.ds(dy * wp + dx, tm), :])

        y = jnp.dot(col_ref[...], wk_ref[...],
                    preferred_element_type=jnp.float32)
        _stats_and_store(y, y_ref, stats_ref, tm, wp, wo)

    return kernel


def _make_pertap_kernel(ks, th, wp, wo):
    """Large-Cin path: ks*ks accumulated K=Cin MXU matmuls (K already full)."""
    tm = th * wp

    def kernel(xwin_ref, wt_ref, y_ref, stats_ref):
        @pl.when(pl.program_id(1) == 0)
        def _init():
            stats_ref[...] = jnp.zeros_like(stats_ref)

        # Tap 0 initializes the accumulator (no separate zero pass).
        y = jnp.dot(xwin_ref[0, pl.ds(0, tm), :], wt_ref[0],
                    preferred_element_type=jnp.float32)
        for t in range(1, ks * ks):
            dy, dx = divmod(t, ks)
            y = y + jnp.dot(xwin_ref[0, pl.ds(dy * wp + dx, tm), :],
                            wt_ref[t], preferred_element_type=jnp.float32)
        _stats_and_store(y, y_ref, stats_ref, tm, wp, wo)

    return kernel


def conv_bn_relu(x_nchw, weight, gamma, beta, *, ks=3, stride=1, padding=1):
    """Conv2d(ks, stride=1, padding, bias=False) -> BatchNorm2d(train) -> ReLU."""
    assert stride == 1, "this kernel implements the default stride=1 path"
    n, cin, h, w = x_nchw.shape
    cout = weight.shape[0]
    ho = h + 2 * padding - ks + 1
    wo = w + 2 * padding - ks + 1
    hp = h + 2 * padding
    wp = _round_up(w + 2 * padding, 8)       # unconditional sublane alignment
    cout_pad = _round_up(cout, LANE)
    kpack = cin < 128                        # pack taps into K when Cin is small

    vmem_limit, target_rows = _tpu_budget()
    th = _pick_th(ho, wp, cin, cout_pad, ks, kpack, target_rows, vmem_limit)
    num_h = ho // th
    tm = th * wp                             # output rows per tile (mult of 8)
    win_len = (th + ks - 1) * wp + ks - 1    # input rows one tile needs
    m_ext = n * ho * wp                      # extended rows (incl. garbage cols)
    m_real = n * ho * wo                     # real pixels -> BN divisor
    ktot = ks * ks * cin

    # --- glue: NCHW -> NHWC (bf16), zero-pad, flatten, per-tile windows. ---
    x = jnp.transpose(x_nchw, (0, 2, 3, 1)).astype(jnp.bfloat16)
    xpad = jnp.pad(x, ((0, 0), (padding, padding),
                       (padding, wp - w - padding), (0, 0)))
    xf = xpad.reshape(n, hp * wp, cin)
    xf = jnp.pad(xf, ((0, 0), (0, ks - 1), (0, 0)))
    row_ids = (jnp.arange(num_h) * tm)[:, None] + jnp.arange(win_len)[None, :]
    xwin = xf[:, row_ids, :].reshape(n * num_h, win_len, cin)  # ~1.0-1.1x input

    # weight (Cout, Cin, kh, kw) -> bf16, Cout padded to a lane multiple.
    wt = jnp.transpose(weight, (2, 3, 1, 0)).astype(jnp.bfloat16)
    wt = jnp.pad(wt, ((0, 0), (0, 0), (0, 0), (0, cout_pad - cout)))

    if kpack:
        w_arg = wt.reshape(ktot, cout_pad)
        w_spec = pl.BlockSpec((ktot, cout_pad), lambda ni, hi: (0, 0))
        kernel = _make_kpack_kernel(ks, th, wp, wo, cin)
        scratch = [pltpu.VMEM((tm, ktot), jnp.bfloat16)]
    else:
        w_arg = wt.reshape(ks * ks, cin, cout_pad)
        w_spec = pl.BlockSpec((ks * ks, cin, cout_pad), lambda ni, hi: (0, 0, 0))
        kernel = _make_pertap_kernel(ks, th, wp, wo)
        scratch = []

    # ---- Pass 1: conv + per-batch BN partial sums (ni parallel, hi reduction).
    y_flat, stats = pl.pallas_call(
        kernel,
        out_shape=(jax.ShapeDtypeStruct((m_ext, cout_pad), jnp.bfloat16),
                   jax.ShapeDtypeStruct((n * 8, cout_pad), jnp.float32)),
        grid_spec=pltpu.PrefetchScalarGridSpec(
            num_scalar_prefetch=0,
            grid=(n, num_h),
            in_specs=[
                pl.BlockSpec((1, win_len, cin),
                             lambda ni, hi: (ni * num_h + hi, 0, 0)),
                w_spec,
            ],
            out_specs=(
                pl.BlockSpec((tm, cout_pad),
                             lambda ni, hi: (ni * num_h + hi, 0)),
                pl.BlockSpec((8, cout_pad), lambda ni, hi: (ni, 0)),
            ),
            scratch_shapes=scratch),
        compiler_params=pltpu.CompilerParams(
            dimension_semantics=("parallel", "arbitrary"),
            vmem_limit_bytes=vmem_limit),
    )(xwin, w_arg)

    # ---- Tiny cross-batch BN fold + normalize + ReLU + layout (XLA fuses). ----
    stats = stats.reshape(n, 8, cout_pad)
    s1 = jnp.sum(stats[:, 0, :cout], axis=0)
    s2 = jnp.sum(stats[:, 1, :cout], axis=0)
    inv_m = jnp.float32(1.0 / m_real)
    mean = s1 * inv_m
    var = s2 * inv_m - mean * mean           # biased variance (training-mode BN)
    scale = gamma.astype(jnp.float32) * lax.rsqrt(var + BN_EPS)
    shift = beta.astype(jnp.float32) - mean * scale
    y = y_flat.reshape(n, ho, wp, cout_pad)[:, :, :wo, :cout].astype(jnp.float32)
    out = jnp.maximum(y * scale + shift, 0.0)
    return jnp.transpose(out, (0, 3, 1, 2))


def _reference(x, weight, gamma, beta, *, ks=3, padding=1):
    y = lax.conv_general_dilated(
        x, weight, window_strides=(1, 1),
        padding=[(padding, padding), (padding, padding)],
        dimension_numbers=("NCHW", "OIHW", "NCHW"))
    mean = jnp.mean(y, axis=(0, 2, 3), keepdims=True)
    var = jnp.mean(jnp.square(y - mean), axis=(0, 2, 3), keepdims=True)
    g = gamma.reshape(1, -1, 1, 1)
    b = beta.reshape(1, -1, 1, 1)
    return jnp.maximum((y - mean) * lax.rsqrt(var + BN_EPS) * g + b, 0.0)


def init_params(key, in_chan, out_chan, ks=3):
    # Conv2d weight: kaiming_normal_(a=1) => gain = sqrt(2/(1+1)) = 1,
    # std = 1/sqrt(fan_in), fan_in = in_chan*ks*ks.  No conv bias.
    fan_in = in_chan * ks * ks
    wgt = jax.random.normal(key, (out_chan, in_chan, ks, ks), jnp.float32)
    wgt = wgt / jnp.sqrt(jnp.float32(fan_in))
    gamma = jnp.ones((out_chan,), jnp.float32)   # BatchNorm2d default init
    beta = jnp.zeros((out_chan,), jnp.float32)
    return wgt, gamma, beta


if __name__ == "__main__":
    key = jax.random.PRNGKey(0)
    k_x, k_w = jax.random.split(key)

    N, Cin, H, W = 2, 4, 16, 16
    Cout = 8

    x = jax.random.normal(k_x, (N, Cin, H, W), jnp.float32)
    weight, gamma, beta = init_params(k_w, Cin, Cout, ks=3)

    out = conv_bn_relu(x, weight, gamma, beta, ks=3, stride=1, padding=1)
    out = jax.block_until_ready(out)

    assert out.shape == (N, Cout, H, W)
    assert bool(jnp.all(out >= 0.0))                                   # ReLU
    ref = _reference(x, weight, gamma, beta, ks=3, padding=1)
    err = float(jnp.max(jnp.abs(out - ref)))
    # Post-BN activations are O(1); allow ~bf16-level error from the bf16 conv.
    assert err < 5e-2, f"max abs error vs reference too large: {err}"
    print("KERNEL_OK")
</pallas_src>

<mosaic_0001>
module attributes {stable_mosaic.version = 11 : i64} {
  func.func @kernel(%arg0: i32, %arg1: i32, %arg2: memref<1x434x4xbf16, #tpu.memory_space<vmem>>, %arg3: memref<36x128xbf16, #tpu.memory_space<vmem>>, %arg4: memref<384x128xbf16, #tpu.memory_space<vmem>>, %arg5: memref<8x128xf32, #tpu.memory_space<vmem>>, %arg6: memref<384x36xbf16, #tpu.memory_space<vmem>>) attributes {dimension_semantics = [#tpu.dimension_semantics<parallel>, #tpu.dimension_semantics<arbitrary>], iteration_bounds = array<i64: 2, 1>, scalar_prefetch = 0 : i64, scratch_operands = 1 : i64, tpu.core_type = #tpu.core_type<tc>, window_params = [{transform_indices = @transform_0, window_bounds = array<i64: 1, 434, 4>}, {pipeline_mode = #tpu.pipeline_mode<synchronous>, transform_indices = @transform_1, window_bounds = array<i64: 36, 128>}, {transform_indices = @transform_2, window_bounds = array<i64: 384, 128>}, {transform_indices = @transform_3, window_bounds = array<i64: 8, 128>}]} {
    %c0_i32 = arith.constant 0 : i32
    %0 = arith.cmpi eq, %arg1, %c0_i32 : i32
    %1 = arith.extui %0 : i1 to i32
    %c0_i32_0 = arith.constant 0 : i32
    %2 = arith.cmpi ne, %1, %c0_i32_0 : i32
    scf.if %2 {
      %cst_50 = arith.constant 0.000000e+00 : f32
      %69 = vector.broadcast %cst_50 : f32 to vector<8x128xf32>
      %c0_51 = arith.constant 0 : index
      %c0_52 = arith.constant 0 : index
      %70 = vector.load %arg5[%c0_51, %c0_52] : memref<8x128xf32, #tpu.memory_space<vmem>>, vector<8x128xf32>
      tpu.vector_store %arg5[%c0_51, %c0_52], %69 {strides = array<i32>} : memref<8x128xf32, #tpu.memory_space<vmem>>, vector<8x128xf32>,
    } else {
    }
    %c0 = arith.constant 0 : index
    %c0_1 = arith.constant 0 : index
    %c0_2 = arith.constant 0 : index
    %3 = vector.load %arg2[%c0, %c0_1, %c0_2] : memref<1x434x4xbf16, #tpu.memory_space<vmem>>, vector<1x384x4xbf16>
    %4 = vector.shape_cast %3 : vector<1x384x4xbf16> to vector<384x4xbf16>
    %c0_3 = arith.constant 0 : index
    %c0_4 = arith.constant 0 : index
    %5 = vector.load %arg6[%c0_3, %c0_4] : memref<384x36xbf16, #tpu.memory_space<vmem>>, vector<384x4xbf16>
    tpu.vector_store %arg6[%c0_3, %c0_4], %4 {strides = array<i32>} : memref<384x36xbf16, #tpu.memory_space<vmem>>, vector<384x4xbf16>,
    %c0_5 = arith.constant 0 : index
    %c1 = arith.constant 1 : index
    %c0_6 = arith.constant 0 : index
    %6 = vector.load %arg2[%c0_5, %c1, %c0_6] : memref<1x434x4xbf16, #tpu.memory_space<vmem>>, vector<1x384x4xbf16>
    %7 = vector.shape_cast %6 : vector<1x384x4xbf16> to vector<384x4xbf16>
    %c0_7 = arith.constant 0 : index
    %c4 = arith.constant 4 : index
    %8 = vector.load %arg6[%c0_7, %c4] : memref<384x36xbf16, #tpu.memory_space<vmem>>, vector<384x4xbf16>
    tpu.vector_store %arg6[%c0_7, %c4], %7 {strides = array<i32>} : memref<384x36xbf16, #tpu.memory_space<vmem>>, vector<384x4xbf16>,
    %c0_8 = arith.constant 0 : index
    %c2 = arith.constant 2 : index
    %c0_9 = arith.constant 0 : index
    %9 = vector.load %arg2[%c0_8, %c2, %c0_9] : memref<1x434x4xbf16, #tpu.memory_space<vmem>>, vector<1x384x4xbf16>
    %10 = vector.shape_cast %9 : vector<1x384x4xbf16> to vector<384x4xbf16>
    %c0_10 = arith.constant 0 : index
    %c8 = arith.constant 8 : index
    %11 = vector.load %arg6[%c0_10, %c8] : memref<384x36xbf16, #tpu.memory_space<vmem>>, vector<384x4xbf16>
    tpu.vector_store %arg6[%c0_10, %c8], %10 {strides = array<i32>} : memref<384x36xbf16, #tpu.memory_space<vmem>>, vector<384x4xbf16>,
    %c0_11 = arith.constant 0 : index
    %c24 = arith.constant 24 : index
    %c0_12 = arith.constant 0 : index
    %12 = vector.load %arg2[%c0_11, %c24, %c0_12] : memref<1x434x4xbf16, #tpu.memory_space<vmem>>, vector<1x384x4xbf16>
    %13 = vector.shape_cast %12 : vector<1x384x4xbf16> to vector<384x4xbf16>
    %c0_13 = arith.constant 0 : index
    %c12 = arith.constant 12 : index
    %14 = vector.load %arg6[%c0_13, %c12] : memref<384x36xbf16, #tpu.memory_space<vmem>>, vector<384x4xbf16>
    tpu.vector_store %arg6[%c0_13, %c12], %13 {strides = array<i32>} : memref<384x36xbf16, #tpu.memory_space<vmem>>, vector<384x4xbf16>,
    %c0_14 = arith.constant 0 : index
    %c25 = arith.constant 25 : index
    %c0_15 = arith.constant 0 : index
    %15 = vector.load %arg2[%c0_14, %c25, %c0_15] : memref<1x434x4xbf16, #tpu.memory_space<vmem>>, vector<1x384x4xbf16>
    %16 = vector.shape_cast %15 : vector<1x384x4xbf16> to vector<384x4xbf16>
    %c0_16 = arith.constant 0 : index
    %c16 = arith.constant 16 : index
    %17 = vector.load %arg6[%c0_16, %c16] : memref<384x36xbf16, #tpu.memory_space<vmem>>, vector<384x4xbf16>
    tpu.vector_store %arg6[%c0_16, %c16], %16 {strides = array<i32>} : memref<384x36xbf16, #tpu.memory_space<vmem>>, vector<384x4xbf16>,
    %c0_17 = arith.constant 0 : index
    %c26 = arith.constant 26 : index
    %c0_18 = arith.constant 0 : index
    %18 = vector.load %arg2[%c0_17, %c26, %c0_18] : memref<1x434x4xbf16, #tpu.memory_space<vmem>>, vector<1x384x4xbf16>
    %19 = vector.shape_cast %18 : vector<1x384x4xbf16> to vector<384x4xbf16>
    %c0_19 = arith.constant 0 : index
    %c20 = arith.constant 20 : index
    %20 = vector.load %arg6[%c0_19, %c20] : memref<384x36xbf16, #tpu.memory_space<vmem>>, vector<384x4xbf16>
    tpu.vector_store %arg6[%c0_19, %c20], %19 {strides = array<i32>} : memref<384x36xbf16, #tpu.memory_space<vmem>>, vector<384x4xbf16>,
    %c0_20 = arith.constant 0 : index
    %c48 = arith.constant 48 : index
    %c0_21 = arith.constant 0 : index
    %21 = vector.load %arg2[%c0_20, %c48, %c0_21] : memref<1x434x4xbf16, #tpu.memory_space<vmem>>, vector<1x384x4xbf16>
    %22 = vector.shape_cast %21 : vector<1x384x4xbf16> to vector<384x4xbf16>
    %c0_22 = arith.constant 0 : index
    %c24_23 = arith.constant 24 : index
    %23 = vector.load %arg6[%c0_22, %c24_23] : memref<384x36xbf16, #tpu.memory_space<vmem>>, vector<384x4xbf16>
    tpu.vector_store %arg6[%c0_22, %c24_23], %22 {strides = array<i32>} : memref<384x36xbf16, #tpu.memory_space<vmem>>, vector<384x4xbf16>,
    %c0_24 = arith.constant 0 : index
    %c49 = arith.constant 49 : index
    %c0_25 = arith.constant 0 : index
    %24 = vector.load %arg2[%c0_24, %c49, %c0_25] : memref<1x434x4xbf16, #tpu.memory_space<vmem>>, vector<1x384x4xbf16>
    %25 = vector.shape_cast %24 : vector<1x384x4xbf16> to vector<384x4xbf16>
    %c0_26 = arith.constant 0 : index
    %c28 = arith.constant 28 : index
    %26 = vector.load %arg6[%c0_26, %c28] : memref<384x36xbf16, #tpu.memory_space<vmem>>, vector<384x4xbf16>
    tpu.vector_store %arg6[%c0_26, %c28], %25 {strides = array<i32>} : memref<384x36xbf16, #tpu.memory_space<vmem>>, vector<384x4xbf16>,
    %c0_27 = arith.constant 0 : index
    %c50 = arith.constant 50 : index
    %c0_28 = arith.constant 0 : index
    %27 = vector.load %arg2[%c0_27, %c50, %c0_28] : memref<1x434x4xbf16, #tpu.memory_space<vmem>>, vector<1x384x4xbf16>
    %28 = vector.shape_cast %27 : vector<1x384x4xbf16> to vector<384x4xbf16>
    %c0_29 = arith.constant 0 : index
    %c32 = arith.constant 32 : index
    %29 = vector.load %arg6[%c0_29, %c32] : memref<384x36xbf16, #tpu.memory_space<vmem>>, vector<384x4xbf16>
    tpu.vector_store %arg6[%c0_29, %c32], %28 {strides = array<i32>} : memref<384x36xbf16, #tpu.memory_space<vmem>>, vector<384x4xbf16>,
    %c0_30 = arith.constant 0 : index
    %c0_31 = arith.constant 0 : index
    %30 = vector.load %arg6[%c0_30, %c0_31] : memref<384x36xbf16, #tpu.memory_space<vmem>>, vector<384x36xbf16>
    %c0_32 = arith.constant 0 : index
    %c0_33 = arith.constant 0 : index
    %31 = vector.load %arg3[%c0_32, %c0_33] : memref<36x128xbf16, #tpu.memory_space<vmem>>, vector<36x128xbf16>
    %cst = arith.constant dense<0.000000e+00> : vector<384x128xf32>
    %32 = tpu.matmul %30, %31, %cst {dimension_numbers = #tpu.dot_dimension_numbers<[1], [0], [0], [1], [0, 0, 1, 1], [], []>} : vector<384x36xbf16>, vector<36x128xbf16>, vector<384x128xf32> -> vector<384x128xf32>
    %33 = tpu.iota {dimensions = array<i32: 0>} : vector<384x1xi32>
    %c24_i32 = arith.constant 24 : i32
    %c0_i32_34 = arith.constant 0 : i32
    %34 = arith.cmpi eq, %c24_i32, %c0_i32_34 : i32
    %c1_i32 = arith.constant 1 : i32
    %35 = arith.select %34, %c1_i32, %c24_i32 : i32
    %36 = vector.broadcast %35 : i32 to vector<384x1xi32>
    %37 = arith.remsi %33, %36 : vector<384x1xi32>
    %c0_i32_35 = arith.constant 0 : i32
    %38 = vector.broadcast %c0_i32_35 : i32 to vector<384x1xi32>
    %39 = arith.cmpi ne, %37, %38 : vector<384x1xi32>
    %c0_i32_36 = arith.constant 0 : i32
    %40 = vector.broadcast %c0_i32_36 : i32 to vector<384x1xi32>
    %41 = arith.cmpi slt, %37, %40 : vector<384x1xi32>
    %c0_i32_37 = arith.constant 0 : i32
    %42 = arith.cmpi slt, %35, %c0_i32_37 : i32
    %43 = vector.broadcast %42 : i1 to vector<384x1xi1>
    %44 = vector.broadcast %43 : vector<384x1xi1> to vector<384x1xi1>
    %45 = arith.xori %41, %44 : vector<384x1xi1>
    %46 = arith.andi %45, %39 : vector<384x1xi1>
    %47 = vector.broadcast %35 : i32 to vector<384x1xi32>
    %48 = arith.addi %37, %47 : vector<384x1xi32>
    %49 = arith.select %46, %48, %37 : vector<384x1xi1>, vector<384x1xi32>
    %c16_i32 = arith.constant 16 : i32
    %50 = vector.broadcast %c16_i32 : i32 to vector<384x1xi32>
    %51 = arith.cmpi slt, %49, %50 : vector<384x1xi32>
    %52 = arith.extui %51 : vector<384x1xi1> to vector<384x1xi32>
    %53 = arith.sitofp %52 : vector<384x1xi32> to vector<384x1xf32>
    %54 = vector.broadcast %53 : vector<384x1xf32> to vector<384x128xf32>
    %55 = arith.mulf %32, %54 : vector<384x128xf32>
    %c0_38 = arith.constant 0 : index
    %c0_39 = arith.constant 0 : index
    %56 = vector.load %arg5[%c0_38, %c0_39] : memref<8x128xf32, #tpu.memory_space<vmem>>, vector<1x128xf32>
    %cst_40 = arith.constant dense<0.000000e+00> : vector<128xf32>
    %57 = vector.multi_reduction <add>, %55, %cst_40 [0] : vector<384x128xf32> to vector<128xf32>
    %58 = vector.shape_cast %57 : vector<128xf32> to vector<1x128xf32>
    %59 = arith.addf %56, %58 : vector<1x128xf32>
    %c0_41 = arith.constant 0 : index
    %c0_42 = arith.constant 0 : index
    %60 = vector.load %arg5[%c0_41, %c0_42] : memref<8x128xf32, #tpu.memory_space<vmem>>, vector<1x128xf32>
    tpu.vector_store %arg5[%c0_41, %c0_42], %59 {strides = array<i32>} : memref<8x128xf32, #tpu.memory_space<vmem>>, vector<1x128xf32>,
    %c1_43 = arith.constant 1 : index
    %c0_44 = arith.constant 0 : index
    %61 = vector.load %arg5[%c1_43, %c0_44] : memref<8x128xf32, #tpu.memory_space<vmem>>, vector<1x128xf32>
    %62 = arith.mulf %55, %55 : vector<384x128xf32>
    %cst_45 = arith.constant dense<0.000000e+00> : vector<128xf32>
    %63 = vector.multi_reduction <add>, %62, %cst_45 [0] : vector<384x128xf32> to vector<128xf32>
    %64 = vector.shape_cast %63 : vector<128xf32> to vector<1x128xf32>
    %65 = arith.addf %61, %64 : vector<1x128xf32>
    %c1_46 = arith.constant 1 : index
    %c0_47 = arith.constant 0 : index
    %66 = vector.load %arg5[%c1_46, %c0_47] : memref<8x128xf32, #tpu.memory_space<vmem>>, vector<1x128xf32>
    tpu.vector_store %arg5[%c1_46, %c0_47], %65 {strides = array<i32>} : memref<8x128xf32, #tpu.memory_space<vmem>>, vector<1x128xf32>,
    %67 = arith.truncf %32 : vector<384x128xf32> to vector<384x128xbf16>
    %c0_48 = arith.constant 0 : index
    %c0_49 = arith.constant 0 : index
    %68 = vector.load %arg4[%c0_48, %c0_49] : memref<384x128xbf16, #tpu.memory_space<vmem>>, vector<384x128xbf16>
    tpu.vector_store %arg4[%c0_48, %c0_49], %67 {strides = array<i32>} : memref<384x128xbf16, #tpu.memory_space<vmem>>, vector<384x128xbf16>,
    return
  }
  func.func @transform_0(%arg0: i32, %arg1: i32) -> (i32, i32, i32) {
    %c1_i32 = arith.constant 1 : i32
    %0 = arith.muli %arg0, %c1_i32 : i32
    %1 = arith.addi %0, %arg1 : i32
    %c0_i32 = arith.constant 0 : i32
    %c0_i32_0 = arith.constant 0 : i32
    %c0_i32_1 = arith.constant 0 : i32
    return %1, %c0_i32, %c0_i32_0 : i32, i32, i32
  }
  func.func @transform_1(%arg0: i32, %arg1: i32) -> (i32, i32) {
    %c0_i32 = arith.constant 0 : i32
    %c0_i32_0 = arith.constant 0 : i32
    %c0_i32_1 = arith.constant 0 : i32
    return %c0_i32, %c0_i32_0 : i32, i32
  }
  func.func @transform_2(%arg0: i32, %arg1: i32) -> (i32, i32) {
    %c1_i32 = arith.constant 1 : i32
    %0 = arith.muli %arg0, %c1_i32 : i32
    %1 = arith.addi %0, %arg1 : i32
    %c0_i32 = arith.constant 0 : i32
    %c0_i32_0 = arith.constant 0 : i32
    return %1, %c0_i32 : i32, i32
  }
  func.func @transform_3(%arg0: i32, %arg1: i32) -> (i32, i32) {
    %c0_i32 = arith.constant 0 : i32
    %c0_i32_0 = arith.constant 0 : i32
    return %arg0, %c0_i32 : i32, i32
  }
}

</mosaic_0001>

<bundles_post_ra>
// kernel: tpu_custom_call.1
= control target key start
LH: loop header
LB: loop body
LE: loop exit
PB: predicated region body
PF: predicated region fallthrough
CT: control target
= control target key end

     0   :  { %9 = vsyncpa [#allocation4], 0  ;;  %s8494_s0 = inlined_call_operand.vmem [shape: bf16[2,434,4], index: 0, kind: input, shape index: {}]   ;;  %s8495_s1 = inlined_call_operand.vmem [shape: bf16[36,128], index: 1, kind: input, shape index: {}]   ;;  %s8496_s2 = inlined_call_operand.hbm [shape: bf16[768,128], index: 2, kind: output, shape index: {0}]   ;;  %s8497_s3 = inlined_call_operand.hbm [shape: f32[16,128], index: 3, kind: output, shape index: {1}]  }
   0x1   :  { %11 = vsyncpa [#allocation4 + $0x1], 0 }
   0x2   :  { %12 = vsyncpa [#allocation6], 0 }
   0x3   :  { %14 = vsyncpa [#allocation6 + $0x1], 0  ;;  %s6373_s12 = smov 0   ;;  %s6375_s13 = smov 0  }
   0x4   :  { %s6377_s14 = smov 0   ;;  %s6379_s15 = smov 0  }
   0x5   :  { %s6381_s16 = smov 0   ;;  %s6383_s17 = smov 0  }
   0x6 LB: > { %s5198_s18 = sadd.s32 4294967295, %s6339_s17   ;;  %s5199_s19 = sadd.s32 4294967294, %s6339_s17   ;;  %s6339_s17 = sphi %s6383_s17, %s20_s17   ;;  %s6335_s16 = sphi %s6381_s16, %s8598_s16   ;;  %s6331_s15 = sphi %s6379_s15, %s8597_s15   ;;  %s6327_s14 = sphi %s6377_s14, %s8596_s14   ;;  %s6323_s13 = sphi %s6375_s13, %s8595_s13   ;;  %s6319_s12 = sphi %s6373_s12, %s8594_s12  }
   0x7   : > { %s32_s20 = sadd.s32 1, %s6335_s16  ;;  %s90_s21 = sadd.s32 1, %s6327_s14 }
   0x8   : > { %p34_p0 = scmp.ge.s32.totalorder %s32_s20, 2  ;;  %p100_p1 = scmp.ne.s32.totalorder %s6327_s14, %s6323_s13 }
   0x9   : > { %p101_p2 = scmp.eq.s32.totalorder %s5198_s18, 1  ;;  %p106_p3 = scmp.ne.s32.totalorder %s6323_s13, %s6319_s12 }
   0xa   : > { %s8600_s20 = smov (%p34_p0, %s32_s20), 0  ;;  %p107_p5 = scmp.eq.s32.totalorder %s5199_s19, 1 }
   0xb   : > { %p6413_p4 = por %p101_p2, %p100_p1  ;;  %s87_s23 = ssub.s32 %s6335_s16, %s8600_s20 }
   0xc   : > { %p5202_p6 = scmp.ge.s32.totalorder %s6339_s17, 1  ;;  %p88_p7 = scmp.eq.s32.totalorder %s87_s23, 0 }
   0xd   : > { %p6420_p8 = por %p107_p5, %p106_p3  ;;  %p164_p9 = scmp.lt.s32.totalorder %s6339_s17, 3 }
   0xe   : > { %s6426_s25 = scalar_select %p88_p7, %s6327_s14, %s90_s21  }
   0xf   : > { %p165_p10 = pnand %p5202_p6, %p164_p9 }
  0x10   : > { %p195_p11 = scmp.lt.s32.totalorder (!%p165_p10), %s6331_s15, 1  ;;  %vm1064_vm0 = vcmask (!%p165_p10), 1046528   ;;  %s6341_s4 = smov (!%p165_p10), 12   ;;  %vm598_vm1 = vsmask.f32 (!%p165_p10), 7424  ;;  %vm401_vm2 = vcmask (!%p165_p10), 31744  }
  0x11   : > { %168 = sbr.rel (%p165_p10) target bundleno = 800 (0x320), region = 28  ;;  %s6342_s5 = smov (!%p165_p10), 20   ;;  %vm3424_vm3 = vcmask (!%p165_p10), 1041408   ;;  %vm867_vm4 = vcmask (!%p165_p10), 64544   ;;  %vm8501_vm5 = vcmask (!%p165_p10), 97344   ;;  %vm8499_vm6 = vcmask (!%p165_p10), 130144  }
  0x12   : > { %s6343_s6 = smov (!%p165_p10), 8   ;;  %s6344_s7 = smov (!%p165_p10), 4   ;;  %vm8498_vm7 = vcmask (!%p165_p10), 162944   ;;  %vm2234_vm8 = vcmask (!%p165_p10), 195744   ;;  %vm2499_vm9 = vcmask (!%p165_p10), 228544   ;;  %vm2964_vm10 = vcmask (!%p165_p10), 261344  }
  0x13   : > { %s6345_s8 = smov (!%p165_p10), 16   ;;  %s6346_s9 = smov (!%p165_p10), 24   ;;  %vm3282_vm11 = vcmask (!%p165_p10), 294144   ;;  %vm8500_vm12 = vcmask (!%p165_p10), 293888  }
  0x14   : > { %s6347_s10 = smov (!%p165_p10), 28   ;;  %s6348_s11 = smov (!%p165_p10), 32  }
  0x15   : > { %s7760_s28 = sand.u32 (!%p165_p10), 1, %s6323_s13   ;;  %s6350_s21 = smov (!%p165_p10), [#allocation3]  }
  0x16   : > { %s5836_s29 = smul.u32 (!%p165_p10), 192, %s7760_s28  ;;  %s5063_s18 = scalar_lea.sflag (!%p165_p10), [#allocation4], %s7760_s28 }
  0x17   : > { %s6233_s23 = sshll.u32 (!%p165_p10), %s6350_s21, 4  ;;  %s6234_s23 = int_to_ptr.vmem [resolvable:$false] %s6233_s23 }
  0x18   : > { %s196_s26 = scalar_select %p195_p11, %s6331_s15, 1 }
  0x1a   : > { %s5837_s27 = smul.u32 220, %s196_s26  ;;  %s6235_s26 = scalar_lea.vmem %s6234_s23, 6144 }
  0x1c   : > { %s6433_s30 = scalar_lea.vmem %s8494_s0, %s5837_s27 }
  0x1d   : > { %v6004_v0 = vld [vmem:[%s6433_s30 + $0x14] sm:$0xff]   ;;  %v6005_v1 = vld [vmem:[%s6433_s30 + $0xc] sm:$0xff]   ;;  %v6008_v6 = vld [vmem:[%s6433_s30] sm:$0xfe]  }
  0x1e   : > { %1381 = vrot.lane.b32.xlu1 %v6004_v0, %s6341_s4  ;;  %1379 = vrot.lane.b32.xlu0 %v6005_v1, %s6341_s4  ;;  %v6006_v2 = vld [vmem:[%s6433_s30 + $0xc] sm:$0xfe]   ;;  %v6007_v3 = vld [vmem:[%s6433_s30 + $0x14] sm:$0xff]   ;;  %v1065_v9 = vrot.slane %v6008_v6, 1 }
  0x1f   : > { %v2113_v4 = vrot.slane %v6006_v2, 1  ;;  %v2114_v5 = vrot.slane %v6007_v3, 1  ;;  %v6009_v7 = vld [vmem:[%s6433_s30 + $0x8] sm:$0xff]   ;;  %v6445_v10 = vld [vmem:[%s6433_s30 + $0x10] sm:$0xff]   ;;  %v6011_v12 = vld [vmem:[%s6433_s30] sm:$0xff]  }
  0x20   : > { %v1066_v11 = vrot.slane %v6009_v7, 1  ;;  %v1068_v13 = vrot.slane %v6445_v10, 1  ;;  %v6012_v14 = vld [vmem:[%s6433_s30 + $0x8] sm:$0xff]   ;;  %v600_v16 = vshrl.u32 %v6011_v12, 16  ;;  %v602_v17 = vshll.u32 %v6011_v12, 16  ;;  %v6453_v18 = vld [vmem:[%s6433_s30 + $0x1c] sm:$0xff]  }
  0x21   : > { %v2115_v8 = vsel %vm1064_vm0, %v2113_v4, %v2114_v5  ;;  %v6456_v19 = vld [vmem:[%s6433_s30 + $0x10] sm:$0xff]   ;;  %v607_v20 = vshll.u32 %v6012_v14, 16  ;;  %v611_v21 = vshrl.u32 %v6012_v14, 16  ;;  %v2116_v24 = vrot.slane %v6453_v18, 1  ;;  %v6466_v28 = vld [vmem:[%s6433_s30 + $0x1c] sm:$0xff]   ;;  %v6485_v50 = vld [vmem:[%s6433_s30 + $0x28] sm:$0xff]  }
  0x22   : > { %2162 = vrot.lane.b32.xlu0 %v2115_v8, %s6342_s5  ;;  %v1067_v15 = vsel %vm1064_vm0, %v1065_v9, %v1066_v11  ;;  %v1069_v22 = vsel %vm1064_vm0, %v1066_v11, %v1068_v13  ;;  %v604_v23 = vrot.slane %v602_v17, 1  ;;  %v615_v25 = vshll.u32 %v6456_v19, 16  ;;  %v6015_v26 = vld [vmem:[%s6433_s30 + $0x14] sm:$0xff]   ;;  %v6017_v35 = vld [vmem:[%s6433_s30 + $0xc] sm:$0xff]   ;;  %v6021_v46 = vld [vmem:[%s6433_s30 + $0x20] sm:$0xff]  }
  0x23   : > { %1114 = vrot.lane.b32.xlu1 %v1067_v15, %s6343_s6  ;;  %v609_v27 = vrot.slane %v607_v20, 1  ;;  %v1656_v31 = vshll.u32 %v6015_v26, 16  ;;  %v1660_v33 = vshrl.u32 %v6015_v26, 16  ;;  %v1664_v34 = vshll.u32 %v6466_v28, 16  ;;  %v6020_v42 = vld [vmem:[%s6433_s30 + $0x18] sm:$0xff]   ;;  %v6019_v59 = vld [vmem:[%s6433_s30 + $0x20] sm:$0xff]  }
  0x24   : > { %v605_v29 = vor.u32 %v604_v23, %v600_v16  ;;  %v617_v30 = vrot.slane %v615_v25, 1  ;;  %v2117_v37 = vsel %vm1064_vm0, %v2114_v5, %v2116_v24  ;;  %v1649_v40 = vshrl.u32 %v6017_v35, 16  ;;  %v6025_v56 = vld [vmem:[%s6433_s30 + $0x18] sm:$0xff]   ;;  %v6024_v63 = vld [vmem:[%s6433_s30 + $0x20] sm:$0xff]   ;;  %v6509_v11 = vld [vmem:[%s6433_s30 + $0x28] sm:$0xff]  }
  0x25   : > { %v613_v32 = vor.u32 %v611_v21, %v609_v27  ;;  %v1658_v38 = vrot.slane %v1656_v31, 1  ;;  %v6476_v39 = vrot.slane %v1664_v34, 1  ;;  %v1651_v41 = vshll.u32 %v6017_v35, 16  ;;  %v6018_v58 = vld [vmem:[%s6433_s30 + $0x18] sm:$0xff]   ;;  %v6501_v4 = vld [vmem:[%s6433_s30 + $0x20] sm:$0xff]   ;;  %v6529_v31 = vld [vmem:[%s6433_s30 + $0x2c] sm:$0xff]  }
  0x26   : > { %v610_v36 = vsel %vm598_vm1, %v605_v29, %v609_v27  ;;  %v2699_v47 = vshll.u32 %v6020_v42, 16  ;;  %v2697_v49 = vshrl.u32 %v6020_v42, 16  ;;  %v2704_v53 = vshll.u32 %v6021_v46, 16  ;;  %v6023_v2 = vld [vmem:[%s6433_s30 + $0x18] sm:$0xfe]   ;;  %v6514_v17 = vld [vmem:[%s6433_s30 + $0x20] sm:$0xff]  }
  0x27   : > { %1116 = vrot.lane.b32.xlu1 %v1069_v22, %s6343_s6  ;;  %795 = vrot.lane.b32.xlu0 %v610_v36, %s6344_s7  ;;  %v618_v43 = vsel %vm598_vm1, %v613_v32, %v617_v30  ;;  %v1662_v44 = vor.u32 %v1660_v33, %v1658_v38  ;;  %v1653_v45 = vrot.slane %v1651_v41, 1  ;;  %v2708_v54 = vshrl.u32 %v6021_v46, 16  ;;  %v6028_v16 = vld [vmem:[%s6433_s30 + $0x18] sm:$0xff]   ;;  %v6032_v20 = vld [vmem:[%s6433_s30 + $0x24] sm:$0xff]  }
  0x28   : > { %v2701_v52 = vrot.slane %v2699_v47, 1  ;;  %v2712_v55 = vshll.u32 %v6485_v50, 16  ;;  %v2706_v60 = vrot.slane %v2704_v53, 1  ;;  %v619_v61 = vshrl.u32 %v6456_v19, 16  ;;  %v6034_v41 = vld [vmem:[%s6433_s30 + $0x24] sm:$0xff]   ;;  %v6549_v42 = vld [vmem:[%s6433_s30 + $0x2c] sm:$0xff]  }
  0x29   : > { %v1667_v48 = vsel %vm598_vm1, %v1662_v44, %v6476_v39  ;;  %v1654_v51 = vor.u32 %v1653_v45, %v1649_v40  ;;  %v623_v0 = vshll.u32 %v6025_v56, 16  ;;  %v627_v8 = vshrl.u32 %v6025_v56, 16  ;;  %v6038_v45 = vld [vmem:[%s6433_s30 + $0x30] sm:$0xff]   ;;  %v6030_v46 = vld [vmem:[%s6433_s30 + $0x1c] sm:$0xff]  }
  0x2a   : > { %v6495_v62 = vrot.slane %v2712_v55, 1  ;;  %v2710_v1 = vor.u32 %v2708_v54, %v2706_v60  ;;  %v2702_v3 = vor.u32 %v2701_v52, %v2697_v49  ;;  %v621_v7 = vor.u32 %v619_v61, %v617_v30  ;;  %v6562_v49 = vld [vmem:[%s6433_s30 + $0x38] sm:$0xff]   ;;  %v6041_v52 = vld [vmem:[%s6433_s30 + $0x28] sm:$0xff]   ;;  %v6037_v56 = vld [vmem:[%s6433_s30 + $0x30] sm:$0xff]  }
  0x2b   : > { %2164 = vrot.lane.b32.xlu1 %v2117_v37, %s6342_s5  ;;  %797 = vrot.lane.b32.xlu0 %v618_v43, %s6344_s7  ;;  %v1659_v57 = vsel %vm598_vm1, %v1654_v51, %v1658_v38  ;;  %v625_v5 = vrot.slane %v623_v0, 1  ;;  %v631_v9 = vshll.u32 %v6501_v4, 16  ;;  %v3161_v14 = vrot.slane %v6023_v2, 1  ;;  %v6031_v38 = vld [vmem:[%s6433_s30 + $0x24] sm:$0xff]   ;;  %v6583_v0 = vld [vmem:[%s6433_s30 + $0x30] sm:$0xff]  }
  0x2c   : > { %v2715_v6 = vsel %vm598_vm1, %v2710_v1, %v6495_v62  ;;  %v2707_v12 = vsel %vm598_vm1, %v2702_v3, %v2706_v60  ;;  %v3162_v15 = vrot.slane %v6024_v63, 1  ;;  %v3164_v23 = vrot.slane %v6509_v11, 1  ;;  %v6040_v1 = vld [vmem:[%s6433_s30 + $0x30] sm:$0xff]  }
  0x2d   : > { %v6517_v19 = vrot.slane %v631_v9, 1  ;;  %v626_v21 = vsel %vm598_vm1, %v621_v7, %v625_v5  ;;  %v629_v22 = vor.u32 %v627_v8, %v625_v5  ;;  %v1070_v26 = vrot.slane %v6028_v16, 1  ;;  %v6597_v8 = vld [vmem:[%s6433_s30 + $0x38] sm:$0xff]   ;;  %v6602_v9 = vld [vmem:[%s6433_s30 + $0x30] sm:$0xff]  }
  0x2e   : > { %v3163_v25 = vsel %vm1064_vm0, %v3161_v14, %v3162_v15  ;;  %v1072_v27 = vrot.slane %v6514_v17, 1  ;;  %v1672_v30 = vshll.u32 %v6032_v20, 16  ;;  %v3165_v32 = vsel %vm1064_vm0, %v3162_v15, %v3164_v23  ;;  %v6048_v16 = vld [vmem:[%s6433_s30 + $0x34] sm:$0xff]   ;;  %v6075_v17 = vld [vmem:[%s6433_s30 + $0x8] sm:$0xff]  }
  0x2f   : > { %1846 = vrot.lane.b32.xlu1 %v1667_v48, %s6345_s8  ;;  %1844 = vrot.lane.b32.xlu0 %v1659_v57, %s6345_s8  ;;  %v634_v29 = vsel %vm598_vm1, %v629_v22, %v6517_v19  ;;  %v1676_v35 = vshrl.u32 %v6032_v20, 16  ;;  %v1680_v36 = vshll.u32 %v6529_v31, 16  ;;  %v1071_v37 = vsel %vm1064_vm0, %v1068_v13, %v1070_v26  ;;  %403 = vst.msk [vmem:[#allocation2 + $0x8] sm:$0xff] %vm401_vm2, %v6075_v17  ;;  %v6066_v17 = vld [vmem:[%s6433_s30 + $0x44] sm:$0xff]  }
  0x30   : > { %v1073_v33 = vsel %vm1064_vm0, %v1070_v26, %v1072_v27  ;;  %v1674_v34 = vrot.slane %v1672_v30, 1  ;;  %v1668_v40 = vshrl.u32 %v6466_v28, 16  ;;  %v2118_v13 = vrot.slane %v6034_v41, 1 }
  0x31   : > { %v6551_v44 = vrot.slane %v1680_v36, 1  ;;  %v2120_v28 = vrot.slane %v6549_v42, 1  ;;  %v2720_v48 = vshll.u32 %v6038_v45, 16  ;;  %v2728_v55 = vshll.u32 %v6562_v49, 16  ;;  %v6084_v42 = vld [vmem:[%s8495_s1] sm:$0xff]  }
  0x32   : > { %v1678_v43 = vor.u32 %v1676_v35, %v1674_v34  ;;  %v1670_v10 = vor.u32 %v1668_v40, %v6476_v39  ;;  %v2724_v39 = vshrl.u32 %v6038_v45, 16  ;;  %v2716_v57 = vshrl.u32 %v6485_v50, 16  ;;  %v6036_v50 = vld [vmem:[%s6433_s30 + $0x28] sm:$0xff]   ;;  %v6642_v45 = vld [vmem:[%s6433_s30 + $0x3c] sm:$0xff]   ;;  %5774 = vmatprep.subr.bf16.mxu0 %v6084_v42  ;;  %5828 = vmatprep.subr.bf16.mxu1 %v6084_v42 }
  0x33   : > { %2429 = vrot.lane.b32.xlu1 %v6019_v59, %s6346_s9  ;;  %2427 = vrot.lane.b32.xlu0 %v6018_v58, %s6346_s9  ;;  %v2121_v53 = vsel %vm1064_vm0, %v2118_v13, %v2120_v28  ;;  %v2722_v54 = vrot.slane %v2720_v48, 1  ;;  %v2119_v58 = vsel %vm1064_vm0, %v2116_v24, %v2118_v13  ;;  %v635_v59 = vshrl.u32 %v6501_v4, 16  ;;  %v6046_v40 = vld [vmem:[%s6433_s30 + $0x2c] sm:$0xff]  }
  0x34   : > { %v1683_v47 = vsel %vm598_vm1, %v1678_v43, %v6551_v44  ;;  %v1675_v51 = vsel %vm598_vm1, %v1670_v10, %v1674_v34  ;;  %v639_v60 = vshll.u32 %v6041_v52, 16  ;;  %v6580_v63 = vrot.slane %v2728_v55, 1  ;;  %v6047_v34 = vld [vmem:[%s6433_s30 + $0x34] sm:$0xff]   ;;  %v6655_v48 = vld [vmem:[%s6433_s30 + $0x48] sm:$0xff]   ;;  %v6053_v55 = vld [vmem:[%s6433_s30 + $0x40] sm:$0xff]   ;;  %5775 = vmatpush3.bf16.msra.mxu0 %v6084_v42  ;;  %5831 = vmatpush3.bf16.msra.mxu1 %v6084_v42 }
  0x35   : > { %v2726_v61 = vor.u32 %v2724_v39, %v2722_v54  ;;  %v2718_v18 = vor.u32 %v2716_v57, %v6495_v62  ;;  %v637_v3 = vor.u32 %v635_v59, %v6517_v19  ;;  %v643_v4 = vshrl.u32 %v6041_v52, 16  ;;  %v6044_v62 = vld [vmem:[%s6433_s30 + $0x28] sm:$0xff]  }
  0x36   : > { %v641_v24 = vrot.slane %v639_v60, 1  ;;  %v647_v5 = vshll.u32 %v6583_v0, 16  ;;  %v3166_v7 = vrot.slane %v6040_v1, 1  ;;  %v3168_v20 = vrot.slane %v6597_v8, 1  ;;  %v6675_v60 = vld [vmem:[%s6433_s30 + $0x40] sm:$0xff]   ;;  %v6085_v1 = vld [vmem:[%s6433_s30 + $0x10] sm:$0xff]  }
  0x37   : > { %2894 = vrot.lane.b32.xlu1 %v2715_v6, %s6347_s10  ;;  %2892 = vrot.lane.b32.xlu0 %v2707_v12, %s6347_s10  ;;  %v2731_v2 = vsel %vm598_vm1, %v2726_v61, %v6580_v63  ;;  %v2723_v6 = vsel %vm598_vm1, %v2718_v18, %v2722_v54  ;;  %v1076_v22 = vrot.slane %v6602_v9, 1  ;;  %v1688_v26 = vshll.u32 %v6048_v16, 16  ;;  %v6057_v54 = vld [vmem:[%s6433_s30 + $0x38] sm:$0xff]   ;;  %404 = vst.msk [vmem:[#allocation2 + $0x10] sm:$0xff] %vm401_vm2, %v6085_v1 }
  0x38   : > { %v642_v12 = vsel %vm598_vm1, %v637_v3, %v641_v24  ;;  %v645_v14 = vor.u32 %v643_v4, %v641_v24  ;;  %v6605_v15 = vrot.slane %v647_v5, 1  ;;  %v3167_v19 = vsel %vm1064_vm0, %v3164_v23, %v3166_v7  ;;  %v6088_v4 = vld [vmem:[%s8495_s1 + $0x8] sm:$0xff]   ;;  %v6758_v9 = vld [vmem:[%s6433_s30 + $0x58] sm:$0xff]  }
  0x39   : > { %v3169_v11 = vsel %vm1064_vm0, %v3166_v7, %v3168_v20  ;;  %v1692_v23 = vshrl.u32 %v6048_v16, 16  ;;  %v1684_v36 = vshrl.u32 %v6529_v31, 16  ;;  %v2124_v13 = vrot.slane %v6642_v45, 1  ;;  %v6089_v7 = vld [vmem:[%s6433_s30 + $0x18] sm:$0xff]   ;;  %5776 = vmatprep.subr.bf16.mxu0 %v6088_v4  ;;  %5829 = vmatprep.subr.bf16.mxu1 %v6088_v4  ;;  %v6068_v45 = vld [vmem:[%s6433_s30 + $0x48] sm:$0xff]  }
  0x3a   : > { %v2732_v57 = vshrl.u32 %v6562_v49, 16  ;;  %v651_v59 = vshrl.u32 %v6583_v0, 16  ;;  %v655_v18 = vshll.u32 %v6057_v54, 16  ;;  %v659_v0 = vshrl.u32 %v6057_v54, 16  ;;  %405 = vst.msk [vmem:[#allocation2 + $0x18] sm:$0xff] %vm401_vm2, %v6089_v7  ;;  %5777 = vmatpush3.bf16.msra.mxu0 %v6088_v4  ;;  %5832 = vmatpush3.bf16.msra.mxu1 %v6088_v4  ;;  %v6108_v54 = vld [vmem:[%s6433_s30 + $0x28] sm:$0xff]  }
  0x3b   : > { %799 = vrot.lane.b32.xlu1 %v626_v21, %s6344_s7  ;;  %3210 = vrot.lane.b32.xlu0 %v3163_v25, %s6348_s11  ;;  %v1074_v21 = vrot.slane %v6044_v62, 1  ;;  %v650_v25 = vsel %vm598_vm1, %v645_v14, %v6605_v15  ;;  %v663_v3 = vshll.u32 %v6675_v60, 16  ;;  %v6060_v62 = vld [vmem:[%s6433_s30 + $0x38] sm:$0xff]   ;;  %v6703_v14 = vld [vmem:[%s6433_s30 + $0x40] sm:$0xff]   ;;  %407 = vst.msk [vmem:[#allocation2 + $0x28] sm:$0xff] %vm401_vm2, %v6108_v54 }
  0x3c   : > { %v2734_v49 = vor.u32 %v2732_v57, %v6580_v63  ;;  %v653_v5 = vor.u32 %v651_v59, %v6605_v15  ;;  %v6092_v16 = vld [vmem:[%s8495_s1 + $0x10] ss:$0 sps:$4 sm:$0x33]   ;;  %v6064_v15 = vld [vmem:[%s6433_s30 + $0x44] sm:$0xff]  }
  0x3d   : > { %v1077_v30 = vsel %vm1064_vm0, %v1074_v21, %v1076_v22  ;;  %v1075_v35 = vsel %vm1064_vm0, %v1072_v27, %v1074_v21  ;;  %v1686_v27 = vor.u32 %v1684_v36, %v6551_v44  ;;  %5834 = vmatprep.subr.msk.bf16.mxu0 %vm3424_vm3, %v6092_v16  ;;  %5835 = vmatprep.subr.msk.bf16.mxu1 %vm3424_vm3, %v6092_v16  ;;  %v6074_v59 = vld [vmem:[%s6433_s30 + $0x48] sm:$0xff]   ;;  %v6787_v4 = vld [vmem:[%s6433_s30 + $0x50] sm:$0xff]  }
  0x3e   : > { %v679_v7 = vshll.u32 %v6787_v4, 16 }
  0x3f   : > { %801 = vrot.lane.b32.xlu1 %v634_v29, %s6344_s7  ;;  %3212 = vrot.lane.b32.xlu0 %v3165_v32, %s6348_s11  ;;  %v6618_v29 = vld [vmem:[%s6433_s30 + $0x3c] sm:$0xff]   ;;  %v1690_v32 = vrot.slane %v1688_v26, 1  ;;  %v3426_v26 = vsel %vm3424_vm3, %v6092_v16, 0 }
  0x40   : > { %5779 = vmatpush3.bf16.msra.mxu0 %v3426_v26  ;;  %5833 = vmatpush3.bf16.msra.mxu1 %v3426_v26 }
  0x41   : > { %v1694_v41 = vor.u32 %v1692_v23, %v1690_v32  ;;  %v1691_v44 = vsel %vm598_vm1, %v1686_v27, %v1690_v32  ;;  %v1080_v32 = vrot.slane %v6703_v14, 1  ;;  %v6747_v27 = vld [vmem:[%s6433_s30 + $0x4c] sm:$0xff]  }
  0x43   : > { %1120 = vrot.lane.b32.xlu1 %v1073_v33, %s6343_s6  ;;  %1118 = vrot.lane.b32.xlu0 %v1071_v37, %s6343_s6  ;;  %v1696_v33 = vshll.u32 %v6618_v29, 16  ;;  %v6050_v37 = vld [vmem:[%s6433_s30 + $0x34] sm:$0xff]  }
  0x44   : > { %v2122_v10 = vrot.slane %v6050_v37, 1 }
  0x45   : > { %v6639_v43 = vrot.slane %v1696_v33, 1  ;;  %v1704_v33 = vshll.u32 %v6064_v15, 16 }
  0x47   : > { %1385 = vrot.lane.b32.xlu1 %v6031_v38, %s6341_s4  ;;  %1383 = vrot.lane.b32.xlu0 %v6030_v46, %s6341_s4  ;;  %v6072_v38 = vld [vmem:[%s6433_s30] sm:$0xff]   ;;  %v1699_v31 = vsel %vm598_vm1, %v1694_v41, %v6639_v43  ;;  %v1706_v37 = vrot.slane %v1704_v33, 1  ;;  %v1700_v41 = vshrl.u32 %v6618_v29, 16  ;;  %v6123_v33 = vld [vmem:[%s6433_s30 + $0x30] sm:$0xff]  }
  0x48   : > { %v6054_v46 = vld [vmem:[%s6433_s30 + $0x40] sm:$0xff]   ;;  %402 = vst.msk [vmem:[#allocation2] sm:$0xff] %vm401_vm2, %v6072_v38  ;;  %408 = vst.msk [vmem:[#allocation2 + $0x30] sm:$0xff] %vm401_vm2, %v6123_v33 }
  0x49   : > { %v2740_v39 = vshrl.u32 %v6054_v46, 16  ;;  %v1702_v29 = vor.u32 %v1700_v41, %v6639_v43  ;;  %v6095_v33 = vld [vmem:[%s6433_s30 + $0x60] sm:$0xff]  }
  0x4b   : > { %1850 = vrot.lane.b32.xlu1 %v1683_v47, %s6345_s8  ;;  %1848 = vrot.lane.b32.xlu0 %v1675_v51, %s6345_s8  ;;  %v2736_v47 = vshll.u32 %v6054_v46, 16  ;;  %v2125_v51 = vsel %vm1064_vm0, %v2122_v10, %v2124_v13  ;;  %v1707_v43 = vsel %vm598_vm1, %v1702_v29, %v1706_v37 }
  0x4d   : > { %v2738_v52 = vrot.slane %v2736_v47, 1  ;;  %v6070_v47 = vld [vmem:[%s6433_s30 + $0x50] sm:$0xff]  }
  0x4f   : > { %2168 = vrot.lane.b32.xlu1 %v2121_v53, %s6342_s5  ;;  %2166 = vrot.lane.b32.xlu0 %v2119_v58, %s6342_s5  ;;  %v2744_v53 = vshll.u32 %v6655_v48, 16  ;;  %v6056_v58 = vld [vmem:[%s6433_s30 + $0x40] sm:$0xff]   ;;  %v2742_v61 = vor.u32 %v2740_v39, %v2738_v52  ;;  %v2128_v39 = vrot.slane %v6747_v27, 1 }
  0x50   : > { %v3170_v24 = vrot.slane %v6056_v58, 1 }
  0x52   : > { %v3171_v23 = vsel %vm1064_vm0, %v3168_v20, %v3170_v24  ;;  %v1708_v20 = vshrl.u32 %v6064_v15, 16 }
  0x53   : > { %2433 = vrot.lane.b32.xlu1 %v6037_v56, %s6346_s9  ;;  %2431 = vrot.lane.b32.xlu0 %v6036_v50, %s6346_s9  ;;  %v2123_v56 = vsel %vm1064_vm0, %v2120_v28, %v2122_v10  ;;  %v6677_v50 = vrot.slane %v2744_v53, 1  ;;  %v6052_v28 = vld [vmem:[%s6433_s30 + $0x38] sm:$0xff]   ;;  %v2752_v53 = vshll.u32 %v6070_v47, 16 }
  0x55   : > { %v2747_v63 = vsel %vm598_vm1, %v2742_v61, %v6677_v50  ;;  %v2754_v58 = vrot.slane %v2752_v53, 1  ;;  %v6081_v53 = vld [vmem:[%s6433_s30 + $0x54] sm:$0xff]  }
  0x57   : > { %2898 = vrot.lane.b32.xlu1 %v2731_v2, %s6347_s10  ;;  %2896 = vrot.lane.b32.xlu0 %v2723_v6, %s6347_s10  ;;  %v6689_v2 = vld [vmem:[%s6433_s30 + $0x48] sm:$0xff]   ;;  %v657_v6 = vrot.slane %v655_v18, 1  ;;  %v2748_v18 = vshrl.u32 %v6655_v48, 16  ;;  %v6073_v48 = vld [vmem:[%s6433_s30 + $0x50] sm:$0xff]  }
  0x58   : > { %v3174_v15 = vrot.slane %v6073_v48, 1 }
  0x59   : > { %v661_v21 = vor.u32 %v659_v0, %v657_v6 }
  0x5b   : > { %803 = vrot.lane.b32.xlu1 %v642_v12, %s6344_s7  ;;  %3214 = vrot.lane.b32.xlu0 %v3167_v19, %s6348_s11  ;;  %v2739_v12 = vsel %vm598_vm1, %v2734_v49, %v2738_v52  ;;  %v658_v19 = vsel %vm598_vm1, %v653_v5, %v657_v6  ;;  %v2126_v52 = vrot.slane %v6066_v17, 1 }
  0x5d   : > { %v2129_v57 = vsel %vm1064_vm0, %v2126_v52, %v2128_v39  ;;  %v2127_v61 = vsel %vm1064_vm0, %v2124_v13, %v2126_v52  ;;  %v2750_v13 = vor.u32 %v2748_v18, %v6677_v50 }
  0x5f   : > { %805 = vrot.lane.b32.xlu1 %v650_v25, %s6344_s7  ;;  %3216 = vrot.lane.b32.xlu0 %v3169_v11, %s6348_s11  ;;  %v6712_v25 = vrot.slane %v663_v3, 1  ;;  %v3172_v11 = vrot.slane %v6689_v2, 1  ;;  %v671_v3 = vshll.u32 %v6074_v59, 16  ;;  %v2755_v16 = vsel %vm598_vm1, %v2750_v13, %v2754_v58  ;;  %v6096_v13 = vld [vmem:[%s6433_s30 + $0x58] sm:$0xff]  }
  0x61   : > { %v3173_v8 = vsel %vm1064_vm0, %v3170_v24, %v3172_v11  ;;  %v667_v24 = vshrl.u32 %v6675_v60, 16  ;;  %v673_v6 = vrot.slane %v671_v3, 1 }
  0x63   : > { %1124 = vrot.lane.b32.xlu1 %v1077_v30, %s6343_s6  ;;  %1122 = vrot.lane.b32.xlu0 %v1075_v35, %s6343_s6  ;;  %v1078_v30 = vrot.slane %v6060_v62, 1  ;;  %v666_v35 = vsel %vm598_vm1, %v661_v21, %v6712_v25  ;;  %v669_v60 = vor.u32 %v667_v24, %v6712_v25  ;;  %v6808_v21 = vld [vmem:[%s6433_s30 + $0x50] sm:$0xff]  }
  0x65   : > { %v1081_v36 = vsel %vm1064_vm0, %v1078_v30, %v1080_v32  ;;  %v1079_v46 = vsel %vm1064_vm0, %v1076_v22, %v1078_v30  ;;  %v674_v25 = vsel %vm598_vm1, %v669_v60, %v673_v6  ;;  %v6082_v30 = vld [vmem:[%s6433_s30 + $0x54] sm:$0xff]   ;;  %v6141_v60 = vld [vmem:[%s6433_s30 + $0x40] sm:$0xff]  }
  0x66   : > { %v1720_v2 = vshll.u32 %v6082_v30, 16  ;;  %410 = vst.msk [vmem:[#allocation2 + $0x40] sm:$0xff] %vm401_vm2, %v6141_v60  ;;  %v6970_v60 = vld [vmem:[%s6433_s30 + $0x6c] sm:$0xff]  }
  0x67   : > { %1389 = vrot.lane.b32.xlu1 %v6047_v34, %s6341_s4  ;;  %1387 = vrot.lane.b32.xlu0 %v6046_v40, %s6341_s4  ;;  %v6725_v34 = vld [vmem:[%s6433_s30 + $0x4c] sm:$0xff]   ;;  %v6063_v40 = vld [vmem:[%s6433_s30 + $0x44] sm:$0xff]  }
  0x68   : > { %v1712_v38 = vshll.u32 %v6725_v34, 16  ;;  %v1716_v54 = vshrl.u32 %v6725_v34, 16 }
  0x6a   : > { %v6749_v10 = vrot.slane %v1712_v38, 1  ;;  %v1084_v38 = vrot.slane %v6808_v21, 1  ;;  %v6111_v21 = vld [vmem:[%s6433_s30 + $0x70] sm:$0xff]  }
  0x6b   : > { %1854 = vrot.lane.b32.xlu1 %v1699_v31, %s6345_s8  ;;  %1852 = vrot.lane.b32.xlu0 %v1691_v44, %s6345_s8  ;;  %v1710_v31 = vor.u32 %v1708_v20, %v1706_v37  ;;  %v6062_v44 = vld [vmem:[%s6433_s30 + $0x3c] sm:$0xff]  }
  0x6d   : > { %v1715_v22 = vsel %vm598_vm1, %v1710_v31, %v6749_v10 }
  0x6f   : > { %2172 = vrot.lane.b32.xlu1 %v2125_v51, %s6342_s5  ;;  %2170 = vrot.lane.b32.xlu0 %v2123_v56, %s6342_s5  ;;  %v6105_v51 = vld [vmem:[%s6433_s30 + $0x20] sm:$0xff]   ;;  %v2760_v56 = vshll.u32 %v6758_v9, 16 }
  0x70   : > { %406 = vst.msk [vmem:[#allocation2 + $0x20] sm:$0xff] %vm401_vm2, %v6105_v51  ;;  %v1722_v51 = vrot.slane %v1720_v2, 1 }
  0x71   : > { %v6783_v49 = vrot.slane %v2760_v56, 1  ;;  %v6856_v56 = vld [vmem:[%s6433_s30 + $0x5c] sm:$0xff]  }
  0x73   : > { %2437 = vrot.lane.b32.xlu1 %v6053_v55, %s6346_s9  ;;  %2435 = vrot.lane.b32.xlu0 %v6052_v28, %s6346_s9  ;;  %v2756_v55 = vshrl.u32 %v6070_v47, 16  ;;  %v6069_v28 = vld [vmem:[%s6433_s30 + $0x50] sm:$0xff]   ;;  %v1724_v47 = vshrl.u32 %v6082_v30, 16  ;;  %v6144_v30 = vld [vmem:[%s6433_s30 + $0x48] sm:$0xff]  }
  0x74   : > { %411 = vst.msk [vmem:[#allocation2 + $0x48] sm:$0xff] %vm401_vm2, %v6144_v30 }
  0x75   : > { %v2758_v0 = vor.u32 %v2756_v55, %v2754_v58  ;;  %v6086_v55 = vld [vmem:[%s6433_s30 + $0x54] sm:$0xff]   ;;  %v1726_v14 = vor.u32 %v1724_v47, %v1722_v51  ;;  %v6080_v58 = vld [vmem:[%s6433_s30 + $0x4c] sm:$0xff]  }
  0x76   : > { %v2130_v18 = vrot.slane %v6086_v55, 1 }
  0x77   : > { %2902 = vrot.lane.b32.xlu1 %v2747_v63, %s6347_s10  ;;  %2900 = vrot.lane.b32.xlu0 %v2739_v12, %s6347_s10  ;;  %v675_v63 = vshrl.u32 %v6074_v59, 16  ;;  %v2763_v5 = vsel %vm598_vm1, %v2758_v0, %v6783_v49  ;;  %v6802_v12 = vld [vmem:[%s6433_s30 + $0x58] sm:$0xff]   ;;  %v1718_v59 = vor.u32 %v1716_v54, %v6749_v10 }
  0x78   : > { %v3176_v20 = vrot.slane %v6802_v12, 1 }
  0x79   : > { %v677_v26 = vor.u32 %v675_v63, %v673_v6  ;;  %v1723_v0 = vsel %vm598_vm1, %v1718_v59, %v1722_v51  ;;  %v6103_v51 = vld [vmem:[%s6433_s30 + $0x64] sm:$0xff]   ;;  %v6943_v59 = vld [vmem:[%s6433_s30 + $0x6c] sm:$0xff]  }
  0x7a   : > { %v3177_v17 = vsel %vm1064_vm0, %v3174_v15, %v3176_v20 }
  0x7b   : > { %807 = vrot.lane.b32.xlu1 %v658_v19, %s6344_s7  ;;  %3218 = vrot.lane.b32.xlu0 %v3171_v23, %s6348_s11  ;;  %v6078_v19 = vld [vmem:[%s6433_s30 + $0x48] sm:$0xff]   ;;  %v6811_v23 = vrot.slane %v679_v7, 1  ;;  %v6091_v7 = vld [vmem:[%s6433_s30 + $0x60] sm:$0xff]  }
  0x7d   : > { %v682_v41 = vsel %vm598_vm1, %v677_v26, %v6811_v23  ;;  %v6901_v26 = vld [vmem:[%s6433_s30 + $0x60] sm:$0xff]  }
  0x7e   : > { %v695_v2 = vshll.u32 %v6901_v26, 16 }
  0x7f   : > { %809 = vrot.lane.b32.xlu1 %v666_v35, %s6344_s7  ;;  %3220 = vrot.lane.b32.xlu0 %v3173_v8, %s6348_s11  ;;  %v3175_v8 = vsel %vm1064_vm0, %v3172_v11, %v3174_v15 }
  0x83   : > { %1128 = vrot.lane.b32.xlu1 %v1081_v36, %s6343_s6  ;;  %1126 = vrot.lane.b32.xlu0 %v1079_v46, %s6343_s6  ;;  %v1082_v36 = vrot.slane %v6078_v19, 1  ;;  %v6126_v46 = vld [vmem:[%s6433_s30 + $0x38] sm:$0xff]  }
  0x84   : > { %409 = vst.msk [vmem:[#allocation2 + $0x38] sm:$0xff] %vm401_vm2, %v6126_v46  ;;  %v6919_v46 = vld [vmem:[%s6433_s30 + $0x68] sm:$0xff]  }
  0x85   : > { %v1083_v52 = vsel %vm1064_vm0, %v1080_v32, %v1082_v36 }
  0x87   : > { %1393 = vrot.lane.b32.xlu1 %v6063_v40, %s6341_s4  ;;  %1391 = vrot.lane.b32.xlu0 %v6062_v44, %s6341_s4  ;;  %v6824_v40 = vld [vmem:[%s6433_s30 + $0x5c] sm:$0xff]   ;;  %v1085_v44 = vsel %vm1064_vm0, %v1082_v36, %v1084_v38 }
  0x88   : > { %v1728_v29 = vshll.u32 %v6824_v40, 16 }
  0x8a   : > { %v6860_v32 = vrot.slane %v1728_v29, 1 }
  0x8b   : > { %1858 = vrot.lane.b32.xlu1 %v1715_v22, %s6345_s8  ;;  %1856 = vrot.lane.b32.xlu0 %v1707_v43, %s6345_s8 }
  0x8f   : > { %2176 = vrot.lane.b32.xlu1 %v2129_v57, %s6342_s5  ;;  %2174 = vrot.lane.b32.xlu0 %v2127_v61, %s6342_s5  ;;  %v6093_v57 = vld [vmem:[%s6433_s30 + $0x60] sm:$0xff]  }
  0x90   : > { %v6780_v42 = vpop.permute.xlu1 %1381  ;;  %v1380_v1 = vpop.permute.xlu0 %1379  ;;  %v2768_v24 = vshll.u32 %v6093_v57, 16 }
  0x92   : > { %v2770_v63 = vrot.slane %v2768_v24, 1  ;;  %v1744_v24 = vshll.u32 %v6943_v59, 16 }
  0x93   : > { %2441 = vrot.lane.b32.xlu1 %v6069_v28, %s6346_s9  ;;  %2439 = vrot.lane.b32.xlu0 %v6068_v45, %s6346_s9  ;;  %v2132_v28 = vrot.slane %v6856_v56, 1  ;;  %v7015_v56 = vld [vmem:[%s6433_s30 + $0x70] sm:$0xff]  }
  0x94   : > { %v6799_v62 = vpop.permute.xlu0 %2162 }
  0x95   : > { %v1115_v50 = vpop.permute.xlu1 %1114  ;;  %v2133_v48 = vsel %vm1064_vm0, %v2130_v18, %v2132_v28 }
  0x97   : > { %2906 = vrot.lane.b32.xlu1 %v2763_v5, %s6347_s10  ;;  %2904 = vrot.lane.b32.xlu0 %v2755_v16, %s6347_s10  ;;  %v2772_v5 = vshrl.u32 %v6093_v57, 16  ;;  %v683_v16 = vshrl.u32 %v6787_v4, 16 }
  0x99   : > { %v1117_v35 = vpop.permute.xlu1 %1116  ;;  %v796_v37 = vpop.permute.xlu0 %795  ;;  %v2774_v27 = vor.u32 %v2772_v5, %v2770_v63  ;;  %v6106_v5 = vld [vmem:[%s6433_s30 + $0x64] sm:$0xff]  }
  0x9a   : > { %868 = vst.msk [vmem:[#allocation2] sm:$0xff] %vm867_vm4, %v796_v37  ;;  %v2134_v30 = vrot.slane %v6106_v5, 1 }
  0x9b   : > { %811 = vrot.lane.b32.xlu1 %v674_v25, %s6344_s7  ;;  %1187 = vst.msk [vmem:[#allocation2] sm:$0xff] %vm8501_vm5, %v1115_v50  ;;  %3222 = vrot.lane.b32.xlu0 %v3175_v8, %s6348_s11  ;;  %v2764_v50 = vshrl.u32 %v6758_v9, 16  ;;  %v687_v25 = vshll.u32 %v6096_v13, 16  ;;  %v685_v8 = vor.u32 %v683_v16, %v6811_v23 }
  0x9c   : > { %1452 = vst.msk [vmem:[#allocation2] sm:$0xff] %vm8499_vm6, %v1380_v1  ;;  %v1731_v1 = vsel %vm598_vm1, %v1726_v14, %v6860_v32 }
  0x9d   : > { %v2165_v11 = vpop.permute.xlu1 %2164  ;;  %v798_v31 = vpop.permute.xlu0 %797  ;;  %v2766_v4 = vor.u32 %v2764_v50, %v6783_v49  ;;  %v689_v37 = vrot.slane %v687_v25, 1  ;;  %v6976_v50 = vrot.slane %v1744_v24, 1  ;;  %v7038_v24 = vld [vmem:[%s6433_s30 + $0x70] sm:$0xff]  }
  0x9e   : > { %869 = vst.msk [vmem:[#allocation2 + $0x8] sm:$0xff] %vm867_vm4, %v798_v31  ;;  %v6925_v31 = vld [vmem:[%s6433_s30 + $0x60] sm:$0xff]  }
  0x9f   : > { %813 = vrot.lane.b32.xlu1 %v682_v41, %s6344_s7  ;;  %1188 = vst.msk [vmem:[#allocation2 + $0x8] sm:$0xff] %vm8501_vm5, %v1117_v35  ;;  %3224 = vrot.lane.b32.xlu0 %v3177_v17, %s6348_s11  ;;  %v691_v41 = vshrl.u32 %v6096_v13, 16  ;;  %v2771_v23 = vsel %vm598_vm1, %v2766_v4, %v2770_v63  ;;  %v6099_v17 = vld [vmem:[%s6433_s30 + $0x58] sm:$0xff]   ;;  %v690_v29 = vsel %vm598_vm1, %v685_v8, %v689_v37  ;;  %v6102_v13 = vld [vmem:[%s6433_s30 + $0x64] sm:$0xff]   ;;  %v1732_v63 = vshrl.u32 %v6824_v40, 16 }
  0xa0   : > { %1453 = vst.msk [vmem:[#allocation2 + $0x8] sm:$0xff] %vm8499_vm6, %v6780_v42  ;;  %v6871_v42 = vld [vmem:[%s6433_s30 + $0x68] sm:$0xff]   ;;  %v1086_v55 = vrot.slane %v6099_v17, 1  ;;  %v6101_v40 = vld [vmem:[%s6433_s30 + $0x5c] sm:$0xff]  }
  0xa1   : > { %v1847_v22 = vpop.permute.xlu1 %1846  ;;  %v1845_v43 = vpop.permute.xlu0 %1844  ;;  %v2776_v45 = vshll.u32 %v6871_v42, 16  ;;  %v1734_v16 = vor.u32 %v1732_v63, %v6860_v32  ;;  %v6114_v8 = vld [vmem:[%s6433_s30 + $0x68] sm:$0xff]  }
  0xa2   : > { %1918 = vst.msk [vmem:[#allocation2 + $0x8] sm:$0xff] %vm8498_vm7, %v1847_v22  ;;  %1917 = vst.msk [vmem:[#allocation2] sm:$0xff] %vm8498_vm7, %v1845_v43  ;;  %v693_v22 = vor.u32 %v691_v41, %v689_v37  ;;  %v3180_v43 = vrot.slane %v6919_v46, 1 }
  0xa3   : > { %1132 = vrot.lane.b32.xlu1 %v1085_v44, %s6343_s6  ;;  %2236 = vst.msk [vmem:[#allocation2 + $0x8] sm:$0xff] %vm2234_vm8, %v2165_v11  ;;  %1130 = vrot.lane.b32.xlu0 %v1083_v52, %s6343_s6  ;;  %2235 = vst.msk [vmem:[#allocation2] sm:$0xff] %vm2234_vm8, %v6799_v62  ;;  %v2131_v62 = vsel %vm1064_vm0, %v2128_v39, %v2130_v18  ;;  %v6898_v19 = vrot.slane %v2776_v45, 1  ;;  %v6090_v39 = vld [vmem:[%s6433_s30 + $0x58] sm:$0xff]   ;;  %v3178_v11 = vrot.slane %v6095_v33, 1  ;;  %v6932_v52 = vrot.slane %v695_v2, 1 }
  0xa5   : > { %v2430_v34 = vpop.permute.xlu1 %2429  ;;  %v2428_v61 = vpop.permute.xlu0 %2427  ;;  %v2779_v36 = vsel %vm598_vm1, %v2774_v27, %v6898_v19  ;;  %v3179_v54 = vsel %vm1064_vm0, %v3176_v20, %v3178_v11  ;;  %v698_v12 = vsel %vm598_vm1, %v693_v22, %v6932_v52  ;;  %v2136_v27 = vrot.slane %v6970_v60, 1  ;;  %v6109_v22 = vld [vmem:[%s6433_s30 + $0x68] sm:$0xff]  }
  0xa6   : > { %2501 = vst.msk [vmem:[#allocation2 + $0x8] sm:$0xff] %vm2499_vm9, %v2430_v34  ;;  %2500 = vst.msk [vmem:[#allocation2] sm:$0xff] %vm2499_vm9, %v2428_v61  ;;  %v1088_v34 = vrot.slane %v6925_v31, 1  ;;  %v3181_v61 = vsel %vm1064_vm0, %v3178_v11, %v3180_v43  ;;  %v2780_v11 = vshrl.u32 %v6871_v42, 16 }
  0xa7   : > { %1397 = vrot.lane.b32.xlu1 %v6081_v53, %s6341_s4  ;;  %1395 = vrot.lane.b32.xlu0 %v6080_v58, %s6341_s4  ;;  %v1736_v58 = vshll.u32 %v6103_v51, 16 }
  0xa8   : > { %v2782_v42 = vor.u32 %v2780_v11, %v6898_v19  ;;  %v711_v19 = vshll.u32 %v7015_v56, 16  ;;  %v6129_v11 = vld [vmem:[%s6433_s30 + $0x80] sm:$0xff]  }
  0xa9   : > { %v2895_v10 = vpop.permute.xlu1 %2894  ;;  %v2893_v3 = vpop.permute.xlu0 %2892 }
  0xaa   : > { %2966 = vst.msk [vmem:[#allocation2 + $0x8] sm:$0xff] %vm2964_vm10, %v2895_v10  ;;  %2965 = vst.msk [vmem:[#allocation2] sm:$0xff] %vm2964_vm10, %v2893_v3  ;;  %v1089_v10 = vsel %vm1064_vm0, %v1086_v55, %v1088_v34  ;;  %v6159_v3 = vld [vmem:[%s6433_s30 + $0x50] sm:$0xff]  }
  0xab   : > { %1862 = vrot.lane.b32.xlu1 %v1731_v1, %s6345_s8  ;;  %1860 = vrot.lane.b32.xlu0 %v1723_v0, %s6345_s8  ;;  %v1740_v1 = vshrl.u32 %v6103_v51, 16  ;;  %v1738_v0 = vrot.slane %v1736_v58, 1  ;;  %412 = vst.msk [vmem:[#allocation2 + $0x50] sm:$0xff] %vm401_vm2, %v6159_v3  ;;  %v7029_v58 = vld [vmem:[%s6433_s30 + $0x78] sm:$0xff]  }
  0xad   : > { %v800_v6 = vpop.permute.xlu1 %799  ;;  %v3211_v15 = vpop.permute.xlu0 %3210  ;;  %v1739_v32 = vsel %vm598_vm1, %v1734_v16, %v1738_v0  ;;  %v7062_v16 = vld [vmem:[%s6433_s30 + $0x7c] sm:$0xff]  }
  0xae   : > { %870 = vst.msk [vmem:[#allocation2 + $0x10] sm:$0xff] %vm867_vm4, %v800_v6 }
  0xaf   : > { %2180 = vrot.lane.b32.xlu1 %v2133_v48, %s6342_s5  ;;  %3283 = vst.msk [vmem:[#allocation2] sm:$0xff] %vm3282_vm11, %v3211_v15  ;;  %2178 = vrot.lane.b32.xlu0 %v2131_v62, %s6342_s5  ;;  %v1087_v48 = vsel %vm1064_vm0, %v1084_v38, %v1086_v55  ;;  %v1742_v62 = vor.u32 %v1740_v1, %v1738_v0  ;;  %v6177_v55 = vld [vmem:[%s6433_s30 + $0x60] sm:$0xff]  }
  0xb0   : > { %414 = vst.msk [vmem:[#allocation2 + $0x60] sm:$0xff] %vm401_vm2, %v6177_v55 }
  0xb1   : > { %v802_v9 = vpop.permute.xlu1 %801  ;;  %v3213_v35 = vpop.permute.xlu0 %3212  ;;  %v1747_v25 = vsel %vm598_vm1, %v1742_v62, %v6976_v50 }
  0xb2   : > { %871 = vst.msk [vmem:[#allocation2 + $0x18] sm:$0xff] %vm867_vm4, %v802_v9  ;;  %v2784_v9 = vshll.u32 %v6111_v21, 16 }
  0xb3   : > { %2445 = vrot.lane.b32.xlu1 %v6091_v7, %s6346_s9  ;;  %3284 = vst.msk [vmem:[#allocation2 + $0x8] sm:$0xff] %vm3282_vm11, %v3213_v35  ;;  %2443 = vrot.lane.b32.xlu0 %v6090_v39, %s6346_s9  ;;  %v6162_v7 = vld [vmem:[%s6433_s30 + $0x58] sm:$0xff]   ;;  %v2788_v35 = vshrl.u32 %v6111_v21, 16 }
  0xb4   : > { %413 = vst.msk [vmem:[#allocation2 + $0x58] sm:$0xff] %vm401_vm2, %v6162_v7  ;;  %v6990_v39 = vld [vmem:[%s6433_s30 + $0x78] sm:$0xff]   ;;  %v2786_v37 = vrot.slane %v2784_v9, 1 }
  0xb5   : > { %v1121_v49 = vpop.permute.xlu1 %1120  ;;  %v1119_v47 = vpop.permute.xlu0 %1118  ;;  %v2792_v41 = vshll.u32 %v6990_v39, 16 }
  0xb6   : > { %1190 = vst.msk [vmem:[#allocation2 + $0x18] sm:$0xff] %vm8501_vm5, %v1121_v49  ;;  %v3307_v44 = vld [vmem:[#allocation2] sm:$0xff]  ;;  %1189 = vst.msk [vmem:[#allocation2 + $0x10] sm:$0xff] %vm8501_vm5, %v1119_v47  ;;  %v2135_v49 = vsel %vm1064_vm0, %v2132_v28, %v2134_v30  ;;  %v699_v47 = vshrl.u32 %v6901_v26, 16  ;;  %v2790_v51 = vor.u32 %v2788_v35, %v2786_v37  ;;  %v6120_v35 = vld [vmem:[%s6433_s30 + $0x74] sm:$0xff]  }
  0xb7   : > { %2910 = vrot.lane.b32.xlu1 %v2779_v36, %s6347_s10  ;;  %5780 = vmatprep.mubr.msk.bf16.mxu0 %vm8500_vm12, %v3307_v44  ;;  %v2137_v36 = vsel %vm1064_vm0, %v2134_v30, %v2136_v27  ;;  %v703_v44 = vshll.u32 %v6114_v8, 16 }
  0xb8   : > { %2908 = vrot.lane.b32.xlu0 %v2771_v23, %s6347_s10  ;;  %v6110_v23 = vld [vmem:[%s6433_s30 + $0x70] sm:$0xff]  }
  0xb9   : > { %v1386_v53 = vpop.permute.xlu1 %1385  ;;  %v1384_v14 = vpop.permute.xlu0 %1383 }
  0xba   : > { %1455 = vst.msk [vmem:[#allocation2 + $0x18] sm:$0xff] %vm8499_vm6, %v1386_v53  ;;  %v3308_v57 = vld [vmem:[#allocation2 + $0x8] sm:$0xff]  ;;  %1454 = vst.msk [vmem:[#allocation2 + $0x10] sm:$0xff] %vm8499_vm6, %v1384_v14  ;;  %v6113_v53 = vld [vmem:[%s6433_s30 + $0x70] sm:$0xff]  }
  0xbb   : > { %815 = vrot.lane.b32.xlu1 %v690_v29, %s6344_s7  ;;  %5781 = vmatmul.mubr.msk.bf16.vlgmr.msra.gmra.mrb[0].mxu0 %vm8500_vm12, %v3308_v57  ;;  %v7012_v29 = vrot.slane %v2792_v41, 1  ;;  %v701_v57 = vor.u32 %v699_v47, %v6932_v52  ;;  %v3182_v1 = vrot.slane %v6113_v53, 1  ;;  %v6180_v52 = vld [vmem:[%s6433_s30 + $0x68] sm:$0xff]   ;;  %v6132_v53 = vld [vmem:[%s6433_s30 + $0x78] sm:$0xff]  }
  0xbc   : > { %3226 = vrot.lane.b32.xlu0 %v3179_v54, %s6348_s11  ;;  %v705_v54 = vrot.slane %v703_v44, 1  ;;  %415 = vst.msk [vmem:[#allocation2 + $0x68] sm:$0xff] %vm401_vm2, %v6180_v52  ;;  %v7097_v44 = vld [vmem:[%s6433_s30 + $0x88] sm:$0xff]  }
  0xbd   : > { %v1851_v20 = vpop.permute.xlu1 %1850  ;;  %v1849_v18 = vpop.permute.xlu0 %1848  ;;  %v2795_v14 = vsel %vm598_vm1, %v2790_v51, %v7012_v29  ;;  %v3183_v5 = vsel %vm1064_vm0, %v3180_v43, %v3182_v1  ;;  %v2808_v55 = vshll.u32 %v7097_v44, 16 }
  0xbe   : > { %1920 = vst.msk [vmem:[#allocation2 + $0x18] sm:$0xff] %vm8498_vm7, %v1851_v20  ;;  %1919 = vst.msk [vmem:[#allocation2 + $0x10] sm:$0xff] %vm8498_vm7, %v1849_v18  ;;  %v2787_v18 = vsel %vm598_vm1, %v2782_v42, %v2786_v37  ;;  %v706_v3 = vsel %vm598_vm1, %v701_v57, %v705_v54  ;;  %v6124_v37 = vld [vmem:[%s6433_s30 + $0x74] sm:$0xff]  }
  0xbf   : > { %817 = vrot.lane.b32.xlu1 %v698_v12, %s6344_s7  ;;  %v707_v12 = vshrl.u32 %v6114_v8, 16  ;;  %v2138_v47 = vrot.slane %v6124_v37, 1 }
  0xc0   : > { %3228 = vrot.lane.b32.xlu0 %v3181_v61, %s6348_s11  ;;  %v6117_v61 = vld [vmem:[%s6433_s30 + $0x68] sm:$0xff]  }
  0xc1   : > { %v2169_v45 = vpop.permute.xlu1 %2168  ;;  %v2167_v6 = vpop.permute.xlu0 %2166  ;;  %v1090_v21 = vrot.slane %v6117_v61, 1  ;;  %v715_v61 = vshrl.u32 %v7015_v56, 16 }
  0xc2   : > { %2238 = vst.msk [vmem:[#allocation2 + $0x18] sm:$0xff] %vm2234_vm8, %v2169_v45  ;;  %2237 = vst.msk [vmem:[#allocation2 + $0x10] sm:$0xff] %vm2234_vm8, %v2167_v6  ;;  %v709_v45 = vor.u32 %v707_v12, %v705_v54  ;;  %v3184_v6 = vrot.slane %v7029_v58, 1  ;;  %v2796_v54 = vshrl.u32 %v6990_v39, 16  ;;  %v2804_v12 = vshrl.u32 %v6129_v11, 16  ;;  %v7173_v58 = vld [vmem:[%s6433_s30 + $0x8c] sm:$0xff]  }
  0xc3   : > { %1136 = vrot.lane.b32.xlu1 %v1089_v10, %s6343_s6  ;;  %v1091_v8 = vsel %vm1064_vm0, %v1088_v34, %v1090_v21  ;;  %v6119_v34 = vld [vmem:[%s6433_s30 + $0x6c] sm:$0xff]   ;;  %v2139_v39 = vsel %vm1064_vm0, %v2136_v27, %v2138_v47  ;;  %v6131_v27 = vld [vmem:[%s6433_s30 + $0x80] sm:$0xff]  }
  0xc4   : > { %1134 = vrot.lane.b32.xlu0 %v1087_v48, %s6343_s6  ;;  %v6121_v48 = vld [vmem:[%s6433_s30 + $0x74] sm:$0xff]  }
  0xc5   : > { %v2434_v38 = vpop.permute.xlu1 %2433  ;;  %v2432_v15 = vpop.permute.xlu0 %2431  ;;  %v1752_v46 = vshll.u32 %v6121_v48, 16 }
  0xc6   : > { %2503 = vst.msk [vmem:[#allocation2 + $0x18] sm:$0xff] %vm2499_vm9, %v2434_v38  ;;  %2502 = vst.msk [vmem:[#allocation2 + $0x10] sm:$0xff] %vm2499_vm9, %v2432_v15  ;;  %v1092_v38 = vrot.slane %v7038_v24, 1  ;;  %v3185_v15 = vsel %vm1064_vm0, %v3182_v1, %v3184_v6  ;;  %v6195_v1 = vld [vmem:[%s6433_s30 + $0x70] sm:$0xff]  }
  0xc7   : > { %1401 = vrot.lane.b32.xlu1 %v6102_v13, %s6341_s4  ;;  %v7045_v13 = vrot.slane %v711_v19, 1  ;;  %v1754_v9 = vrot.slane %v1752_v46, 1  ;;  %416 = vst.msk [vmem:[#allocation2 + $0x70] sm:$0xff] %vm401_vm2, %v6195_v1  ;;  %v3186_v46 = vrot.slane %v6131_v27, 1 }
  0xc8   : > { %1399 = vrot.lane.b32.xlu0 %v6101_v40, %s6341_s4  ;;  %v1093_v30 = vsel %vm1064_vm0, %v1090_v21, %v1092_v38  ;;  %v723_v21 = vshrl.u32 %v6132_v53, 16 }
  0xc9   : > { %v2899_v4 = vpop.permute.xlu1 %2898  ;;  %v2897_v33 = vpop.permute.xlu0 %2896  ;;  %v714_v40 = vsel %vm598_vm1, %v709_v45, %v7045_v13  ;;  %v2798_v45 = vor.u32 %v2796_v54, %v7012_v29  ;;  %v6138_v54 = vld [vmem:[%s6433_s30 + $0x84] sm:$0xff]  }
  0xca   : > { %2968 = vst.msk [vmem:[#allocation2 + $0x18] sm:$0xff] %vm2964_vm10, %v2899_v4  ;;  %2967 = vst.msk [vmem:[#allocation2 + $0x10] sm:$0xff] %vm2964_vm10, %v2897_v33  ;;  %v1756_v4 = vshrl.u32 %v6121_v48, 16  ;;  %v6198_v48 = vld [vmem:[%s6433_s30 + $0x78] sm:$0xff]  }
  0xcb   : > { %1866 = vrot.lane.b32.xlu1 %v1747_v25, %s6345_s8  ;;  %417 = vst.msk [vmem:[#allocation2 + $0x78] sm:$0xff] %vm401_vm2, %v6198_v48 }
  0xcc   : > { %1864 = vrot.lane.b32.xlu0 %v1739_v32, %s6345_s8  ;;  %v1760_v32 = vshll.u32 %v7062_v16, 16 }
  0xcd   : > { %v804_v2 = vpop.permute.xlu1 %803  ;;  %v3215_v17 = vpop.permute.xlu0 %3214 }
  0xce   : > { %872 = vst.msk [vmem:[#allocation2 + $0x20] sm:$0xff] %vm867_vm4, %v804_v2  ;;  %v7085_v2 = vld [vmem:[%s6433_s30 + $0x7c] sm:$0xff]  }
  0xcf   : > { %2184 = vrot.lane.b32.xlu1 %v2137_v36, %s6342_s5  ;;  %3285 = vst.msk [vmem:[#allocation2 + $0x10] sm:$0xff] %vm3282_vm11, %v3215_v17  ;;  %v1748_v36 = vshrl.u32 %v6943_v59, 16 }
  0xd0   : > { %2182 = vrot.lane.b32.xlu0 %v2135_v49, %s6342_s5  ;;  %v1758_v49 = vor.u32 %v1756_v4, %v1754_v9 }
  0xd1   : > { %v806_v28 = vpop.permute.xlu1 %805  ;;  %v3217_v26 = vpop.permute.xlu0 %3216  ;;  %v1750_v59 = vor.u32 %v1748_v36, %v6976_v50  ;;  %v3187_v36 = vsel %vm1064_vm0, %v3184_v6, %v3186_v46 }
  0xd2   : > { %873 = vst.msk [vmem:[#allocation2 + $0x28] sm:$0xff] %vm867_vm4, %v806_v28  ;;  %v2140_v28 = vrot.slane %v7085_v2, 1 }
  0xd3   : > { %2449 = vrot.lane.b32.xlu1 %v6110_v23, %s6346_s9  ;;  %3286 = vst.msk [vmem:[#allocation2 + $0x18] sm:$0xff] %vm3282_vm11, %v3217_v26  ;;  %v7088_v23 = vrot.slane %v1760_v32, 1  ;;  %v1755_v50 = vsel %vm598_vm1, %v1750_v59, %v1754_v9 }
  0xd4   : > { %2447 = vrot.lane.b32.xlu0 %v6109_v22, %s6346_s9  ;;  %v2800_v22 = vshll.u32 %v6129_v11, 16 }
  0xd5   : > { %v1125_v20 = vpop.permute.xlu1 %1124  ;;  %v1123_v10 = vpop.permute.xlu0 %1122  ;;  %v1763_v51 = vsel %vm598_vm1, %v1758_v49, %v7088_v23 }
  0xd6   : > { %1192 = vst.msk [vmem:[#allocation2 + $0x28] sm:$0xff] %vm8501_vm5, %v1125_v20  ;;  %v3309_v0 = vld [vmem:[#allocation2 + $0x10] sm:$0xff]  ;;  %1191 = vst.msk [vmem:[#allocation2 + $0x20] sm:$0xff] %vm8501_vm5, %v1123_v10  ;;  %v2802_v57 = vrot.slane %v2800_v22, 1  ;;  %v6128_v20 = vld [vmem:[%s6433_s30 + $0x80] sm:$0xff]  }
  0xd7   : > { %2914 = vrot.lane.b32.xlu1 %v2795_v14, %s6347_s10  ;;  %5784 = vmatprep.mubr.msk.bf16.mxu0 %vm8500_vm12, %v3309_v0  ;;  %v2141_v14 = vsel %vm1064_vm0, %v2138_v47, %v2140_v28  ;;  %v6127_v10 = vld [vmem:[%s6433_s30 + $0x78] sm:$0xff]   ;;  %v7124_v0 = vrot.slane %v2808_v55, 1  ;;  %v1764_v55 = vshrl.u32 %v7062_v16, 16 }
  0xd8   : > { %2912 = vrot.lane.b32.xlu0 %v2787_v18, %s6347_s10  ;;  %v719_v18 = vshll.u32 %v6132_v53, 16  ;;  %v2806_v56 = vor.u32 %v2804_v12, %v2802_v57  ;;  %v1776_v53 = vshll.u32 %v7173_v58, 16  ;;  %v7196_v12 = vld [vmem:[%s6433_s30 + $0x8c] sm:$0xff]  }
  0xd9   : > { %v1390_v63 = vpop.permute.xlu1 %1389  ;;  %v1388_v7 = vpop.permute.xlu0 %1387  ;;  %v1766_v16 = vor.u32 %v1764_v55, %v7088_v23 }
  0xda   : > { %1457 = vst.msk [vmem:[#allocation2 + $0x28] sm:$0xff] %vm8499_vm6, %v1390_v63  ;;  %v3310_v62 = vld [vmem:[#allocation2 + $0x18] sm:$0xff]  ;;  %1456 = vst.msk [vmem:[#allocation2 + $0x20] sm:$0xff] %vm8499_vm6, %v1388_v7  ;;  %v2811_v7 = vsel %vm598_vm1, %v2806_v56, %v7124_v0 }
  0xdb   : > { %819 = vrot.lane.b32.xlu1 %v706_v3, %s6344_s7  ;;  %5785 = vmatmul.mubr.msk.bf16.gmra.mrb[4].mxu0 %vm8500_vm12, %v3310_v62  ;;  %v7127_v3 = vld [vmem:[%s6433_s30 + $0x80] sm:$0xff]   ;;  %v717_v62 = vor.u32 %v715_v61, %v7045_v13  ;;  %v6147_v61 = vld [vmem:[%s6433_s30 + $0x90] sm:$0xff]   ;;  %v7212_v56 = vld [vmem:[%s6433_s30 + $0x98] sm:$0xff]  }
  0xdc   : > { %3230 = vrot.lane.b32.xlu0 %v3183_v5, %s6348_s11  ;;  %v721_v5 = vrot.slane %v719_v18, 1  ;;  %v7152_v13 = vld [vmem:[%s6433_s30 + $0x80] sm:$0xff]  }
  0xdd   : > { %v1855_v43 = vpop.permute.xlu1 %1854  ;;  %v1853_v25 = vpop.permute.xlu0 %1852 }
  0xde   : > { %1922 = vst.msk [vmem:[#allocation2 + $0x28] sm:$0xff] %vm8498_vm7, %v1855_v43  ;;  %1921 = vst.msk [vmem:[#allocation2 + $0x20] sm:$0xff] %vm8498_vm7, %v1853_v25  ;;  %v7145_v43 = vld [vmem:[%s6433_s30 + $0x88] sm:$0xff]   ;;  %v2803_v25 = vsel %vm598_vm1, %v2798_v45, %v2802_v57  ;;  %v722_v4 = vsel %vm598_vm1, %v717_v62, %v721_v5  ;;  %v725_v32 = vor.u32 %v723_v21, %v721_v5  ;;  %v2824_v5 = vshll.u32 %v7212_v56, 16 }
  0xdf   : > { %821 = vrot.lane.b32.xlu1 %v714_v40, %s6344_s7  ;;  %v727_v40 = vshll.u32 %v7127_v3, 16  ;;  %v3188_v37 = vrot.slane %v7145_v43, 1  ;;  %v6142_v57 = vld [vmem:[%s6433_s30 + $0x84] sm:$0xff]   ;;  %v7284_v43 = vld [vmem:[%s6433_s30 + $0x9c] sm:$0xff]  }
  0xe0   : > { %3232 = vrot.lane.b32.xlu0 %v3185_v15, %s6348_s11  ;;  %v6135_v15 = vld [vmem:[%s6433_s30 + $0x78] sm:$0xff]   ;;  %v2142_v1 = vrot.slane %v6142_v57, 1 }
  0xe1   : > { %v2173_v33 = vpop.permute.xlu1 %2172  ;;  %v2171_v41 = vpop.permute.xlu0 %2170  ;;  %v1094_v11 = vrot.slane %v6135_v15, 1  ;;  %v6146_v15 = vld [vmem:[%s6433_s30 + $0x90] sm:$0xff]  }
  0xe2   : > { %2240 = vst.msk [vmem:[#allocation2 + $0x28] sm:$0xff] %vm2234_vm8, %v2173_v33  ;;  %2239 = vst.msk [vmem:[#allocation2 + $0x20] sm:$0xff] %vm2234_vm8, %v2171_v41  ;;  %v7157_v33 = vrot.slane %v727_v40, 1  ;;  %v2143_v21 = vsel %vm1064_vm0, %v2140_v28, %v2142_v1  ;;  %v2812_v40 = vshrl.u32 %v7097_v44, 16  ;;  %v6145_v28 = vld [vmem:[%s6433_s30 + $0x88] sm:$0xff]  }
  0xe3   : > { %1140 = vrot.lane.b32.xlu1 %v1093_v30, %s6343_s6 }
  0xe4   : > { %1138 = vrot.lane.b32.xlu0 %v1091_v8, %s6343_s6 }
  0xe5   : > { %v2438_v31 = vpop.permute.xlu1 %2437  ;;  %v2436_v17 = vpop.permute.xlu0 %2435 }
  0xe6   : > { %2505 = vst.msk [vmem:[#allocation2 + $0x28] sm:$0xff] %vm2499_vm9, %v2438_v31  ;;  %2504 = vst.msk [vmem:[#allocation2 + $0x20] sm:$0xff] %vm2499_vm9, %v2436_v17  ;;  %v1096_v31 = vrot.slane %v7152_v13, 1  ;;  %v3189_v17 = vsel %vm1064_vm0, %v3186_v46, %v3188_v37 }
  0xe7   : > { %1405 = vrot.lane.b32.xlu1 %v6120_v35, %s6341_s4  ;;  %v6139_v35 = vld [vmem:[%s6433_s30 + $0x84] sm:$0xff]  }
  0xe8   : > { %1403 = vrot.lane.b32.xlu0 %v6119_v34, %s6341_s4  ;;  %v730_v34 = vsel %vm598_vm1, %v725_v32, %v7157_v33  ;;  %v1768_v59 = vshll.u32 %v6139_v35, 16  ;;  %v1097_v22 = vsel %vm1064_vm0, %v1094_v11, %v1096_v31  ;;  %v2814_v32 = vor.u32 %v2812_v40, %v7124_v0  ;;  %v7310_v40 = vld [vmem:[%s6433_s30 + $0x9c] sm:$0xff]  }
  0xe9   : > { %v2903_v42 = vpop.permute.xlu1 %2902  ;;  %v2901_v26 = vpop.permute.xlu0 %2900 }
  0xea   : > { %2970 = vst.msk [vmem:[#allocation2 + $0x28] sm:$0xff] %vm2964_vm10, %v2903_v42  ;;  %2969 = vst.msk [vmem:[#allocation2 + $0x20] sm:$0xff] %vm2964_vm10, %v2901_v26  ;;  %v1770_v42 = vrot.slane %v1768_v59, 1  ;;  %v1095_v26 = vsel %vm1064_vm0, %v1092_v38, %v1094_v11  ;;  %v6137_v38 = vld [vmem:[%s6433_s30 + $0x7c] sm:$0xff]  }
  0xeb   : > { %1870 = vrot.lane.b32.xlu1 %v1763_v51, %s6345_s8  ;;  %v1772_v51 = vshrl.u32 %v6139_v35, 16  ;;  %v6149_v35 = vld [vmem:[%s6433_s30 + $0x90] sm:$0xff]  }
  0xec   : > { %1868 = vrot.lane.b32.xlu0 %v1755_v50, %s6345_s8  ;;  %v1771_v23 = vsel %vm598_vm1, %v1766_v16, %v1770_v42  ;;  %v3190_v59 = vrot.slane %v6149_v35, 1 }
  0xed   : > { %v808_v19 = vpop.permute.xlu1 %807  ;;  %v3219_v52 = vpop.permute.xlu0 %3218 }
  0xee   : > { %874 = vst.msk [vmem:[#allocation2 + $0x30] sm:$0xff] %vm867_vm4, %v808_v19  ;;  %v1774_v19 = vor.u32 %v1772_v51, %v1770_v42  ;;  %v3191_v55 = vsel %vm1064_vm0, %v3188_v37, %v3190_v59 }
  0xef   : > { %2188 = vrot.lane.b32.xlu1 %v2141_v14, %s6342_s5  ;;  %3287 = vst.msk [vmem:[#allocation2 + $0x20] sm:$0xff] %vm3282_vm11, %v3219_v52  ;;  %v2144_v52 = vrot.slane %v7196_v12, 1 }
  0xf0   : > { %2186 = vrot.lane.b32.xlu0 %v2139_v39, %s6342_s5 }
  0xf1   : > { %v810_v60 = vpop.permute.xlu1 %809  ;;  %v3221_v63 = vpop.permute.xlu0 %3220  ;;  %v2145_v45 = vsel %vm1064_vm0, %v2142_v1, %v2144_v52 }
  0xf2   : > { %875 = vst.msk [vmem:[#allocation2 + $0x38] sm:$0xff] %vm867_vm4, %v810_v60 }
  0xf3   : > { %2453 = vrot.lane.b32.xlu1 %v6128_v20, %s6346_s9  ;;  %3288 = vst.msk [vmem:[#allocation2 + $0x28] sm:$0xff] %vm3282_vm11, %v3221_v63  ;;  %v7199_v20 = vrot.slane %v1776_v53, 1  ;;  %v2820_v63 = vshrl.u32 %v6147_v61, 16  ;;  %v6153_v53 = vld [vmem:[%s6433_s30 + $0x88] sm:$0xff]  }
  0xf4   : > { %2451 = vrot.lane.b32.xlu0 %v6127_v10, %s6346_s9  ;;  %v2816_v10 = vshll.u32 %v6147_v61, 16 }
  0xf5   : > { %v1129_v29 = vpop.permute.xlu1 %1128  ;;  %v1127_v30 = vpop.permute.xlu0 %1126  ;;  %v1779_v18 = vsel %vm598_vm1, %v1774_v19, %v7199_v20 }
  0xf6   : > { %1194 = vst.msk [vmem:[#allocation2 + $0x38] sm:$0xff] %vm8501_vm5, %v1129_v29  ;;  %v3311_v9 = vld [vmem:[#allocation2 + $0x20] sm:$0xff]  ;;  %1193 = vst.msk [vmem:[#allocation2 + $0x30] sm:$0xff] %vm8501_vm5, %v1127_v30  ;;  %v2818_v48 = vrot.slane %v2816_v10, 1 }
  0xf7   : > { %2918 = vrot.lane.b32.xlu1 %v2811_v7, %s6347_s10  ;;  %5788 = vmatprep.mubr.msk.bf16.mxu0 %vm8500_vm12, %v3311_v9  ;;  %v6150_v7 = vld [vmem:[%s6433_s30 + $0x88] sm:$0xff]   ;;  %v6213_v29 = vld [vmem:[%s6433_s30 + $0x80] sm:$0xff]   ;;  %v7235_v9 = vrot.slane %v2824_v5, 1  ;;  %v6156_v5 = vld [vmem:[%s6433_s30 + $0x94] sm:$0xff]  }
  0xf8   : > { %2916 = vrot.lane.b32.xlu0 %v2803_v25, %s6347_s10  ;;  %v731_v25 = vshrl.u32 %v7127_v3, 16  ;;  %v2822_v30 = vor.u32 %v2820_v63, %v2818_v48  ;;  %v735_v2 = vshll.u32 %v6150_v7, 16  ;;  %418 = vst.msk [vmem:[#allocation2 + $0x80] sm:$0xff] %vm401_vm2, %v6213_v29  ;;  %v6216_v3 = vld [vmem:[%s6433_s30 + $0x88] sm:$0xff]   ;;  %v739_v11 = vshrl.u32 %v6150_v7, 16  ;;  %v6165_v29 = vld [vmem:[%s6433_s30 + $0xa0] sm:$0xff]  }
  0xf9   : > { %v1394_v8 = vpop.permute.xlu1 %1393  ;;  %v1392_v41 = vpop.permute.xlu0 %1391  ;;  %419 = vst.msk [vmem:[#allocation2 + $0x88] sm:$0xff] %vm401_vm2, %v6216_v3 }
  0xfa   : > { %1459 = vst.msk [vmem:[#allocation2 + $0x38] sm:$0xff] %vm8499_vm6, %v1394_v8  ;;  %v3312_v49 = vld [vmem:[#allocation2 + $0x28] sm:$0xff]  ;;  %1458 = vst.msk [vmem:[#allocation2 + $0x30] sm:$0xff] %vm8499_vm6, %v1392_v41  ;;  %v2827_v41 = vsel %vm598_vm1, %v2822_v30, %v7235_v9  ;;  %v2148_v30 = vrot.slane %v7310_v40, 1 }
  0xfb   : > { %823 = vrot.lane.b32.xlu1 %v722_v4, %s6344_s7  ;;  %5789 = vmatmul.mubr.msk.bf16.gmra.mrb[8].mxu0 %vm8500_vm12, %v3312_v49  ;;  %v7238_v4 = vld [vmem:[%s6433_s30 + $0x90] sm:$0xff]   ;;  %v737_v49 = vrot.slane %v735_v2, 1  ;;  %v2832_v2 = vshll.u32 %v6165_v29, 16 }
  0xfc   : > { %3234 = vrot.lane.b32.xlu0 %v3187_v36, %s6348_s11  ;;  %v733_v36 = vor.u32 %v731_v25, %v7157_v33  ;;  %v2819_v33 = vsel %vm598_vm1, %v2814_v32, %v2818_v48  ;;  %v1780_v48 = vshrl.u32 %v7173_v58, 16 }
  0xfd   : > { %v1859_v6 = vpop.permute.xlu1 %1858  ;;  %v1857_v47 = vpop.permute.xlu0 %1856  ;;  %v2834_v3 = vrot.slane %v2832_v2, 1 }
  0xfe   : > { %1924 = vst.msk [vmem:[#allocation2 + $0x38] sm:$0xff] %vm8498_vm7, %v1859_v6  ;;  %1923 = vst.msk [vmem:[#allocation2 + $0x30] sm:$0xff] %vm8498_vm7, %v1857_v47  ;;  %v7258_v6 = vld [vmem:[%s6433_s30 + $0x98] sm:$0xff]   ;;  %v738_v51 = vsel %vm598_vm1, %v733_v36, %v737_v49  ;;  %v1782_v58 = vor.u32 %v1780_v48, %v7199_v20 }
  0xff   : > { %825 = vrot.lane.b32.xlu1 %v730_v34, %s6344_s7  ;;  %v743_v34 = vshll.u32 %v7238_v4, 16 }
 0x100   : > { %3236 = vrot.lane.b32.xlu0 %v3189_v17, %s6348_s11 }
 0x101   : > { %v2177_v50 = vpop.permute.xlu1 %2176  ;;  %v2175_v14 = vpop.permute.xlu0 %2174  ;;  %v7264_v42 = vrot.slane %v743_v34, 1  ;;  %v2828_v34 = vshrl.u32 %v7212_v56, 16  ;;  %v6163_v56 = vld [vmem:[%s6433_s30 + $0x98] sm:$0xff]  }
 0x102   : > { %2242 = vst.msk [vmem:[#allocation2 + $0x38] sm:$0xff] %vm2234_vm8, %v2177_v50  ;;  %2241 = vst.msk [vmem:[#allocation2 + $0x30] sm:$0xff] %vm2234_vm8, %v2175_v14  ;;  %v7268_v50 = vld [vmem:[%s6433_s30 + $0x90] sm:$0xff]   ;;  %v3192_v14 = vrot.slane %v7258_v6, 1 }
 0x103   : > { %1144 = vrot.lane.b32.xlu1 %v1097_v22, %s6343_s6  ;;  %v741_v22 = vor.u32 %v739_v11, %v737_v49  ;;  %v7395_v6 = vld [vmem:[%s6433_s30 + $0xac] sm:$0xff]  }
 0x104   : > { %1142 = vrot.lane.b32.xlu0 %v1095_v26, %s6343_s6  ;;  %v6157_v26 = vld [vmem:[%s6433_s30 + $0x94] sm:$0xff]  }
 0x105   : > { %v2442_v24 = vpop.permute.xlu1 %2441  ;;  %v2440_v39 = vpop.permute.xlu0 %2439  ;;  %v746_v61 = vsel %vm598_vm1, %v741_v22, %v7264_v42  ;;  %v1784_v16 = vshll.u32 %v6157_v26, 16  ;;  %v7349_v22 = vld [vmem:[%s6433_s30 + $0xa0] sm:$0xff]  }
 0x106   : > { %2507 = vst.msk [vmem:[#allocation2 + $0x38] sm:$0xff] %vm2499_vm9, %v2442_v24  ;;  %2506 = vst.msk [vmem:[#allocation2 + $0x30] sm:$0xff] %vm2499_vm9, %v2440_v39  ;;  %v1098_v24 = vrot.slane %v6153_v53, 1  ;;  %v3193_v39 = vsel %vm1064_vm0, %v3190_v59, %v3192_v14  ;;  %v6164_v59 = vld [vmem:[%s6433_s30 + $0xa0] sm:$0xff]   ;;  %v2830_v53 = vor.u32 %v2828_v34, %v7235_v9  ;;  %v7421_v34 = vld [vmem:[%s6433_s30 + $0xac] sm:$0xff]  }
 0x107   : > { %1409 = vrot.lane.b32.xlu1 %v6138_v54, %s6341_s4  ;;  %v1786_v10 = vrot.slane %v1784_v16, 1 }
 0x108   : > { %1407 = vrot.lane.b32.xlu0 %v6137_v38, %s6341_s4  ;;  %v1100_v38 = vrot.slane %v7268_v50, 1 }
 0x109   : > { %v2907_v60 = vpop.permute.xlu1 %2906  ;;  %v2905_v27 = vpop.permute.xlu0 %2904  ;;  %v1787_v20 = vsel %vm598_vm1, %v1782_v58, %v1786_v10 }
 0x10a   : > { %2972 = vst.msk [vmem:[#allocation2 + $0x38] sm:$0xff] %vm2964_vm10, %v2907_v60  ;;  %2971 = vst.msk [vmem:[#allocation2 + $0x30] sm:$0xff] %vm2964_vm10, %v2905_v27  ;;  %v1101_v1 = vsel %vm1064_vm0, %v1098_v24, %v1100_v38  ;;  %v1788_v60 = vshrl.u32 %v6157_v26, 16  ;;  %v6167_v26 = vld [vmem:[%s6433_s30 + $0xa0] sm:$0xff]  }
 0x10b   : > { %1874 = vrot.lane.b32.xlu1 %v1779_v18, %s6345_s8  ;;  %v3194_v16 = vrot.slane %v6167_v26, 1 }
 0x10c   : > { %1872 = vrot.lane.b32.xlu0 %v1771_v23, %s6345_s8  ;;  %v1792_v23 = vshll.u32 %v7284_v43, 16  ;;  %v1790_v7 = vor.u32 %v1788_v60, %v1786_v10 }
 0x10d   : > { %v812_v62 = vpop.permute.xlu1 %811  ;;  %v3223_v46 = vpop.permute.xlu0 %3222 }
 0x10e   : > { %876 = vst.msk [vmem:[#allocation2 + $0x40] sm:$0xff] %vm867_vm4, %v812_v62  ;;  %v7306_v62 = vrot.slane %v1792_v23, 1  ;;  %v6171_v23 = vld [vmem:[%s6433_s30 + $0x98] sm:$0xff]  }
 0x10f   : > { %2192 = vrot.lane.b32.xlu1 %v2145_v45, %s6342_s5  ;;  %3289 = vst.msk [vmem:[#allocation2 + $0x30] sm:$0xff] %vm3282_vm11, %v3223_v46  ;;  %v1099_v45 = vsel %vm1064_vm0, %v1096_v31, %v1098_v24  ;;  %v6155_v31 = vld [vmem:[%s6433_s30 + $0x8c] sm:$0xff]   ;;  %v759_v24 = vshll.u32 %v7349_v22, 16 }
 0x110   : > { %2190 = vrot.lane.b32.xlu0 %v2143_v21, %s6342_s5  ;;  %v6160_v21 = vld [vmem:[%s6433_s30 + $0x94] sm:$0xff]  }
 0x111   : > { %v814_v44 = vpop.permute.xlu1 %813  ;;  %v3225_v8 = vpop.permute.xlu0 %3224  ;;  %v2146_v25 = vrot.slane %v6160_v21, 1  ;;  %v7375_v60 = vrot.slane %v759_v24, 1 }
 0x112   : > { %877 = vst.msk [vmem:[#allocation2 + $0x48] sm:$0xff] %vm867_vm4, %v814_v44  ;;  %v7323_v44 = vld [vmem:[%s6433_s30 + $0xa8] sm:$0xff]  }
 0x113   : > { %2457 = vrot.lane.b32.xlu1 %v6146_v15, %s6346_s9  ;;  %3290 = vst.msk [vmem:[#allocation2 + $0x38] sm:$0xff] %vm3282_vm11, %v3225_v8  ;;  %v1795_v15 = vsel %vm598_vm1, %v1790_v7, %v7306_v62  ;;  %v2149_v35 = vsel %vm1064_vm0, %v2146_v25, %v2148_v30  ;;  %v2836_v8 = vshrl.u32 %v6165_v29, 16  ;;  %v2840_v36 = vshll.u32 %v7323_v44, 16 }
 0x114   : > { %2455 = vrot.lane.b32.xlu0 %v6145_v28, %s6346_s9  ;;  %v2147_v11 = vsel %vm1064_vm0, %v2144_v52, %v2146_v25  ;;  %v2844_v24 = vshrl.u32 %v7323_v44, 16  ;;  %v6181_v44 = vld [vmem:[%s6433_s30 + $0xa8] sm:$0xff]  }
 0x115   : > { %v1133_v0 = vpop.permute.xlu1 %1132  ;;  %v1131_v17 = vpop.permute.xlu0 %1130 }
 0x116   : > { %1196 = vst.msk [vmem:[#allocation2 + $0x48] sm:$0xff] %vm8501_vm5, %v1133_v0  ;;  %v3313_v47 = vld [vmem:[#allocation2 + $0x30] sm:$0xff]  ;;  %1195 = vst.msk [vmem:[#allocation2 + $0x40] sm:$0xff] %vm8501_vm5, %v1131_v17  ;;  %v747_v17 = vshrl.u32 %v7238_v4, 16  ;;  %v6224_v4 = vld [vmem:[%s6433_s30 + $0x98] sm:$0xff]  }
 0x117   : > { %2922 = vrot.lane.b32.xlu1 %v2827_v41, %s6347_s10  ;;  %5792 = vmatprep.mubr.msk.bf16.mxu0 %vm8500_vm12, %v3313_v47  ;;  %v6168_v41 = vld [vmem:[%s6433_s30 + $0x98] sm:$0xff]   ;;  %v6223_v0 = vld [vmem:[%s6433_s30 + $0x90] sm:$0xff]   ;;  %v2838_v47 = vor.u32 %v2836_v8, %v2834_v3  ;;  %421 = vst.msk [vmem:[#allocation2 + $0x98] sm:$0xff] %vm401_vm2, %v6224_v4 }
 0x118   : > { %2920 = vrot.lane.b32.xlu0 %v2819_v33, %s6347_s10  ;;  %v751_v12 = vshll.u32 %v6168_v41, 16  ;;  %420 = vst.msk [vmem:[#allocation2 + $0x90] sm:$0xff] %vm401_vm2, %v6223_v0  ;;  %v6183_v0 = vld [vmem:[%s6433_s30 + $0xb0] sm:$0xff]  }
 0x119   : > { %v1398_v54 = vpop.permute.xlu1 %1397  ;;  %v1396_v57 = vpop.permute.xlu0 %1395 }
 0x11a   : > { %1461 = vst.msk [vmem:[#allocation2 + $0x48] sm:$0xff] %vm8499_vm6, %v1398_v54  ;;  %v3314_v19 = vld [vmem:[#allocation2 + $0x38] sm:$0xff]  ;;  %1460 = vst.msk [vmem:[#allocation2 + $0x40] sm:$0xff] %vm8499_vm6, %v1396_v57 }
 0x11b   : > { %827 = vrot.lane.b32.xlu1 %v738_v51, %s6344_s7  ;;  %5793 = vmatmul.mubr.msk.bf16.gmra.mrb[12].mxu0 %vm8500_vm12, %v3314_v19  ;;  %v7346_v51 = vrot.slane %v2840_v36, 1  ;;  %v753_v19 = vrot.slane %v751_v12, 1  ;;  %v6174_v36 = vld [vmem:[%s6433_s30 + $0xa4] sm:$0xff]   ;;  %v2848_v12 = vshll.u32 %v6183_v0, 16 }
 0x11c   : > { %3238 = vrot.lane.b32.xlu0 %v3191_v55, %s6348_s11  ;;  %v749_v55 = vor.u32 %v747_v17, %v7264_v42  ;;  %v2835_v42 = vsel %vm598_vm1, %v2830_v53, %v2834_v3  ;;  %v1796_v3 = vshrl.u32 %v7284_v43, 16 }
 0x11d   : > { %v1863_v37 = vpop.permute.xlu1 %1862  ;;  %v1861_v18 = vpop.permute.xlu0 %1860  ;;  %v2843_v57 = vsel %vm598_vm1, %v2838_v47, %v7346_v51  ;;  %v2152_v47 = vrot.slane %v7421_v34, 1  ;;  %v2850_v4 = vrot.slane %v2848_v12, 1 }
 0x11e   : > { %1926 = vst.msk [vmem:[#allocation2 + $0x48] sm:$0xff] %vm8498_vm7, %v1863_v37  ;;  %1925 = vst.msk [vmem:[#allocation2 + $0x40] sm:$0xff] %vm8498_vm7, %v1861_v18  ;;  %v7369_v37 = vld [vmem:[%s6433_s30 + $0xa8] sm:$0xff]   ;;  %v1798_v43 = vor.u32 %v1796_v3, %v7306_v62 }
 0x11f   : > { %829 = vrot.lane.b32.xlu1 %v746_v61, %s6344_s7  ;;  %v755_v61 = vshrl.u32 %v6168_v41, 16 }
 0x120   : > { %3240 = vrot.lane.b32.xlu0 %v3193_v39, %s6348_s11 }
 0x121   : > { %v2181_v27 = vpop.permute.xlu1 %2180  ;;  %v2179_v63 = vpop.permute.xlu0 %2178  ;;  %v757_v10 = vor.u32 %v755_v61, %v753_v19 }
 0x122   : > { %2244 = vst.msk [vmem:[#allocation2 + $0x48] sm:$0xff] %vm2234_vm8, %v2181_v27  ;;  %2243 = vst.msk [vmem:[#allocation2 + $0x40] sm:$0xff] %vm2234_vm8, %v2179_v63  ;;  %v7379_v27 = vld [vmem:[%s6433_s30 + $0xa0] sm:$0xff]   ;;  %v3195_v63 = vsel %vm1064_vm0, %v3192_v14, %v3194_v16 }
 0x123   : > { %1148 = vrot.lane.b32.xlu1 %v1101_v1, %s6343_s6  ;;  %v754_v1 = vsel %vm598_vm1, %v749_v55, %v753_v19  ;;  %v762_v29 = vsel %vm598_vm1, %v757_v10, %v7375_v60  ;;  %v7460_v10 = vld [vmem:[%s6433_s30 + $0xb0] sm:$0xff]  }
 0x124   : > { %1146 = vrot.lane.b32.xlu0 %v1099_v45, %s6343_s6  ;;  %v6175_v45 = vld [vmem:[%s6433_s30 + $0xa4] sm:$0xff]  }
 0x125   : > { %v2446_v13 = vpop.permute.xlu1 %2445  ;;  %v2444_v46 = vpop.permute.xlu0 %2443  ;;  %v1800_v58 = vshll.u32 %v6175_v45, 16 }
 0x126   : > { %2509 = vst.msk [vmem:[#allocation2 + $0x48] sm:$0xff] %vm2499_vm9, %v2446_v13  ;;  %2508 = vst.msk [vmem:[#allocation2 + $0x40] sm:$0xff] %vm2499_vm9, %v2444_v46  ;;  %v1102_v13 = vrot.slane %v6171_v23, 1  ;;  %v2846_v23 = vor.u32 %v2844_v24, %v7346_v51  ;;  %v6192_v24 = vld [vmem:[%s6433_s30 + $0xb4] sm:$0xff]  }
 0x127   : > { %1413 = vrot.lane.b32.xlu1 %v6156_v5, %s6341_s4  ;;  %v3196_v5 = vrot.slane %v7369_v37, 1  ;;  %v1802_v2 = vrot.slane %v1800_v58, 1  ;;  %v7506_v37 = vld [vmem:[%s6433_s30 + $0xbc] sm:$0xff]  }
 0x128   : > { %1411 = vrot.lane.b32.xlu0 %v6155_v31, %s6341_s4  ;;  %v1104_v31 = vrot.slane %v7379_v27, 1 }
 0x129   : > { %v2911_v28 = vpop.permute.xlu1 %2910  ;;  %v3197_v46 = vsel %vm1064_vm0, %v3194_v16, %v3196_v5  ;;  %v1803_v62 = vsel %vm598_vm1, %v1798_v43, %v1802_v2  ;;  %v6182_v16 = vld [vmem:[%s6433_s30 + $0xb0] sm:$0xff]  }
 0x12a   : > { %2974 = vst.msk [vmem:[#allocation2 + $0x48] sm:$0xff] %vm2964_vm10, %v2911_v28  ;;  %v2909_v32 = vpop.permute.xlu0 %2908  ;;  %v1105_v25 = vsel %vm1064_vm0, %v1102_v13, %v1104_v31  ;;  %v1804_v28 = vshrl.u32 %v6175_v45, 16  ;;  %v6185_v45 = vld [vmem:[%s6433_s30 + $0xb0] sm:$0xff]  }
 0x12b   : > { %1878 = vrot.lane.b32.xlu1 %v1795_v15, %s6345_s8  ;;  %2973 = vst.msk [vmem:[#allocation2 + $0x40] sm:$0xff] %vm2964_vm10, %v2909_v32  ;;  %v3198_v58 = vrot.slane %v6185_v45, 1  ;;  %v7550_v45 = vld [vmem:[%s6433_s30 + $0xc8] sm:$0xff]  }
 0x12c   : > { %1876 = vrot.lane.b32.xlu0 %v1787_v20, %s6345_s8  ;;  %v1808_v20 = vshll.u32 %v7395_v6, 16  ;;  %v1806_v41 = vor.u32 %v1804_v28, %v1802_v2 }
 0x12d   : > { %v816_v49 = vpop.permute.xlu1 %815 }
 0x12e   : > { %878 = vst.msk [vmem:[#allocation2 + $0x50] sm:$0xff] %vm867_vm4, %v816_v49  ;;  %v3227_v33 = vpop.permute.xlu0 %3226  ;;  %v7417_v49 = vrot.slane %v1808_v20, 1  ;;  %v6189_v20 = vld [vmem:[%s6433_s30 + $0xa8] sm:$0xff]  }
 0x12f   : > { %2196 = vrot.lane.b32.xlu1 %v2149_v35, %s6342_s5  ;;  %3291 = vst.msk [vmem:[#allocation2 + $0x40] sm:$0xff] %vm3282_vm11, %v3227_v33  ;;  %v1103_v35 = vsel %vm1064_vm0, %v1100_v38, %v1102_v13  ;;  %v6173_v38 = vld [vmem:[%s6433_s30 + $0x9c] sm:$0xff]   ;;  %v775_v13 = vshll.u32 %v7460_v10, 16 }
 0x130   : > { %2194 = vrot.lane.b32.xlu0 %v2147_v11, %s6342_s5  ;;  %v6178_v11 = vld [vmem:[%s6433_s30 + $0xa4] sm:$0xff]  }
 0x131   : > { %v818_v52 = vpop.permute.xlu1 %817  ;;  %v2150_v17 = vrot.slane %v6178_v11, 1  ;;  %v7486_v28 = vrot.slane %v775_v13, 1 }
 0x132   : > { %879 = vst.msk [vmem:[#allocation2 + $0x58] sm:$0xff] %vm867_vm4, %v818_v52  ;;  %v3229_v54 = vpop.permute.xlu0 %3228  ;;  %v7434_v52 = vld [vmem:[%s6433_s30 + $0xb8] sm:$0xff]  }
 0x133   : > { %2461 = vrot.lane.b32.xlu1 %v6164_v59, %s6346_s9  ;;  %3292 = vst.msk [vmem:[#allocation2 + $0x48] sm:$0xff] %vm3282_vm11, %v3229_v54  ;;  %v1811_v59 = vsel %vm598_vm1, %v1806_v41, %v7417_v49  ;;  %v2153_v26 = vsel %vm1064_vm0, %v2150_v17, %v2152_v47  ;;  %v2852_v54 = vshrl.u32 %v6183_v0, 16  ;;  %v2856_v55 = vshll.u32 %v7434_v52, 16 }
 0x134   : > { %2459 = vrot.lane.b32.xlu0 %v6163_v56, %s6346_s9  ;;  %v2151_v61 = vsel %vm1064_vm0, %v2148_v30, %v2150_v17  ;;  %v3653_v17 = vlaneseq }
 0x135   : > { %v1137_v9 = vpop.permute.xlu1 %1136 }
 0x136   : > { %1198 = vst.msk [vmem:[#allocation2 + $0x58] sm:$0xff] %vm8501_vm5, %v1137_v9  ;;  %v1135_v39 = vpop.permute.xlu0 %1134  ;;  %v3315_v18 = vld [vmem:[#allocation2 + $0x40] sm:$0xff] }
 0x137   : > { %2926 = vrot.lane.b32.xlu1 %v2843_v57, %s6347_s10  ;;  %1197 = vst.msk [vmem:[#allocation2 + $0x50] sm:$0xff] %vm8501_vm5, %v1135_v39  ;;  %5796 = vmatprep.mubr.msk.bf16.mxu0 %vm8500_vm12, %v3315_v18  ;;  %v6186_v57 = vld [vmem:[%s6433_s30 + $0xa8] sm:$0xff]   ;;  %v6225_v9 = vld [vmem:[%s6433_s30 + $0xa0] sm:$0xff]   ;;  %v763_v39 = vshrl.u32 %v7349_v22, 16  ;;  %v2854_v18 = vor.u32 %v2852_v54, %v2850_v4  ;;  %v1812_v54 = vshrl.u32 %v7395_v6, 16 }
 0x138   : > { %2924 = vrot.lane.b32.xlu0 %v2835_v42, %s6347_s10  ;;  %v767_v40 = vshll.u32 %v6186_v57, 16  ;;  %422 = vst.msk [vmem:[#allocation2 + $0xa0] sm:$0xff] %vm401_vm2, %v6225_v9  ;;  %v6226_v22 = vld [vmem:[%s6433_s30 + $0xa8] sm:$0xff]   ;;  %v7532_v9 = vshrl.u32 %v3653_v17, 7  ;;  %v6203_v17 = vld [vmem:[%s6433_s30 + $0xc0] sm:$0xff]  }
 0x139   : > { %v1402_v48 = vpop.permute.xlu1 %1401  ;;  %423 = vst.msk [vmem:[#allocation2 + $0xa8] sm:$0xff] %vm401_vm2, %v6226_v22  ;;  %v1814_v6 = vor.u32 %v1812_v54, %v7417_v49 }
 0x13a   : > { %1463 = vst.msk [vmem:[#allocation2 + $0x58] sm:$0xff] %vm8499_vm6, %v1402_v48  ;;  %v1400_v7 = vpop.permute.xlu0 %1399  ;;  %v3316_v21 = vld [vmem:[#allocation2 + $0x48] sm:$0xff] }
 0x13b   : > { %831 = vrot.lane.b32.xlu1 %v754_v1, %s6344_s7  ;;  %1462 = vst.msk [vmem:[#allocation2 + $0x50] sm:$0xff] %vm8499_vm6, %v1400_v7  ;;  %5797 = vmatmul.mubr.msk.bf16.gmra.mrb[16].mxu0 %vm8500_vm12, %v3316_v21  ;;  %v7457_v1 = vrot.slane %v2856_v55, 1  ;;  %v769_v21 = vrot.slane %v767_v40, 1  ;;  %v6196_v55 = vld [vmem:[%s6433_s30 + $0xb4] sm:$0xff]  }
 0x13c   : > { %3242 = vrot.lane.b32.xlu0 %v3195_v63, %s6348_s11  ;;  %v765_v63 = vor.u32 %v763_v39, %v7375_v60  ;;  %v2851_v60 = vsel %vm598_vm1, %v2846_v23, %v2850_v4  ;;  %v2154_v39 = vrot.slane %v6196_v55, 1 }
 0x13d   : > { %v1867_v14 = vpop.permute.xlu1 %1866  ;;  %v2859_v7 = vsel %vm598_vm1, %v2854_v18, %v7457_v1 }
 0x13e   : > { %1928 = vst.msk [vmem:[#allocation2 + $0x58] sm:$0xff] %vm8498_vm7, %v1867_v14  ;;  %v1865_v15 = vpop.permute.xlu0 %1864  ;;  %v7480_v14 = vld [vmem:[%s6433_s30 + $0xb8] sm:$0xff]  }
 0x13f   : > { %833 = vrot.lane.b32.xlu1 %v762_v29, %s6344_s7  ;;  %1927 = vst.msk [vmem:[#allocation2 + $0x50] sm:$0xff] %vm8498_vm7, %v1865_v15  ;;  %v771_v29 = vshrl.u32 %v6186_v57, 16  ;;  %v7527_v57 = vld [vmem:[%s6433_s30 + $0xbc] sm:$0xff]  }
 0x140   : > { %3244 = vrot.lane.b32.xlu0 %v3197_v46, %s6348_s11  ;;  %v2156_v18 = vrot.slane %v7527_v57, 1 }
 0x141   : > { %v2185_v32 = vpop.permute.xlu1 %2184  ;;  %v773_v2 = vor.u32 %v771_v29, %v769_v21  ;;  %v7560_v29 = vld [vmem:[%s6433_s30 + $0xb8] sm:$0xff]  }
 0x142   : > { %2246 = vst.msk [vmem:[#allocation2 + $0x58] sm:$0xff] %vm2234_vm8, %v2185_v32  ;;  %v2183_v8 = vpop.permute.xlu0 %2182  ;;  %v7490_v32 = vld [vmem:[%s6433_s30 + $0xb0] sm:$0xff]  }
 0x143   : > { %1152 = vrot.lane.b32.xlu1 %v1105_v25, %s6343_s6  ;;  %2245 = vst.msk [vmem:[#allocation2 + $0x50] sm:$0xff] %vm2234_vm8, %v2183_v8  ;;  %v770_v25 = vsel %vm598_vm1, %v765_v63, %v769_v21  ;;  %v3199_v8 = vsel %vm1064_vm0, %v3196_v5, %v3198_v58  ;;  %v778_v0 = vsel %vm598_vm1, %v773_v2, %v7486_v28 }
 0x144   : > { %1150 = vrot.lane.b32.xlu0 %v1103_v35, %s6343_s6  ;;  %v6193_v35 = vld [vmem:[%s6433_s30 + $0xb4] sm:$0xff]  }
 0x145   : > { %v2450_v50 = vpop.permute.xlu1 %2449  ;;  %v1816_v43 = vshll.u32 %v6193_v35, 16 }
 0x146   : > { %2511 = vst.msk [vmem:[#allocation2 + $0x58] sm:$0xff] %vm2499_vm9, %v2450_v50  ;;  %v2448_v33 = vpop.permute.xlu0 %2447  ;;  %v1106_v50 = vrot.slane %v6189_v20, 1  ;;  %v2155_v20 = vsel %vm1064_vm0, %v2152_v47, %v2154_v39 }
 0x147   : > { %1417 = vrot.lane.b32.xlu1 %v6174_v36, %s6341_s4  ;;  %2510 = vst.msk [vmem:[#allocation2 + $0x50] sm:$0xff] %vm2499_vm9, %v2448_v33  ;;  %v3200_v36 = vrot.slane %v7480_v14, 1 }
 0x148   : > { %1415 = vrot.lane.b32.xlu0 %v6173_v38, %s6341_s4  ;;  %v1108_v38 = vrot.slane %v7490_v32, 1  ;;  %v1107_v4 = vsel %vm1064_vm0, %v1104_v31, %v1106_v50  ;;  %v6191_v31 = vld [vmem:[%s6433_s30 + $0xac] sm:$0xff]  }
 0x149   : > { %v2915_v56 = vpop.permute.xlu1 %2914  ;;  %v3201_v33 = vsel %vm1064_vm0, %v3198_v58, %v3200_v36  ;;  %v2872_v58 = vshll.u32 %v7550_v45, 16  ;;  %v6217_v32 = vld [vmem:[%s6433_s30 + $0xc8] sm:$0xff]  }
 0x14a   : > { %2976 = vst.msk [vmem:[#allocation2 + $0x58] sm:$0xff] %vm2964_vm10, %v2915_v56  ;;  %v2913_v53 = vpop.permute.xlu0 %2912  ;;  %v1109_v12 = vsel %vm1064_vm0, %v1106_v50, %v1108_v38  ;;  %v1818_v56 = vrot.slane %v1816_v43, 1 }
 0x14b   : > { %1882 = vrot.lane.b32.xlu1 %v1811_v59, %s6345_s8  ;;  %2975 = vst.msk [vmem:[#allocation2 + $0x50] sm:$0xff] %vm2964_vm10, %v2913_v53  ;;  %v1824_v53 = vshll.u32 %v7506_v37, 16  ;;  %v7594_v47 = vrot.slane %v2872_v58, 1 }
 0x14c   : > { %1880 = vrot.lane.b32.xlu0 %v1803_v62, %s6345_s8  ;;  %v1820_v62 = vshrl.u32 %v6193_v35, 16  ;;  %v1819_v22 = vsel %vm598_vm1, %v1814_v6, %v1818_v56  ;;  %v2860_v35 = vshrl.u32 %v7434_v52, 16  ;;  %v6206_v52 = vld [vmem:[%s6433_s30 + $0xc0] ss:$0 sps:$4 sm:$0x11]   ;;  %v7626_v6 = vld [vmem:[%s6433_s30 + $0xc4] sm:$0xff]  }
 0x14d   : > { %v820_v19 = vpop.permute.xlu1 %819  ;;  %v791_v55 = vshll.u32 %v6206_v52, 16 }
 0x14e   : > { %880 = vst.msk [vmem:[#allocation2 + $0x60] sm:$0xff] %vm867_vm4, %v820_v19  ;;  %v3231_v42 = vpop.permute.xlu0 %3230  ;;  %v6201_v19 = vld [vmem:[%s6433_s30 + $0xc0] sm:$0xff]  }
 0x14f   : > { %2200 = vrot.lane.b32.xlu1 %v2153_v26, %s6342_s5  ;;  %3293 = vst.msk [vmem:[#allocation2 + $0x50] sm:$0xff] %vm3282_vm11, %v3231_v42  ;;  %v1822_v42 = vor.u32 %v1820_v62, %v1818_v56  ;;  %v2864_v40 = vshll.u32 %v6201_v19, 16  ;;  %v2868_v21 = vshrl.u32 %v6201_v19, 16  ;;  %v6228_v56 = vld [vmem:[%s6433_s30 + $0xb8] sm:$0xff]  }
 0x150   : > { %2198 = vrot.lane.b32.xlu0 %v2151_v61, %s6342_s5  ;;  %425 = vst.msk [vmem:[#allocation2 + $0xb8] sm:$0xff] %vm401_vm2, %v6228_v56  ;;  %v7688_v56 = vld [vmem:[%s6433_s30 + $0xd0] sm:$0xff]  }
 0x151   : > { %v822_v30 = vpop.permute.xlu1 %821  ;;  %v2866_v63 = vrot.slane %v2864_v40, 1 }
 0x152   : > { %881 = vst.msk [vmem:[#allocation2 + $0x68] sm:$0xff] %vm867_vm4, %v822_v30  ;;  %v3233_v48 = vpop.permute.xlu0 %3232 }
 0x153   : > { %2465 = vrot.lane.b32.xlu1 %v6182_v16, %s6346_s9  ;;  %3294 = vst.msk [vmem:[#allocation2 + $0x58] sm:$0xff] %vm3282_vm11, %v3233_v48  ;;  %v7535_v16 = vrot.slane %v1824_v53, 1  ;;  %v2157_v48 = vsel %vm1064_vm0, %v2154_v39, %v2156_v18  ;;  %v2870_v34 = vor.u32 %v2868_v21, %v2866_v63 }
 0x154   : > { %2463 = vrot.lane.b32.xlu0 %v6181_v44, %s6346_s9  ;;  %v7544_v44 = vadd.s32 16, %v7532_v9 }
 0x155   : > { %v1141_v51 = vpop.permute.xlu1 %1140  ;;  %v1827_v23 = vsel %vm598_vm1, %v1822_v42, %v7535_v16  ;;  %v2875_v54 = vsel %vm598_vm1, %v2870_v34, %v7594_v47  ;;  %v1836_v34 = vshrl.u32 %v7626_v6, 16 }
 0x156   : > { %1200 = vst.msk [vmem:[#allocation2 + $0x68] sm:$0xff] %vm8501_vm5, %v1141_v51  ;;  %v1139_v46 = vpop.permute.xlu0 %1138  ;;  %v3317_v15 = vld [vmem:[#allocation2 + $0x50] sm:$0xff]  ;;  %v7563_v13 = vmul.u32.u64.low 2863311531, %v7544_v44  ;;  %v7564_v51 = vmul.u32.u64.high 2863311531, %v7544_v44, %v7563_v13 }
 0x157   : > { %2930 = vrot.lane.b32.xlu1 %v2859_v7, %s6347_s10  ;;  %1199 = vst.msk [vmem:[#allocation2 + $0x60] sm:$0xff] %vm8501_vm5, %v1139_v46  ;;  %5800 = vmatprep.mubr.msk.bf16.mxu0 %vm8500_vm12, %v3317_v15  ;;  %v7572_v46 = vmul.u32.u64.low 2863311531, %v7532_v9  ;;  %v7573_v15 = vmul.u32.u64.high 2863311531, %v7532_v9, %v7572_v46 }
 0x158   : > { %2928 = vrot.lane.b32.xlu0 %v2851_v60, %s6347_s10  ;;  %v7567_v60 = vadd.s32 8, %v7532_v9  ;;  %v1832_v46 = vshll.u32 %v7626_v6, 16 }
 0x159   : > { %v1406_v3 = vpop.permute.xlu1 %1405  ;;  %v3708_v19 = vshrl.u32 %v7573_v15, 4 }
 0x15a   : > { %1465 = vst.msk [vmem:[#allocation2 + $0x68] sm:$0xff] %vm8499_vm6, %v1406_v3  ;;  %v1404_v41 = vpop.permute.xlu0 %1403  ;;  %v3318_v11 = vld [vmem:[#allocation2 + $0x58] sm:$0xff]  ;;  %v6227_v3 = vld [vmem:[%s6433_s30 + $0xb0] sm:$0xff]   ;;  %v7590_v50 = vmul.u32.u64.low 2863311531, %v7567_v60  ;;  %v7591_v43 = vmul.u32.u64.high 2863311531, %v7567_v60, %v7590_v50 }
 0x15b   : > { %835 = vrot.lane.b32.xlu1 %v770_v25, %s6344_s7  ;;  %1464 = vst.msk [vmem:[#allocation2 + $0x60] sm:$0xff] %vm8499_vm6, %v1404_v41  ;;  %5801 = vmatmul.mubr.msk.bf16.gmra.mrb[20].mxu0 %vm8500_vm12, %v3318_v11  ;;  %v7576_v25 = vadd.s32 24, %v7532_v9  ;;  %v6200_v41 = vld [vmem:[%s6433_s30 + $0xc0] sm:$0xff]   ;;  %v779_v11 = vshrl.u32 %v7460_v10, 16  ;;  %v1834_v50 = vrot.slane %v1832_v46, 1  ;;  %v7769_v46 = vadd.s32 40, %v7532_v9 }
 0x15c   : > { %3246 = vrot.lane.b32.xlu0 %v3199_v8, %s6348_s11  ;;  %424 = vst.msk [vmem:[#allocation2 + $0xb0] sm:$0xff] %vm401_vm2, %v6227_v3 }
 0x15d   : > { %v1871_v5 = vpop.permute.xlu1 %1870  ;;  %v781_v53 = vor.u32 %v779_v11, %v7486_v28 }
 0x15e   : > { %1930 = vst.msk [vmem:[#allocation2 + $0x68] sm:$0xff] %vm8498_vm7, %v1871_v5  ;;  %v1869_v59 = vpop.permute.xlu0 %1868 }
 0x15f   : > { %837 = vrot.lane.b32.xlu1 %v778_v0, %s6344_s7  ;;  %1929 = vst.msk [vmem:[#allocation2 + $0x60] sm:$0xff] %vm8498_vm7, %v1869_v59  ;;  %v783_v0 = vshll.u32 %v7560_v29, 16  ;;  %v6199_v59 = vld [vmem:[%s6433_s30 + $0xb8] sm:$0xff]  }
 0x160   : > { %3248 = vrot.lane.b32.xlu0 %v3201_v33, %s6348_s11  ;;  %v7598_v5 = vmul.u32.u64.low 2863311531, %v7576_v25  ;;  %v7599_v33 = vmul.u32.u64.high 2863311531, %v7576_v25, %v7598_v5 }
 0x161   : > { %v2189_v26 = vpop.permute.xlu1 %2188 }
 0x162   : > { %2248 = vst.msk [vmem:[#allocation2 + $0x68] sm:$0xff] %vm2234_vm8, %v2189_v26  ;;  %v2187_v61 = vpop.permute.xlu0 %2186  ;;  %v785_v26 = vrot.slane %v783_v0, 1  ;;  %v1828_v0 = vshrl.u32 %v7506_v37, 16 }
 0x163   : > { %1156 = vrot.lane.b32.xlu1 %v1109_v12, %s6343_s6  ;;  %2247 = vst.msk [vmem:[#allocation2 + $0x60] sm:$0xff] %vm2234_vm8, %v2187_v61  ;;  %v2862_v12 = vor.u32 %v2860_v35, %v7457_v1  ;;  %v787_v1 = vshrl.u32 %v7560_v29, 16  ;;  %v3202_v61 = vrot.slane %v6203_v17, 1 }
 0x164   : > { %1154 = vrot.lane.b32.xlu0 %v1107_v4, %s6343_s6  ;;  %v3730_v4 = vshrl.u32 %v7564_v51, 4 }
 0x165   : > { %v2454_v27 = vpop.permute.xlu1 %2453  ;;  %v2867_v42 = vsel %vm598_vm1, %v2862_v12, %v2866_v63  ;;  %v3709_v63 = vmul.u32 24, %v3708_v19  ;;  %v3203_v29 = vsel %vm1064_vm0, %v3200_v36, %v3202_v61  ;;  %v6212_v36 = vld [vmem:[%s6433_s30 + $0xcc] ss:$0 sps:$4 sm:$0x11]  }
 0x166   : > { %2513 = vst.msk [vmem:[#allocation2 + $0x68] sm:$0xff] %vm2499_vm9, %v2454_v27  ;;  %v2452_v30 = vpop.permute.xlu0 %2451  ;;  %v6207_v27 = vld [vmem:[%s6433_s30 + $0xb8] sm:$0xff]   ;;  %v1840_v5 = vshll.u32 %v6212_v36, 16  ;;  %v6215_v12 = vld [vmem:[%s6433_s30 + $0xcc] ss:$0 sps:$4 sm:$0x11]  }
 0x167   : > { %1421 = vrot.lane.b32.xlu1 %v6192_v24, %s6341_s4  ;;  %2512 = vst.msk [vmem:[#allocation2 + $0x60] sm:$0xff] %vm2499_vm9, %v2452_v30  ;;  %v7619_v24 = vld [vmem:[%s6433_s30 + $0xc8] sm:$0xff]   ;;  %v786_v30 = vsel %vm598_vm1, %v781_v53, %v785_v26  ;;  %v1110_v51 = vrot.slane %v6207_v27, 1  ;;  %v7650_v3 = vsub.s32 %v7532_v9, %v3709_v63 }
 0x168   : > { %1419 = vrot.lane.b32.xlu0 %v6191_v31, %s6341_s4  ;;  %v6208_v31 = vld [vmem:[%s6433_s30 + $0xc0] ss:$0 sps:$4 sm:$0x11]   ;;  %v3204_v13 = vrot.slane %v7619_v24, 1  ;;  %v6210_v53 = vld [vmem:[%s6433_s30 + $0xc4] sm:$0xff]  }
 0x169   : > { %v2919_v49 = vpop.permute.xlu1 %2918  ;;  %v1112_v58 = vrot.slane %v6208_v31, 1  ;;  %vm4230_vm15 = vcmp.ne.s32.totalorder %v7650_v3, 0  ;;  %vm4278_vm2 = vcmp.lt.s32.totalorder %v7650_v3, 0  ;;  %v2880_v31 = vshll.u32 %v7688_v56, 16 }
 0x16a   : > { %2978 = vst.msk [vmem:[#allocation2 + $0x68] sm:$0xff] %vm2964_vm10, %v2919_v49  ;;  %v2917_v7 = vpop.permute.xlu0 %2916  ;;  %v3719_v49 = vshrl.u32 %v7591_v43, 4 }
 0x16b   : > { %1886 = vrot.lane.b32.xlu1 %v1827_v23, %s6345_s8  ;;  %2977 = vst.msk [vmem:[#allocation2 + $0x60] sm:$0xff] %vm2964_vm10, %v2917_v7  ;;  %v3731_v23 = vmul.u32 24, %v3730_v4  ;;  %v3741_v7 = vshrl.u32 %v7599_v33, 4  ;;  %v1113_v11 = vsel %vm1064_vm0, %v1110_v51, %v1112_v58  ;;  %v1842_v4 = vrot.slane %v1840_v5, 1 }
 0x16c   : > { %1884 = vrot.lane.b32.xlu0 %v1819_v22, %s6345_s8  ;;  %v789_v22 = vor.u32 %v787_v1, %v785_v26  ;;  %v3720_v35 = vmul.u32 24, %v3719_v49  ;;  %v1830_v26 = vor.u32 %v1828_v0, %v7535_v16  ;;  %v7766_v58 = vrot.slane %v2880_v31, 1 }
 0x16d   : > { %v824_v2 = vpop.permute.xlu1 %823 }
 0x16e   : > { %882 = vst.msk [vmem:[#allocation2 + $0x70] sm:$0xff] %vm867_vm4, %v824_v2  ;;  %v3235_v8 = vpop.permute.xlu0 %3234  ;;  %v7664_v52 = vsub.s32 %v7567_v60, %v3720_v35  ;;  %v1111_v60 = vsel %vm1064_vm0, %v1108_v38, %v1110_v51  ;;  %v1838_v38 = vor.u32 %v1836_v34, %v1834_v50  ;;  %v2876_v34 = vshrl.u32 %v7550_v45, 16 }
 0x16f   : > { %2204 = vrot.lane.b32.xlu1 %v2157_v48, %s6342_s5  ;;  %3295 = vst.msk [vmem:[#allocation2 + $0x60] sm:$0xff] %vm3282_vm11, %v3235_v8  ;;  %v793_v48 = vrot.slane %v791_v55, 1  ;;  %v3742_v8 = vmul.u32 24, %v3741_v7 }
 0x170   : > { %2202 = vrot.lane.b32.xlu0 %v2155_v20, %s6342_s5  ;;  %v7643_v20 = vsub.s32 %v7544_v44, %v3731_v23  ;;  %v3205_v44 = vsel %vm1064_vm0, %v3202_v61, %v3204_v13  ;;  %v4375_v19 = vadd.s32 24, %v7664_v52  ;;  %v1835_v23 = vsel %vm598_vm1, %v1830_v26, %v1834_v50 }
 0x171   : > { %v826_v10 = vpop.permute.xlu1 %825  ;;  %v794_v14 = vsel %vm598_vm1, %v789_v22, %v793_v48  ;;  %v7670_v37 = vsub.s32 %v7576_v25, %v3742_v8  ;;  %v4374_v25 = vadd.s32 24, %v7650_v3  ;;  %v1843_v49 = vsel %vm598_vm1, %v1838_v38, %v1842_v4 }
 0x172   : > { %883 = vst.msk [vmem:[#allocation2 + $0x78] sm:$0xff] %vm867_vm4, %v826_v10  ;;  %v3237_v62 = vpop.permute.xlu0 %3236  ;;  %vm4232_vm13 = vcmp.ne.s32.totalorder %v7643_v20, 0  ;;  %vm4280_vm14 = vcmp.lt.s32.totalorder %v7643_v20, 0  ;;  %v4376_v10 = vadd.s32 24, %v7643_v20  ;;  %v7744_v22 = vadd.s32 32, %v7532_v9 }
 0x173   : > { %2469 = vrot.lane.b32.xlu1 %v6200_v41, %s6346_s9  ;;  %3296 = vst.msk [vmem:[#allocation2 + $0x68] sm:$0xff] %vm3282_vm11, %v3237_v62  ;;  %vm7681_vm3 = vmand %vm4280_vm14, %vm4232_vm13  ;;  %vm4231_vm14 = vcmp.ne.s32.totalorder %v7664_v52, 0  ;;  %v4377_v61 = vadd.s32 24, %v7670_v37 }
 0x174   : > { %2467 = vrot.lane.b32.xlu0 %v6199_v59, %s6346_s9  ;;  %v7675_v59 = vld [vmem:[%s6433_s30 + $0xc4] sm:$0xff]   ;;  %vm7697_vm13 = vmand %vm4278_vm2, %vm4230_vm15  ;;  %v4424_v1 = vsel %vm7681_vm3, %v4376_v10, %v7643_v20  ;;  %v6218_v10 = vld [vmem:[%s6433_s30 + $0xd0] sm:$0xff]  }
 0x175   : > { %v1145_v28 = vpop.permute.xlu1 %1144  ;;  %v2158_v55 = vrot.slane %v7675_v59, 1 }
 0x176   : > { %1202 = vst.msk [vmem:[#allocation2 + $0x78] sm:$0xff] %vm8501_vm5, %v1145_v28  ;;  %v1143_v39 = vpop.permute.xlu0 %1142  ;;  %v3319_v40 = vld [vmem:[#allocation2 + $0x60] sm:$0xff]  ;;  %v4422_v28 = vsel %vm7697_vm13, %v4374_v25, %v7650_v3  ;;  %v7783_v3 = vmul.u32.u64.low 2863311531, %v7744_v22  ;;  %v7784_v8 = vmul.u32.u64.high 2863311531, %v7744_v22, %v7783_v3  ;;  %vm8520_vm13 = vcmask 293888  }
 0x177   : > { %2934 = vrot.lane.b32.xlu1 %v2875_v54, %s6347_s10  ;;  %1201 = vst.msk [vmem:[#allocation2 + $0x70] sm:$0xff] %vm8501_vm5, %v1143_v39  ;;  %5804 = vmatprep.mubr.msk.bf16.mxu1 %vm8500_vm12, %v3319_v40  ;;  %v6209_v54 = vld [vmem:[%s6433_s30 + $0xbc] sm:$0xff]   ;;  %v6220_v40 = vld [vmem:[%s6433_s30 + $0xd8] ss:$0 sps:$4 sm:$0x11]   ;;  %v2159_v50 = vsel %vm1064_vm0, %v2156_v18, %v2158_v55 }
 0x178   : > { %2932 = vrot.lane.b32.xlu0 %v2867_v42, %s6347_s10  ;;  %v2160_v42 = vrot.slane %v6215_v12, 1  ;;  %v2888_v20 = vshll.u32 %v6220_v40, 16  ;;  %v6222_v25 = vld [vmem:[%s6433_s30 + $0xd8] ss:$0 sps:$4 sm:$0x11]   ;;  %v3752_v31 = vshrl.u32 %v7784_v8, 4 }
 0x179   : > { %v1410_v21 = vpop.permute.xlu1 %1409  ;;  %v3208_v27 = vrot.slane %v6222_v25, 1 }
 0x17a   : > { %1467 = vst.msk [vmem:[#allocation2 + $0x78] sm:$0xff] %vm8499_vm6, %v1410_v21  ;;  %v1408_v15 = vpop.permute.xlu0 %1407  ;;  %v3320_v2 = vld [vmem:[#allocation2 + $0x68] sm:$0xff]  ;;  %v2161_v51 = vsel %vm1064_vm0, %v2158_v55, %v2160_v42  ;;  %v2890_v59 = vrot.slane %v2888_v20, 1  ;;  %v3753_v3 = vmul.u32 24, %v3752_v31 }
 0x17b   : > { %839 = vrot.lane.b32.xlu1 %v786_v30, %s6344_s7  ;;  %1466 = vst.msk [vmem:[#allocation2 + $0x70] sm:$0xff] %vm8499_vm6, %v1408_v15  ;;  %5805 = vmatmul.mubr.msk.bf16.vlgmr.msra.gmra.mrb[0].mxu1 %vm8500_vm12, %v3320_v2  ;;  %vm4233_vm6 = vcmp.ne.s32.totalorder %v7670_v37, 0  ;;  %vm4281_vm12 = vcmp.lt.s32.totalorder %v7670_v37, 0  ;;  %v7738_v30 = vadd.s32 48, %v7532_v9  ;;  %v2884_v2 = vshrl.u32 %v7688_v56, 16 }
 0x17c   : > { %3250 = vrot.lane.b32.xlu0 %v3203_v29, %s6348_s11  ;;  %vm7732_vm2 = vmand %vm4281_vm12, %vm4233_vm6  ;;  %vm7747_vm6 = vcmp.lt.s32.totalorder %v4424_v1, 16  ;;  %v3754_v24 = vsub.s32 %v7744_v22, %v3753_v3 }
 0x17d   : > { %v1875_v41 = vpop.permute.xlu1 %1874  ;;  %v4425_v29 = vsel %vm7732_vm2, %v4377_v61, %v7670_v37  ;;  %v2886_v45 = vor.u32 %v2884_v2, %v7766_v58 }
 0x17e   : > { %1932 = vst.msk [vmem:[#allocation2 + $0x78] sm:$0xff] %vm8498_vm7, %v1875_v41  ;;  %v1873_v43 = vpop.permute.xlu0 %1872  ;;  %v7787_v41 = vadd.s32 56, %v7532_v9  ;;  %vm7806_vm3 = vcmp.lt.s32.totalorder %v4425_v29, 16 }
 0x17f   : > { %841 = vrot.lane.b32.xlu1 %v794_v14, %s6344_s7  ;;  %1931 = vst.msk [vmem:[#allocation2 + $0x70] sm:$0xff] %vm8498_vm7, %v1873_v43  ;;  %vm4279_vm7 = vcmp.lt.s32.totalorder %v7664_v52, 0  ;;  %v7774_v35 = vmul.u32.u64.low 2863311531, %v7738_v30  ;;  %v7775_v14 = vmul.u32.u64.high 2863311531, %v7738_v30, %v7774_v35  ;;  %v2891_v61 = vsel %vm598_vm1, %v2886_v45, %v2890_v59 }
 0x180   : > { %3252 = vrot.lane.b32.xlu0 %v3205_v44, %s6348_s11  ;;  %vm7722_vm15 = vmand %vm4279_vm7, %vm4231_vm14  ;;  %vm7751_vm7 = vcmp.lt.s32.totalorder %v4422_v28, 16  ;;  %v6349_v44 = vmov 0.0   ;;  %v7820_v12 = vmul.u32.u64.low 2863311531, %v7787_v41  ;;  %v7821_v56 = vmul.u32.u64.high 2863311531, %v7787_v41, %v7820_v12 }
 0x181   : > { %v2193_v33 = vpop.permute.xlu1 %2192  ;;  %v4423_v21 = vsel %vm7722_vm15, %v4375_v19, %v7664_v52  ;;  %v5454_v43 = vsel %vm7751_vm7, 1.0, %v6349_v44  ;;  %v7803_v52 = vmul.u32.u64.low 2863311531, %v7769_v46  ;;  %v7804_v5 = vmul.u32.u64.high 2863311531, %v7769_v46, %v7803_v52  ;;  %vm8523_vm15 = vmmov %vm8520_vm13 }
 0x182   : > { %2250 = vst.msk [vmem:[#allocation2 + $0x78] sm:$0xff] %vm2234_vm8, %v2193_v33  ;;  %v2191_v62 = vpop.permute.xlu0 %2190  ;;  %vm7778_vm12 = vcmp.lt.s32.totalorder %v4423_v21, 16  ;;  %v5457_v38 = vsel %vm7806_vm3, 1.0, %v6349_v44  ;;  %v3785_v35 = vshrl.u32 %v7821_v56, 4  ;;  %vm4282_vm3 = vcmp.lt.s32.totalorder %v3754_v24, 0 }
 0x183   : > { %1160 = vrot.lane.b32.xlu1 %v1113_v11, %s6343_s6  ;;  %2249 = vst.msk [vmem:[#allocation2 + $0x70] sm:$0xff] %vm2234_vm8, %v2191_v62  ;;  %v5456_v11 = vsel %vm7747_vm6, 1.0, %v6349_v44  ;;  %v5455_v18 = vsel %vm7778_vm12, 1.0, %v6349_v44  ;;  %v3763_v63 = vshrl.u32 %v7804_v5, 4  ;;  %vm4234_vm12 = vcmp.ne.s32.totalorder %v3754_v24, 0 }
 0x184   : > { %1158 = vrot.lane.b32.xlu0 %v1111_v60, %s6343_s6  ;;  %v6221_v60 = vld [vmem:[%s6433_s30 + $0xd0] sm:$0xff]   ;;  %s7834_s30 = scalar_lea.vmem [#allocation3], %s5836_s29  ;;  %v4378_v45 = vadd.s32 24, %v3754_v24  ;;  %s5603_s6 = smul.u32 3072, %s6331_s15 }
 0x185   : > { %v2458_v16 = vpop.permute.xlu1 %2457  ;;  %v3206_v42 = vrot.slane %v6221_v60, 1 }
 0x186   : > { %2515 = vst.msk [vmem:[#allocation2 + $0x78] sm:$0xff] %vm2499_vm9, %v2458_v16  ;;  %v2456_v6 = vpop.permute.xlu0 %2455 }
 0x187   : > { %1425 = vrot.lane.b32.xlu1 %v6210_v53, %s6341_s4  ;;  %2514 = vst.msk [vmem:[#allocation2 + $0x70] sm:$0xff] %vm2499_vm9, %v2456_v6  ;;  %v3209_v2 = vsel %vm1064_vm0, %v3206_v42, %v3208_v27 }
 0x188   : > { %1423 = vrot.lane.b32.xlu0 %v6209_v54, %s6341_s4  ;;  %v2878_v54 = vor.u32 %v2876_v34, %v7594_v47  ;;  %v3774_v47 = vshrl.u32 %v7775_v14, 4  ;;  %s5203_s4 = sshll.u32 %s7760_s28, 3 }
 0x189   : > { %v2923_v48 = vpop.permute.xlu1 %2922 }
 0x18a   : > { %2980 = vst.msk [vmem:[#allocation2 + $0x78] sm:$0xff] %vm2964_vm10, %v2923_v48  ;;  %v2921_v15 = vpop.permute.xlu0 %2920  ;;  %v2883_v48 = vsel %vm598_vm1, %v2878_v54, %v7766_v58  ;;  %v3775_v20 = vmul.u32 24, %v3774_v47  ;;  %vm8521_vm1 = vcmask 130144  }
 0x18b   : > { %1890 = vrot.lane.b32.xlu1 %v1843_v49, %s6345_s8  ;;  %2979 = vst.msk [vmem:[#allocation2 + $0x70] sm:$0xff] %vm2964_vm10, %v2921_v15  ;;  %vm8522_vm14 = vmmov %vm8521_vm1 }
 0x18c   : > { %1888 = vrot.lane.b32.xlu0 %v1835_v23, %s6345_s8  ;;  %v3776_v52 = vsub.s32 %v7738_v30, %v3775_v20  ;;  %s5082_s8 = sshll.u32 %s7834_s30, 4  ;;  %s8403_s8 = int_to_ptr.vmem [resolvable:$true] %s5082_s8 }
 0x18d   : > { %v828_v0 = vpop.permute.xlu1 %827  ;;  %s6229_s19 = scalar_lea.vmem %s8403_s8, 3072  ;;  %p6236_p1 = scmp.lt.s32.totalorder %s8403_s8, %s6234_s23 }
 0x18e   : > { %884 = vst.msk [vmem:[#allocation2 + $0x80] sm:$0xff] %vm867_vm4, %v828_v0  ;;  %v3239_v37 = vpop.permute.xlu0 %3238  ;;  %v5782_v33 = vpop.f32.mrb[0].mxu0  ;;  %v3764_v0 = vmul.u32 24, %v3763_v63  ;;  %vm4236_vm6 = vcmp.ne.s32.totalorder %v3776_v52, 0  ;;  %vm4284_vm7 = vcmp.lt.s32.totalorder %v3776_v52, 0  ;;  %p6230_p12 = scmp.ne.s32.totalorder %s8403_s8, %s6229_s19  ;;  %p6237_p2 = scmp.lt.s32.totalorder %s6235_s26, %s6229_s19 }
 0x18f   : > { %2208 = vrot.lane.b32.xlu1 %v2161_v51, %s6342_s5  ;;  %3297 = vst.msk [vmem:[#allocation2 + $0x70] sm:$0xff] %vm3282_vm11, %v3239_v37  ;;  %v3462_v17 = vpop.f32.mrb[1].mxu0  ;;  %v4616_v1 = vmul.f32 %v5782_v33, %v5456_v11  ;;  %v3207_v11 = vsel %vm1064_vm0, %v3204_v13, %v3206_v42  ;;  %v3786_v37 = vmul.u32 24, %v3785_v35  ;;  %vm8524_vm0 = vcmask 162944  }
 0x190   : > { %v4614_v62 = vmul.f32 %v5454_v43, %v3462_v17  ;;  %2206 = vrot.lane.b32.xlu0 %v2159_v50, %s6342_s5  ;;  %v5783_v53 = vpop.f32.mrb[2].mxu0  ;;  %v3765_v13 = vsub.s32 %v7769_v46, %v3764_v0  ;;  %vm8525_vm2 = vmmov %vm8524_vm0  ;;  %v4380_v46 = vadd.s32 24, %v3776_v52  ;;  %s8291_s5 = scalar_lea.vmem [#allocation5], %s5203_s4  ;;  %p6231_p13 = pnand %p6230_p12, %p6413_p4 }
 0x191   : > { %v830_v26 = vpop.permute.xlu1 %829  ;;  %v5612_v4 = vpack.c.bf16 %v5783_v53, %v5782_v33  ;;  %v3465_v16 = vpop.f32.mrb[3].mxu0  ;;  %v4617_v39 = vmul.f32 %v5783_v53, %v5457_v38  ;;  %v4721_v7 = vmul.f32 %v4616_v1, %v4616_v1  ;;  %v3787_v30 = vsub.s32 %v7787_v41, %v3786_v37  ;;  %208 = vst [vmem:[%s8291_s5] sm:$0xff] %v6349_v44  ;;  %p6238_p3 = por %p6237_p2, %p6236_p1 }
 0x192   : > { %885 = vst.msk [vmem:[#allocation2 + $0x88] sm:$0xff] %vm867_vm4, %v830_v26  ;;  %v4615_v55 = vmul.f32 %v5455_v18, %v3465_v16  ;;  %v5607_v19 = vpack.c.bf16 %v3465_v16, %v3462_v17  ;;  %v3241_v28 = vpop.permute.xlu0 %3240  ;;  %v4719_v6 = vmul.f32 %v4614_v62, %v4614_v62  ;;  %v4379_v59 = vadd.s32 24, %v3765_v13  ;;  %p6232_p0 = pneg %p6231_p13 }
 0x193   : > { %2473 = vrot.lane.b32.xlu1 %v6218_v10, %s6346_s9  ;;  %5724 = vst [vmem:[%s7834_s30 + $0x8] sm:$0xff] %v5612_v4   ;;  %3298 = vst.msk [vmem:[#allocation2 + $0x78] sm:$0xff] %vm3282_vm11, %v3241_v28  ;;  %v4722_v14 = vmul.f32 %v4617_v39, %v4617_v39  ;;  %v4381_v12 = vadd.s32 24, %v3787_v30  ;;  %v7897_v26 = vadd.s32 64, %v7532_v9  ;;  %v7903_v16 = vadd.s32 80, %v7532_v9 }
 0x194   : > { %v4663_v40 = vadd.f32 %v4615_v55, %v4614_v62  ;;  %v4720_v23 = vmul.f32 %v4615_v55, %v4615_v55  ;;  %5608 = vst [vmem:[%s7834_s30] sm:$0xff] %v5607_v19   ;;  %2471 = vrot.lane.b32.xlu0 %v6217_v32, %s6346_s9  ;;  %v7911_v55 = vadd.s32 88, %v7532_v9  ;;  %v7914_v19 = vadd.s32 72, %v7532_v9  ;;  %p6239_p5 = pnand %p6238_p3, %p6232_p0 }
 0x195   : > { %v1149_v49 = vpop.permute.xlu1 %1148 }
 0x196   : > { %1204 = vst.msk [vmem:[#allocation2 + $0x88] sm:$0xff] %vm8501_vm5, %v1149_v49  ;;  %v4664_v21 = vadd.f32 %v4663_v40, %v4616_v1  ;;  %v4767_v29 = vadd.f32 %v4720_v23, %v4719_v6  ;;  %v1147_v51 = vpop.permute.xlu0 %1146  ;;  %v3321_v15 = vld [vmem:[#allocation2 + $0x70] sm:$0xff]  ;;  %v7907_v54 = vmul.u32.u64.low 2863311531, %v7897_v26  ;;  %v7908_v1 = vmul.u32.u64.high 2863311531, %v7897_v26, %v7907_v54 }
 0x197   : > { %2938 = vrot.lane.b32.xlu1 %v2891_v61, %s6347_s10  ;;  %1203 = vst.msk [vmem:[#allocation2 + $0x80] sm:$0xff] %vm8501_vm5, %v1147_v51  ;;  %5808 = vmatprep.mubr.msk.bf16.mxu1 %vm8520_vm13, %v3321_v15  ;;  %vm4235_vm13 = vcmp.ne.s32.totalorder %v3765_v13, 0  ;;  %v7926_v23 = vmul.u32.u64.low 2863311531, %v7911_v55  ;;  %v7927_v49 = vmul.u32.u64.high 2863311531, %v7911_v55, %v7926_v23 }
 0x198   : > { %v4768_v58 = vadd.f32 %v4767_v29, %v4721_v7  ;;  %2936 = vrot.lane.b32.xlu0 %v2883_v48, %s6347_s10  ;;  %v7852_v8 = vadd.f32 %v4664_v21, %v4617_v39  ;;  %v7921_v6 = vmul.u32.u64.low 2863311531, %v7903_v16  ;;  %v7922_v39 = vmul.u32.u64.high 2863311531, %v7903_v16, %v7921_v6 }
 0x199   : > { %v1414_v36 = vpop.permute.xlu1 %1413  ;;  %v7930_v48 = vmul.u32.u64.low 2863311531, %v7914_v19  ;;  %v7931_v63 = vmul.u32.u64.high 2863311531, %v7914_v19, %v7930_v48 }
 0x19a   : > { %1469 = vst.msk [vmem:[#allocation2 + $0x88] sm:$0xff] %vm8521_vm1, %v1414_v36  ;;  %v1412_v50 = vpop.permute.xlu0 %1411  ;;  %v3322_v43 = vld [vmem:[#allocation2 + $0x78] sm:$0xff]  ;;  %v7859_v34 = vadd.f32 %v4768_v58, %v4722_v14  ;;  %vm4283_vm1 = vcmp.lt.s32.totalorder %v3765_v13, 0  ;;  %v7991_v48 = vadd.s32 96, %v7532_v9 }
 0x19b   : > { %3256 = vrot.lane.b32.xlu1 %v3209_v2, %s6348_s11  ;;  %1468 = vst.msk [vmem:[#allocation2 + $0x80] sm:$0xff] %vm8522_vm14, %v1412_v50  ;;  %5809 = vmatmul.mubr.msk.bf16.gmra.mrb[4].mxu1 %vm8523_vm15, %v3322_v43  ;;  %vm7871_vm14 = vmand %vm4284_vm7, %vm4236_vm6 }
 0x19c   : > { %3254 = vrot.lane.b32.xlu0 %v3207_v11, %s6348_s11  ;;  %vm7876_vm15 = vmand %vm4282_vm3, %vm4234_vm12  ;;  %v4428_v25 = vsel %vm7871_vm14, %v4380_v46, %v3776_v52  ;;  %v3796_v11 = vshrl.u32 %v7908_v1, 4  ;;  %vm8536_vm14 = vcmask 293888   ;;  %s8408_s11 = scalar_lea.hbm %s8496_s2, %s5603_s6 }
 0x19d   : > { %v1879_v5 = vpop.permute.xlu1 %1878  ;;  %vm7880_vm5 = vmand %vm4283_vm1, %vm4235_vm13  ;;  %v4426_v56 = vsel %vm7876_vm15, %v4378_v45, %v3754_v24  ;;  %vm4476_vm7 = vcmp.lt.s32.totalorder %v4428_v25, 16  ;;  %vm8534_vm13 = vcmask 97344   ;;  %vm8537_vm15 = vcmask 130144  }
 0x19e   : > { %1934 = vst.msk [vmem:[#allocation2 + $0x88] sm:$0xff] %vm8524_vm0, %v1879_v5  ;;  %v1877_v33 = vpop.permute.xlu0 %1876  ;;  %vm4237_vm0 = vcmp.ne.s32.totalorder %v3787_v30, 0  ;;  %v4427_v53 = vsel %vm7880_vm5, %v4379_v59, %v3765_v13  ;;  %vm4474_vm12 = vcmp.lt.s32.totalorder %v4426_v56, 16  ;;  %v5460_v61 = vsel %vm4476_vm7, 1.0, %v6349_v44  ;;  %vm8535_vm1 = vmmov %vm8534_vm13 }
 0x19f   : > { %1933 = vst.msk [vmem:[#allocation2 + $0x80] sm:$0xff] %vm8525_vm2, %v1877_v33  ;;  %vm4285_vm2 = vcmp.lt.s32.totalorder %v3787_v30, 0  ;;  %vm4475_vm3 = vcmp.lt.s32.totalorder %v4427_v53, 16  ;;  %v5458_v42 = vsel %vm4474_vm12, 1.0, %v6349_v44  ;;  %v3797_v10 = vmul.u32 24, %v3796_v11 }
 0x1a0   : > { %vm7890_vm6 = vmand %vm4285_vm2, %vm4237_vm0  ;;  %v5459_v31 = vsel %vm4475_vm3, 1.0, %v6349_v44 }
 0x1a1   : > { %v2197_v57 = vpop.permute.xlu1 %2196  ;;  %v4429_v4 = vsel %vm7890_vm6, %v4381_v12, %v3787_v30  ;;  %v3807_v30 = vshrl.u32 %v7931_v63, 4  ;;  %vm8538_vm0 = vmmov %vm8537_vm15  ;;  %v3798_v56 = vsub.s32 %v7897_v26, %v3797_v10  ;;  %vm8540_vm6 = vcmask 162944  }
 0x1a2   : > { %2252 = vst.msk [vmem:[#allocation2 + $0x88] sm:$0xff] %vm2234_vm8, %v2197_v57  ;;  %v2195_v22 = vpop.permute.xlu0 %2194  ;;  %vm4477_vm5 = vcmp.lt.s32.totalorder %v4429_v4, 16  ;;  %v3818_v57 = vshrl.u32 %v7922_v39, 4  ;;  %vm8539_vm2 = vmmov %vm8536_vm14  ;;  %v7983_v39 = vadd.s32 112, %v7532_v9 }
 0x1a3   : > { %2251 = vst.msk [vmem:[#allocation2 + $0x80] sm:$0xff] %vm2234_vm8, %v2195_v22  ;;  %v5461_v15 = vsel %vm4477_vm5, 1.0, %v6349_v44  ;;  %v3808_v25 = vmul.u32 24, %v3807_v30  ;;  %vm8541_vm7 = vmmov %vm8540_vm6  ;;  %vm4238_vm12 = vcmp.ne.s32.totalorder %v3798_v56, 0  ;;  %vm4286_vm3 = vcmp.lt.s32.totalorder %v3798_v56, 0 }
 0x1a4   : > { %v3819_v41 = vmul.u32 24, %v3818_v57  ;;  %v4382_v26 = vadd.s32 24, %v3798_v56 }
 0x1a5   : > { %v2462_v60 = vpop.permute.xlu1 %2461 }
 0x1a6   : > { %2517 = vst.msk [vmem:[#allocation2 + $0x88] sm:$0xff] %vm2499_vm9, %v2462_v60  ;;  %v2460_v17 = vpop.permute.xlu0 %2459 }
 0x1a7   : > { %2516 = vst.msk [vmem:[#allocation2 + $0x80] sm:$0xff] %vm2499_vm9, %v2460_v17 }
 0x1a9   : > { %v2927_v32 = vpop.permute.xlu1 %2926 }
 0x1aa   : > { %2982 = vst.msk [vmem:[#allocation2 + $0x88] sm:$0xff] %vm2964_vm10, %v2927_v32  ;;  %v2925_v38 = vpop.permute.xlu0 %2924  ;;  %v3820_v32 = vsub.s32 %v7903_v16, %v3819_v41 }
 0x1ab   : > { %2981 = vst.msk [vmem:[#allocation2 + $0x80] sm:$0xff] %vm2964_vm10, %v2925_v38  ;;  %v3809_v38 = vsub.s32 %v7914_v19, %v3808_v25 }
 0x1ac   : > { %vm4240_vm5 = vcmp.ne.s32.totalorder %v3820_v32, 0  ;;  %v4384_v19 = vadd.s32 24, %v3820_v32 }
 0x1ad   : > { %v832_v28 = vpop.permute.xlu1 %831 }
 0x1ae   : > { %886 = vst.msk [vmem:[#allocation2 + $0x90] sm:$0xff] %vm867_vm4, %v832_v28  ;;  %v3243_v27 = vpop.permute.xlu0 %3242  ;;  %v5786_v47 = vpop.f32.mrb[4].mxu0 }
 0x1af   : > { %3299 = vst.msk [vmem:[#allocation2 + $0x80] sm:$0xff] %vm3282_vm11, %v3243_v27  ;;  %v3478_v40 = vpop.f32.mrb[5].mxu0  ;;  %v4620_v51 = vmul.f32 %v5786_v47, %v5460_v61  ;;  %v4383_v61 = vadd.s32 24, %v3809_v38 }
 0x1b0   : > { %v4618_v7 = vmul.f32 %v5458_v42, %v3478_v40  ;;  %v5787_v21 = vpop.f32.mrb[6].mxu0 }
 0x1b1   : > { %v834_v29 = vpop.permute.xlu1 %833  ;;  %v5622_v2 = vpack.c.bf16 %v5787_v21, %v5786_v47  ;;  %v3481_v20 = vpop.f32.mrb[7].mxu0  ;;  %v4621_v50 = vmul.f32 %v5787_v21, %v5461_v15  ;;  %v4725_v24 = vmul.f32 %v4620_v51, %v4620_v51 }
 0x1b2   : > { %887 = vst.msk [vmem:[#allocation2 + $0x98] sm:$0xff] %vm867_vm4, %v834_v29  ;;  %v4666_v35 = vadd.f32 %v7852_v8, %v4618_v7  ;;  %v4723_v14 = vmul.f32 %v4618_v7, %v4618_v7  ;;  %v4619_v58 = vmul.f32 %v5459_v31, %v3481_v20  ;;  %v5617_v36 = vpack.c.bf16 %v3481_v20, %v3478_v40  ;;  %v3245_v3 = vpop.permute.xlu0 %3244 }
 0x1b3   : > { %5726 = vst [vmem:[%s7834_s30 + $0x18] sm:$0xff] %v5622_v2   ;;  %3300 = vst.msk [vmem:[#allocation2 + $0x88] sm:$0xff] %vm3282_vm11, %v3245_v3  ;;  %v4726_v22 = vmul.f32 %v4621_v50, %v4621_v50  ;;  %v7997_v21 = vmul.u32.u64.low 2863311531, %v7983_v39  ;;  %v7998_v29 = vmul.u32.u64.high 2863311531, %v7983_v39, %v7997_v21 }
 0x1b4   : > { %v4770_v0 = vadd.f32 %v7859_v34, %v4723_v14  ;;  %v4667_v43 = vadd.f32 %v4666_v35, %v4619_v58  ;;  %v4724_v52 = vmul.f32 %v4619_v58, %v4619_v58  ;;  %5725 = vst [vmem:[%s7834_s30 + $0x10] sm:$0xff] %v5617_v36   ;;  %v3829_v34 = vshrl.u32 %v7927_v49, 4 }
 0x1b5   : > { %v1153_v5 = vpop.permute.xlu1 %1152  ;;  %v8006_v20 = vmul.u32.u64.low 2863311531, %v7991_v48  ;;  %v8007_v35 = vmul.u32.u64.high 2863311531, %v7991_v48, %v8006_v20  ;;  %v8010_v14 = vadd.s32 120, %v7532_v9 }
 0x1b6   : > { %1206 = vst.msk [vmem:[#allocation2 + $0x98] sm:$0xff] %vm8534_vm13, %v1153_v5  ;;  %v4668_v8 = vadd.f32 %v4667_v43, %v4620_v51  ;;  %v4771_v37 = vadd.f32 %v4770_v0, %v4724_v52  ;;  %v1151_v13 = vpop.permute.xlu0 %1150  ;;  %v3323_v33 = vld [vmem:[#allocation2 + $0x80] sm:$0xff]  ;;  %v3830_v62 = vmul.u32 24, %v3829_v34  ;;  %vm4288_vm13 = vcmp.lt.s32.totalorder %v3820_v32, 0 }
 0x1b7   : > { %1205 = vst.msk [vmem:[#allocation2 + $0x90] sm:$0xff] %vm8535_vm1, %v1151_v13  ;;  %5812 = vmatprep.mubr.msk.bf16.mxu1 %vm8536_vm14, %v3323_v33  ;;  %vm7962_vm1 = vmand %vm4286_vm3, %vm4238_vm12  ;;  %vm4239_vm14 = vcmp.ne.s32.totalorder %v3809_v38, 0  ;;  %v8001_v51 = vadd.s32 104, %v7532_v9  ;;  %v8022_v57 = vmul.u32.u64.low 2863311531, %v8010_v14  ;;  %v8023_v34 = vmul.u32.u64.high 2863311531, %v8010_v14, %v8022_v57 }
 0x1b8   : > { %v4772_v18 = vadd.f32 %v4771_v37, %v4725_v24  ;;  %v7947_v45 = vadd.f32 %v4668_v8, %v4621_v50  ;;  %v3831_v54 = vsub.s32 %v7911_v55, %v3830_v62  ;;  %v4430_v27 = vsel %vm7962_vm1, %v4382_v26, %v3798_v56 }
 0x1b9   : > { %v1418_v46 = vpop.permute.xlu1 %1417  ;;  %vm4478_vm3 = vcmp.lt.s32.totalorder %v4430_v27, 16  ;;  %v8016_v50 = vmul.u32.u64.low 2863311531, %v8001_v51  ;;  %v8017_v43 = vmul.u32.u64.high 2863311531, %v8001_v51, %v8016_v50  ;;  %v3873_v55 = vshrl.u32 %v8023_v34, 4 }
 0x1ba   : > { %1471 = vst.msk [vmem:[#allocation2 + $0x98] sm:$0xff] %vm8537_vm15, %v1418_v46  ;;  %v1416_v59 = vpop.permute.xlu0 %1415  ;;  %v3324_v60 = vld [vmem:[#allocation2 + $0x88] sm:$0xff]  ;;  %v7950_v17 = vadd.f32 %v4772_v18, %v4726_v22  ;;  %vm4287_vm15 = vcmp.lt.s32.totalorder %v3809_v38, 0  ;;  %v4385_v47 = vadd.s32 24, %v3831_v54  ;;  %v5462_v2 = vsel %vm4478_vm3, 1.0, %v6349_v44 }
 0x1bb   : > { %1470 = vst.msk [vmem:[#allocation2 + $0x90] sm:$0xff] %vm8538_vm0, %v1416_v59  ;;  %5813 = vmatmul.mubr.msk.bf16.gmra.mrb[8].mxu1 %vm8539_vm2, %v3324_v60  ;;  %vm4241_vm0 = vcmp.ne.s32.totalorder %v3831_v54, 0  ;;  %vm4289_vm2 = vcmp.lt.s32.totalorder %v3831_v54, 0  ;;  %v3862_v59 = vshrl.u32 %v7998_v29, 4  ;;  %v8098_v34 = vadd.s32 152, %v7532_v9 }
 0x1bc   : > { %vm7978_vm12 = vmand %vm4289_vm2, %vm4241_vm0  ;;  %vm8552_vm0 = vcmask 293888   ;;  %vm8553_vm2 = vcmask 130144  }
 0x1bd   : > { %v1883_v12 = vpop.permute.xlu1 %1882  ;;  %v4433_v7 = vsel %vm7978_vm12, %v4385_v47, %v3831_v54  ;;  %v3863_v28 = vmul.u32 24, %v3862_v59  ;;  %vm8556_vm12 = vcmask 162944  }
 0x1be   : > { %1936 = vst.msk [vmem:[#allocation2 + $0x98] sm:$0xff] %vm8540_vm6, %v1883_v12  ;;  %v1881_v53 = vpop.permute.xlu0 %1880  ;;  %vm7967_vm6 = vmand %vm4288_vm13, %vm4240_vm5  ;;  %vm4481_vm1 = vcmp.lt.s32.totalorder %v4433_v7, 16 }
 0x1bf   : > { %1935 = vst.msk [vmem:[#allocation2 + $0x90] sm:$0xff] %vm8541_vm7, %v1881_v53  ;;  %vm7973_vm7 = vmand %vm4287_vm15, %vm4239_vm14  ;;  %v4432_v23 = vsel %vm7967_vm6, %v4384_v19, %v3820_v32  ;;  %v5465_v24 = vsel %vm4481_vm1, 1.0, %v6349_v44  ;;  %vm8550_vm14 = vcmask 97344   ;;  %v3864_v6 = vsub.s32 %v7983_v39, %v3863_v28 }
 0x1c0   : > { %v4431_v49 = vsel %vm7973_vm7, %v4383_v61, %v3809_v38  ;;  %vm4480_vm5 = vcmp.lt.s32.totalorder %v4432_v23, 16  ;;  %vm8551_vm15 = vmmov %vm8550_vm14  ;;  %v3874_v23 = vmul.u32 24, %v3873_v55 }
 0x1c1   : > { %v2201_v4 = vpop.permute.xlu1 %2200  ;;  %vm4479_vm13 = vcmp.lt.s32.totalorder %v4431_v49, 16  ;;  %v5464_v3 = vsel %vm4480_vm5, 1.0, %v6349_v44  ;;  %vm8554_vm6 = vmmov %vm8553_vm2  ;;  %vm4244_vm5 = vcmp.ne.s32.totalorder %v3864_v6, 0  ;;  %v4388_v29 = vadd.s32 24, %v3864_v6 }
 0x1c2   : > { %2254 = vst.msk [vmem:[#allocation2 + $0x98] sm:$0xff] %vm2234_vm8, %v2201_v4  ;;  %v2199_v1 = vpop.permute.xlu0 %2198  ;;  %v5463_v0 = vsel %vm4479_vm13, 1.0, %v6349_v44  ;;  %vm8555_vm7 = vmmov %vm8552_vm0  ;;  %vm4292_vm13 = vcmp.lt.s32.totalorder %v3864_v6, 0  ;;  %v3875_v21 = vsub.s32 %v8010_v14, %v3874_v23 }
 0x1c3   : > { %2253 = vst.msk [vmem:[#allocation2 + $0x90] sm:$0xff] %vm2234_vm8, %v2199_v1  ;;  %vm8557_vm3 = vmmov %vm8556_vm12 }
 0x1c5   : > { %v2466_v16 = vpop.permute.xlu1 %2465 }
 0x1c6   : > { %2519 = vst.msk [vmem:[#allocation2 + $0x98] sm:$0xff] %vm2499_vm9, %v2466_v16  ;;  %v2464_v42 = vpop.permute.xlu0 %2463 }
 0x1c7   : > { %2518 = vst.msk [vmem:[#allocation2 + $0x90] sm:$0xff] %vm2499_vm9, %v2464_v42 }
 0x1c9   : > { %v2931_v40 = vpop.permute.xlu1 %2930 }
 0x1ca   : > { %2984 = vst.msk [vmem:[#allocation2 + $0x98] sm:$0xff] %vm2964_vm10, %v2931_v40  ;;  %v2929_v63 = vpop.permute.xlu0 %2928 }
 0x1cb   : > { %2983 = vst.msk [vmem:[#allocation2 + $0x90] sm:$0xff] %vm2964_vm10, %v2929_v63 }
 0x1cd   : > { %v836_v15 = vpop.permute.xlu1 %835 }
 0x1ce   : > { %888 = vst.msk [vmem:[#allocation2 + $0xa0] sm:$0xff] %vm867_vm4, %v836_v15  ;;  %v3247_v58 = vpop.permute.xlu0 %3246  ;;  %v5790_v36 = vpop.f32.mrb[8].mxu0 }
 0x1cf   : > { %3301 = vst.msk [vmem:[#allocation2 + $0x90] sm:$0xff] %vm3282_vm11, %v3247_v58  ;;  %v3494_v11 = vpop.f32.mrb[9].mxu0  ;;  %v4624_v37 = vmul.f32 %v5790_v36, %v5464_v3  ;;  %v8066_v58 = vadd.s32 144, %v7532_v9 }
 0x1d0   : > { %v4622_v52 = vmul.f32 %v5462_v2, %v3494_v11  ;;  %v5791_v5 = vpop.f32.mrb[10].mxu0 }
 0x1d1   : > { %v838_v8 = vpop.permute.xlu1 %837  ;;  %v5632_v13 = vpack.c.bf16 %v5791_v5, %v5790_v36  ;;  %v3497_v33 = vpop.f32.mrb[11].mxu0  ;;  %v4625_v41 = vmul.f32 %v5791_v5, %v5465_v24  ;;  %v4729_v62 = vmul.f32 %v4624_v37, %v4624_v37  ;;  %v8084_v5 = vadd.s32 136, %v7532_v9 }
 0x1d2   : > { %889 = vst.msk [vmem:[#allocation2 + $0xa8] sm:$0xff] %vm867_vm4, %v838_v8  ;;  %v4670_v30 = vadd.f32 %v7947_v45, %v4622_v52  ;;  %v4727_v22 = vmul.f32 %v4622_v52, %v4622_v52  ;;  %v4623_v18 = vmul.f32 %v5463_v0, %v3497_v33  ;;  %v5627_v46 = vpack.c.bf16 %v3497_v33, %v3494_v11  ;;  %v3249_v10 = vpop.permute.xlu0 %3248 }
 0x1d3   : > { %5728 = vst [vmem:[%s7834_s30 + $0x28] sm:$0xff] %v5632_v13   ;;  %3302 = vst.msk [vmem:[#allocation2 + $0x98] sm:$0xff] %vm3282_vm11, %v3249_v10  ;;  %v3840_v45 = vshrl.u32 %v8007_v35, 4  ;;  %v4730_v54 = vmul.f32 %v4625_v41, %v4625_v41  ;;  %v4389_v11 = vadd.s32 24, %v3875_v21  ;;  %v8074_v0 = vadd.s32 128, %v7532_v9 }
 0x1d4   : > { %v4774_v60 = vadd.f32 %v7950_v17, %v4727_v22  ;;  %v4671_v25 = vadd.f32 %v4670_v30, %v4623_v18  ;;  %v4728_v12 = vmul.f32 %v4623_v18, %v4623_v18  ;;  %5727 = vst [vmem:[%s7834_s30 + $0x20] sm:$0xff] %v5627_v46   ;;  %v3851_v17 = vshrl.u32 %v8017_v43, 4 }
 0x1d5   : > { %v1157_v56 = vpop.permute.xlu1 %1156  ;;  %v3841_v19 = vmul.u32 24, %v3840_v45  ;;  %v8094_v33 = vmul.u32.u64.low 2863311531, %v8074_v0  ;;  %v8095_v57 = vmul.u32.u64.high 2863311531, %v8074_v0, %v8094_v33 }
 0x1d6   : > { %1208 = vst.msk [vmem:[#allocation2 + $0xa8] sm:$0xff] %vm8550_vm14, %v1157_v56  ;;  %v4672_v53 = vadd.f32 %v4671_v25, %v4624_v37  ;;  %v4775_v32 = vadd.f32 %v4774_v60, %v4728_v12  ;;  %v1155_v38 = vpop.permute.xlu0 %1154  ;;  %v3325_v4 = vld [vmem:[#allocation2 + $0x90] sm:$0xff]  ;;  %v3852_v47 = vmul.u32 24, %v3851_v17 }
 0x1d7   : > { %1207 = vst.msk [vmem:[#allocation2 + $0xa0] sm:$0xff] %vm8551_vm15, %v1155_v38  ;;  %5816 = vmatprep.mubr.msk.bf16.mxu1 %vm8552_vm0, %v3325_v4  ;;  %v3842_v40 = vsub.s32 %v7991_v48, %v3841_v19  ;;  %vm8052_vm15 = vmand %vm4292_vm13, %vm4244_vm5  ;;  %v8087_v8 = vmul.u32.u64.low 2863311531, %v8066_v58  ;;  %v8088_v37 = vmul.u32.u64.high 2863311531, %v8066_v58, %v8087_v8 }
 0x1d8   : > { %v4776_v1 = vadd.f32 %v4775_v32, %v4729_v62  ;;  %v8036_v16 = vadd.f32 %v4672_v53, %v4625_v41  ;;  %v3853_v63 = vsub.s32 %v8001_v51, %v3852_v47  ;;  %v4436_v36 = vsel %vm8052_vm15, %v4388_v29, %v3864_v6 }
 0x1d9   : > { %v1422_v26 = vpop.permute.xlu1 %1421  ;;  %vm4242_vm1 = vcmp.ne.s32.totalorder %v3842_v40, 0  ;;  %vm4290_vm14 = vcmp.lt.s32.totalorder %v3842_v40, 0  ;;  %v4386_v15 = vadd.s32 24, %v3842_v40  ;;  %vm4484_vm13 = vcmp.lt.s32.totalorder %v4436_v36, 16 }
 0x1da   : > { %1473 = vst.msk [vmem:[#allocation2 + $0xa8] sm:$0xff] %vm8553_vm2, %v1422_v26  ;;  %v1420_v61 = vpop.permute.xlu0 %1419  ;;  %v3326_v42 = vld [vmem:[#allocation2 + $0x98] sm:$0xff]  ;;  %v8040_v27 = vadd.f32 %v4776_v1, %v4730_v54  ;;  %vm4243_vm0 = vcmp.ne.s32.totalorder %v3853_v63, 0  ;;  %vm4291_vm2 = vcmp.lt.s32.totalorder %v3853_v63, 0  ;;  %v4387_v20 = vadd.s32 24, %v3853_v63 }
 0x1db   : > { %1472 = vst.msk [vmem:[#allocation2 + $0xa0] sm:$0xff] %vm8554_vm6, %v1420_v61  ;;  %5817 = vmatmul.mubr.msk.bf16.gmra.mrb[12].mxu1 %vm8555_vm7, %v3326_v42  ;;  %vm8056_vm6 = vmand %vm4290_vm14, %vm4242_vm1  ;;  %vm4245_vm7 = vcmp.ne.s32.totalorder %v3875_v21, 0  ;;  %v8103_v18 = vmul.u32.u64.low 2863311531, %v8084_v5  ;;  %v8104_v46 = vmul.u32.u64.high 2863311531, %v8084_v5, %v8103_v18  ;;  %v5468_v60 = vsel %vm4484_vm13, 1.0, %v6349_v44 }
 0x1dc   : > { %v4434_v3 = vsel %vm8056_vm6, %v4386_v15, %v3842_v40  ;;  %v8110_v12 = vmul.u32.u64.low 2863311531, %v8098_v34  ;;  %v8111_v56 = vmul.u32.u64.high 2863311531, %v8098_v34, %v8110_v12  ;;  %v3906_v55 = vshrl.u32 %v8088_v37, 4 }
 0x1dd   : > { %v1887_v31 = vpop.permute.xlu1 %1886  ;;  %vm4482_vm1 = vcmp.lt.s32.totalorder %v4434_v3, 16  ;;  %v3884_v61 = vshrl.u32 %v8095_v57, 4  ;;  %vm8569_vm6 = vcmask 130144  }
 0x1de   : > { %1938 = vst.msk [vmem:[#allocation2 + $0xa8] sm:$0xff] %vm8556_vm12, %v1887_v31  ;;  %v1885_v49 = vpop.permute.xlu0 %1884  ;;  %vm4293_vm12 = vcmp.lt.s32.totalorder %v3875_v21, 0  ;;  %v5466_v22 = vsel %vm4482_vm1, 1.0, %v6349_v44 }
 0x1df   : > { %1937 = vst.msk [vmem:[#allocation2 + $0xa0] sm:$0xff] %vm8557_vm3, %v1885_v49  ;;  %vm8061_vm3 = vmand %vm4291_vm2, %vm4243_vm0  ;;  %vm8568_vm2 = vcmask 293888  }
 0x1e0   : > { %vm8076_vm5 = vmand %vm4293_vm12, %vm4245_vm7  ;;  %v4435_v52 = vsel %vm8061_vm3, %v4387_v20, %v3853_v63  ;;  %vm8572_vm3 = vcmask 162944  }
 0x1e1   : > { %v2205_v7 = vpop.permute.xlu1 %2204  ;;  %v4437_v13 = vsel %vm8076_vm5, %v4389_v11, %v3875_v21  ;;  %vm4483_vm14 = vcmp.lt.s32.totalorder %v4435_v52, 16  ;;  %vm8570_vm7 = vmmov %vm8569_vm6 }
 0x1e2   : > { %2256 = vst.msk [vmem:[#allocation2 + $0xa8] sm:$0xff] %vm2234_vm8, %v2205_v7  ;;  %v2203_v39 = vpop.permute.xlu0 %2202  ;;  %vm4485_vm15 = vcmp.lt.s32.totalorder %v4437_v13, 16  ;;  %v5467_v25 = vsel %vm4483_vm14, 1.0, %v6349_v44  ;;  %vm8571_vm12 = vmmov %vm8568_vm2 }
 0x1e3   : > { %2255 = vst.msk [vmem:[#allocation2 + $0xa0] sm:$0xff] %vm2234_vm8, %v2203_v39  ;;  %v5469_v38 = vsel %vm4485_vm15, 1.0, %v6349_v44  ;;  %v3907_v39 = vmul.u32 24, %v3906_v55  ;;  %vm8573_vm5 = vmmov %vm8572_vm3 }
 0x1e5   : > { %v2470_v51 = vpop.permute.xlu1 %2469  ;;  %v3908_v3 = vsub.s32 %v8066_v58, %v3907_v39 }
 0x1e6   : > { %2521 = vst.msk [vmem:[#allocation2 + $0xa8] sm:$0xff] %vm2499_vm9, %v2470_v51  ;;  %v2468_v35 = vpop.permute.xlu0 %2467  ;;  %v3885_v51 = vmul.u32 24, %v3884_v61 }
 0x1e7   : > { %2520 = vst.msk [vmem:[#allocation2 + $0xa0] sm:$0xff] %vm2499_vm9, %v2468_v35  ;;  %vm4248_vm13 = vcmp.ne.s32.totalorder %v3908_v3, 0  ;;  %vm4296_vm1 = vcmp.lt.s32.totalorder %v3908_v3, 0 }
 0x1e9   : > { %v2935_v50 = vpop.permute.xlu1 %2934 }
 0x1ea   : > { %2986 = vst.msk [vmem:[#allocation2 + $0xa8] sm:$0xff] %vm2964_vm10, %v2935_v50  ;;  %v2933_v24 = vpop.permute.xlu0 %2932  ;;  %v3886_v50 = vsub.s32 %v8074_v0, %v3885_v51 }
 0x1eb   : > { %2985 = vst.msk [vmem:[#allocation2 + $0xa0] sm:$0xff] %vm2964_vm10, %v2933_v24 }
 0x1ec   : > { %vm4246_vm14 = vcmp.ne.s32.totalorder %v3886_v50, 0  ;;  %vm4294_vm15 = vcmp.lt.s32.totalorder %v3886_v50, 0  ;;  %v4390_v33 = vadd.s32 24, %v3886_v50 }
 0x1ed   : > { %v840_v30 = vpop.permute.xlu1 %839 }
 0x1ee   : > { %890 = vst.msk [vmem:[#allocation2 + $0xb0] sm:$0xff] %vm867_vm4, %v840_v30  ;;  %v3251_v10 = vpop.permute.xlu0 %3250  ;;  %v5794_v59 = vpop.f32.mrb[12].mxu0 }
 0x1ef   : > { %3303 = vst.msk [vmem:[#allocation2 + $0xa0] sm:$0xff] %vm3282_vm11, %v3251_v10  ;;  %v3510_v41 = vpop.f32.mrb[13].mxu0  ;;  %v4628_v32 = vmul.f32 %v5794_v59, %v5468_v60 }
 0x1f0   : > { %v4626_v45 = vmul.f32 %v5466_v22, %v3510_v41  ;;  %v5795_v62 = vpop.f32.mrb[14].mxu0 }
 0x1f1   : > { %v842_v53 = vpop.permute.xlu1 %841  ;;  %v5642_v4 = vpack.c.bf16 %v5795_v62, %v5794_v59  ;;  %v3513_v17 = vpop.f32.mrb[15].mxu0  ;;  %v4629_v47 = vmul.f32 %v5795_v62, %v5469_v38  ;;  %v4733_v23 = vmul.f32 %v4628_v32, %v4628_v32  ;;  %v3675_v38 = vadd.s32 168, %v7532_v9 }
 0x1f2   : > { %891 = vst.msk [vmem:[#allocation2 + $0xb8] sm:$0xff] %vm867_vm4, %v842_v53  ;;  %v4674_v54 = vadd.f32 %v8036_v16, %v4626_v45  ;;  %v4731_v1 = vmul.f32 %v4626_v45, %v4626_v45  ;;  %v4627_v26 = vmul.f32 %v5467_v25, %v3513_v17  ;;  %v5637_v28 = vpack.c.bf16 %v3513_v17, %v3510_v41  ;;  %v3253_v19 = vpop.permute.xlu0 %3252 }
 0x1f3   : > { %5730 = vst [vmem:[%s7834_s30 + $0x38] sm:$0xff] %v5642_v4   ;;  %3304 = vst.msk [vmem:[#allocation2 + $0xa8] sm:$0xff] %vm3282_vm11, %v3253_v19  ;;  %vm8566_vm4 = vcmask 97344   ;;  %v3895_v16 = vshrl.u32 %v8104_v46, 4  ;;  %v4734_v48 = vmul.f32 %v4629_v47, %v4629_v47  ;;  %v8167_v41 = vadd.s32 160, %v7532_v9 }
 0x1f4   : > { %v4778_v42 = vadd.f32 %v8040_v27, %v4731_v1  ;;  %v4675_v31 = vadd.f32 %v4674_v54, %v4627_v26  ;;  %v4732_v6 = vmul.f32 %v4627_v26, %v4627_v26  ;;  %5729 = vst [vmem:[%s7834_s30 + $0x30] sm:$0xff] %v5637_v28   ;;  %vm8567_vm0 = vmmov %vm8566_vm4  ;;  %v3917_v27 = vshrl.u32 %v8111_v56, 4 }
 0x1f5   : > { %v1161_v40 = vpop.permute.xlu1 %1160  ;;  %v3896_v20 = vmul.u32 24, %v3895_v16  ;;  %v3676_v45 = vadd.s32 176, %v7532_v9  ;;  %v8175_v62 = vmul.u32.u64.low 2863311531, %v8167_v41  ;;  %v8176_v53 = vmul.u32.u64.high 2863311531, %v8167_v41, %v8175_v62 }
 0x1f6   : > { %1210 = vst.msk [vmem:[#allocation2 + $0xb8] sm:$0xff] %vm8566_vm4, %v1161_v40  ;;  %v4676_v49 = vadd.f32 %v4675_v31, %v4628_v32  ;;  %v4779_v63 = vadd.f32 %v4778_v42, %v4732_v6  ;;  %v1159_v7 = vpop.permute.xlu0 %1158  ;;  %v3327_v21 = vld [vmem:[#allocation2 + $0xa0] sm:$0xff]  ;;  %v3918_v43 = vmul.u32 24, %v3917_v27  ;;  %v3677_v32 = vadd.s32 184, %v7532_v9 }
 0x1f7   : > { %1209 = vst.msk [vmem:[#allocation2 + $0xb0] sm:$0xff] %vm8567_vm0, %v1159_v7  ;;  %5820 = vmatprep.mubr.msk.bf16.mxu1 %vm8568_vm2, %v3327_v21  ;;  %v3897_v52 = vsub.s32 %v8084_v5, %v3896_v20  ;;  %vm8141_vm2 = vmand %vm4296_vm1, %vm4248_vm13  ;;  %v4392_v5 = vadd.s32 24, %v3908_v3  ;;  %v8184_v19 = vmul.u32.u64.low 2863311531, %v3676_v45  ;;  %v8185_v55 = vmul.u32.u64.high 2863311531, %v3676_v45, %v8184_v19 }
 0x1f8   : > { %v4780_v29 = vadd.f32 %v4779_v63, %v4733_v23  ;;  %v8127_v2 = vadd.f32 %v4676_v49, %v4629_v47  ;;  %v3919_v37 = vsub.s32 %v8098_v34, %v3918_v43 }
 0x1f9   : > { %v1426_v15 = vpop.permute.xlu1 %1425  ;;  %vm4247_vm4 = vcmp.ne.s32.totalorder %v3897_v52, 0  ;;  %vm4295_vm0 = vcmp.lt.s32.totalorder %v3897_v52, 0  ;;  %v4391_v57 = vadd.s32 24, %v3897_v52  ;;  %v4440_v18 = vsel %vm8141_vm2, %v4392_v5, %v3908_v3 }
 0x1fa   : > { %1475 = vst.msk [vmem:[#allocation2 + $0xb8] sm:$0xff] %vm8569_vm6, %v1426_v15  ;;  %v1424_v35 = vpop.permute.xlu0 %1423  ;;  %v3328_v14 = vld [vmem:[#allocation2 + $0xa8] sm:$0xff]  ;;  %v8130_v36 = vadd.f32 %v4780_v29, %v4734_v48  ;;  %vm8146_vm6 = vmand %vm4294_vm15, %vm4246_vm14  ;;  %v4393_v46 = vadd.s32 24, %v3919_v37  ;;  %v8188_v42 = vmul.u32.u64.low 2863311531, %v3677_v32  ;;  %v8189_v47 = vmul.u32.u64.high 2863311531, %v3677_v32, %v8188_v42 }
 0x1fb   : > { %1474 = vst.msk [vmem:[#allocation2 + $0xb0] sm:$0xff] %vm8570_vm7, %v1424_v35  ;;  %5821 = vmatmul.mubr.msk.bf16.gmra.mrb[16].mxu1 %vm8571_vm12, %v3328_v14  ;;  %vm4249_vm7 = vcmp.ne.s32.totalorder %v3919_v37, 0  ;;  %vm4297_vm12 = vcmp.lt.s32.totalorder %v3919_v37, 0  ;;  %v4438_v10 = vsel %vm8146_vm6, %v4390_v33, %v3886_v50  ;;  %v3928_v29 = vshrl.u32 %v8176_v53, 4 }
 0x1fc   : > { %vm4486_vm13 = vcmp.lt.s32.totalorder %v4438_v10, 16  ;;  %v8191_v31 = vmul.u32.u64.low 2863311531, %v3675_v38  ;;  %v8192_v6 = vmul.u32.u64.high 2863311531, %v3675_v38, %v8191_v31 }
 0x1fd   : > { %v1891_v11 = vpop.permute.xlu1 %1890  ;;  %v5470_v54 = vsel %vm4486_vm13, 1.0, %v6349_v44 }
 0x1fe   : > { %1940 = vst.msk [vmem:[#allocation2 + $0xb8] sm:$0xff] %vm8572_vm3, %v1891_v11  ;;  %v1889_v24 = vpop.permute.xlu0 %1888  ;;  %vm8150_vm3 = vmand %vm4295_vm0, %vm4247_vm4 }
 0x1ff   : > { %1939 = vst.msk [vmem:[#allocation2 + $0xb0] sm:$0xff] %vm8573_vm5, %v1889_v24  ;;  %v4439_v60 = vsel %vm8150_vm3, %v4391_v57, %v3897_v52  ;;  %vm4488_vm5 = vcmp.lt.s32.totalorder %v4440_v18, 16  ;;  %v3950_v52 = vshrl.u32 %v8185_v55, 4  ;;  %v3939_v24 = vshrl.u32 %v8192_v6, 4 }
 0x200   : > { %v5472_v17 = vsel %vm4488_vm5, 1.0, %v6349_v44 }
 0x201   : > { %v2209_v8 = vpop.permute.xlu1 %2208  ;;  %v3951_v0 = vmul.u32 24, %v3950_v52  ;;  %v3940_v13 = vmul.u32 24, %v3939_v24 }
 0x202   : > { %2258 = vst.msk [vmem:[#allocation2 + $0xb8] sm:$0xff] %vm2234_vm8, %v2209_v8  ;;  %v2207_v58 = vpop.permute.xlu0 %2206 }
 0x203   : > { %2257 = vst.msk [vmem:[#allocation2 + $0xb0] sm:$0xff] %vm2234_vm8, %v2207_v58  ;;  %vm8160_vm8 = vmand %vm4297_vm12, %vm4249_vm7  ;;  %v3941_v34 = vsub.s32 %v3675_v38, %v3940_v13 }
 0x204   : > { %v4441_v56 = vsel %vm8160_vm8, %v4393_v46, %v3919_v37 }
 0x205   : > { %v2474_v30 = vpop.permute.xlu1 %2473  ;;  %vm4489_vm1 = vcmp.lt.s32.totalorder %v4441_v56, 16  ;;  %vm4251_vm6 = vcmp.ne.s32.totalorder %v3941_v34, 0  ;;  %vm4299_vm7 = vcmp.lt.s32.totalorder %v3941_v34, 0  ;;  %v4395_v10 = vadd.s32 24, %v3941_v34 }
 0x206   : > { %2523 = vst.msk [vmem:[#allocation2 + $0xb8] sm:$0xff] %vm2499_vm9, %v2474_v30  ;;  %v2472_v22 = vpop.permute.xlu0 %2471  ;;  %v5473_v49 = vsel %vm4489_vm1, 1.0, %v6349_v44  ;;  %v3952_v30 = vsub.s32 %v3676_v45, %v3951_v0  ;;  %vm4347_vm5 = vmand %vm4299_vm7, %vm4251_vm6  ;;  %v3678_v56 = vadd.s32 192, %v7532_v9 }
 0x207   : > { %2522 = vst.msk [vmem:[#allocation2 + $0xb0] sm:$0xff] %vm2499_vm9, %v2472_v22  ;;  %vm4487_vm9 = vcmp.lt.s32.totalorder %v4439_v60, 16 }
 0x208   : > { %v5471_v28 = vsel %vm4487_vm9, 1.0, %v6349_v44  ;;  %vm4252_vm4 = vcmp.ne.s32.totalorder %v3952_v30, 0  ;;  %vm4300_vm0 = vcmp.lt.s32.totalorder %v3952_v30, 0  ;;  %v4396_v46 = vadd.s32 24, %v3952_v30 }
 0x209   : > { %v2939_v25 = vpop.permute.xlu1 %2938  ;;  %vm4348_vm8 = vmand %vm4300_vm0, %vm4252_vm4 }
 0x20a   : > { %2988 = vst.msk [vmem:[#allocation2 + $0xb8] sm:$0xff] %vm2964_vm10, %v2939_v25  ;;  %v2937_v12 = vpop.permute.xlu0 %2936  ;;  %v4444_v25 = vsel %vm4348_vm8, %v4396_v46, %v3952_v30 }
 0x20b   : > { %2987 = vst.msk [vmem:[#allocation2 + $0xb0] sm:$0xff] %vm2964_vm10, %v2937_v12  ;;  %vm8582_vm10 = vcmask 293888   ;;  %v4443_v12 = vsel %vm4347_vm5, %v4395_v10, %v3941_v34  ;;  %vm4492_vm1 = vcmp.lt.s32.totalorder %v4444_v25, 16  ;;  %v3683_v25 = vadd.s32 232, %v7532_v9 }
 0x20d   : > { %v3257_v4 = vpop.permute.xlu1 %3256 }
 0x20e   : > { %3306 = vst.msk [vmem:[#allocation2 + $0xb8] sm:$0xff] %vm3282_vm11, %v3257_v4  ;;  %v3255_v1 = vpop.permute.xlu0 %3254  ;;  %v5798_v26 = vpop.f32.mrb[16].mxu0 }
 0x20f   : > { %3305 = vst.msk [vmem:[#allocation2 + $0xb0] sm:$0xff] %vm3282_vm11, %v3255_v1  ;;  %v3526_v61 = vpop.f32.mrb[17].mxu0  ;;  %v4632_v23 = vmul.f32 %v5798_v26, %v5472_v17  ;;  %vm8583_vm11 = vmmov %vm8582_vm10  ;;  %v8213_v4 = vmul.u32.u64.low 2863311531, %v3678_v56  ;;  %v8214_v17 = vmul.u32.u64.high 2863311531, %v3678_v56, %v8213_v4 }
 0x210   : > { %v4630_v40 = vmul.f32 %v5470_v54, %v3526_v61  ;;  %v5799_v16 = vpop.f32.mrb[18].mxu0  ;;  %v3681_v54 = vadd.s32 216, %v7532_v9 }
 0x211   : > { %v5652_v63 = vpack.c.bf16 %v5799_v16, %v5798_v26  ;;  %v3529_v7 = vpop.f32.mrb[19].mxu0  ;;  %v4633_v51 = vmul.f32 %v5799_v16, %v5473_v49  ;;  %v4737_v3 = vmul.f32 %v4632_v23, %v4632_v23  ;;  %v5476_v26 = vsel %vm4492_vm1, 1.0, %v6349_v44 }
 0x212   : > { %v4678_v21 = vadd.f32 %v8127_v2, %v4630_v40  ;;  %v4735_v39 = vmul.f32 %v4630_v40, %v4630_v40  ;;  %v4631_v27 = vmul.f32 %v5471_v28, %v3529_v7  ;;  %v5647_v48 = vpack.c.bf16 %v3529_v7, %v3526_v61 }
 0x213   : > { %5732 = vst [vmem:[%s7834_s30 + $0x48] sm:$0xff] %v5652_v63   ;;  %v3961_v2 = vshrl.u32 %v8189_v47, 4  ;;  %v4738_v8 = vmul.f32 %v4633_v51, %v4633_v51 }
 0x214   : > { %v4782_v15 = vadd.f32 %v8130_v36, %v4735_v39  ;;  %v4679_v20 = vadd.f32 %v4678_v21, %v4631_v27  ;;  %v4736_v35 = vmul.f32 %v4631_v27, %v4631_v27  ;;  %5731 = vst [vmem:[%s7834_s30 + $0x40] sm:$0xff] %v5647_v48   ;;  %v3929_v36 = vmul.u32 24, %v3928_v29 }
 0x215   : > { %v3330_v14 = vld [vmem:[#allocation2 + $0xb8] sm:$0xff]  ;;  %v3962_v57 = vmul.u32 24, %v3961_v2 }
 0x216   : > { %v4680_v11 = vadd.f32 %v4679_v20, %v4632_v23  ;;  %v4783_v50 = vadd.f32 %v4782_v15, %v4736_v35  ;;  %v3329_v43 = vld [vmem:[#allocation2 + $0xb0] sm:$0xff]  ;;  %v3930_v33 = vsub.s32 %v8167_v41, %v3929_v36  ;;  %v3680_v41 = vadd.s32 208, %v7532_v9 }
 0x217   : > { %5824 = vmatprep.mubr.msk.bf16.mxu1 %vm8582_vm10, %v3329_v43  ;;  %v3963_v22 = vsub.s32 %v3677_v32, %v3962_v57  ;;  %v3679_v32 = vadd.s32 200, %v7532_v9  ;;  %vm4491_vm10 = vcmp.lt.s32.totalorder %v4443_v12, 16  ;;  %v3972_v20 = vshrl.u32 %v8214_v17, 4 }
 0x218   : > { %v4784_v37 = vadd.f32 %v4783_v50, %v4737_v3  ;;  %5825 = vmatmul.mubr.msk.bf16.gmra.mrb[20].mxu1 %vm8583_vm11, %v3330_v14  ;;  %v4681_v58 = vadd.f32 %v4680_v11, %v4633_v51  ;;  %vm4250_vm14 = vcmp.ne.s32.totalorder %v3930_v33, 0  ;;  %vm4298_vm15 = vcmp.lt.s32.totalorder %v3930_v33, 0 }
 0x219   : > { %v4394_v18 = vadd.s32 24, %v3930_v33  ;;  %vm4346_vm2 = vmand %vm4298_vm15, %vm4250_vm14  ;;  %vm4253_vm12 = vcmp.ne.s32.totalorder %v3963_v22, 0  ;;  %vm4301_vm3 = vcmp.lt.s32.totalorder %v3963_v22, 0  ;;  %v4397_v60 = vadd.s32 24, %v3963_v22 }
 0x21a   : > { %v4785_v5 = vadd.f32 %v4784_v37, %v4738_v8  ;;  %vm4349_vm13 = vmand %vm4301_vm3, %vm4253_vm12  ;;  %v8208_v62 = vmul.u32.u64.low 2863311531, %v3680_v41  ;;  %v8209_v53 = vmul.u32.u64.high 2863311531, %v3680_v41, %v8208_v62  ;;  %v5475_v19 = vsel %vm4491_vm10, 1.0, %v6349_v44 }
 0x21b   : > { %v4442_v59 = vsel %vm4346_vm2, %v4394_v18, %v3930_v33  ;;  %v4445_v45 = vsel %vm4349_vm13, %v4397_v60, %v3963_v22  ;;  %v8219_v55 = vmul.u32.u64.low 2863311531, %v3679_v32  ;;  %v8220_v61 = vmul.u32.u64.high 2863311531, %v3679_v32, %v8219_v55 }
 0x21c   : > { %vm4490_vm9 = vcmp.lt.s32.totalorder %v4442_v59, 16  ;;  %vm4493_vm11 = vcmp.lt.s32.totalorder %v4445_v45, 16  ;;  %v8223_v23 = vmul.u32.u64.low 2863311531, %v3681_v54  ;;  %v8224_v49 = vmul.u32.u64.high 2863311531, %v3681_v54, %v8223_v23 }
 0x21d   : > { %v5474_v38 = vsel %vm4490_vm9, 1.0, %v6349_v44  ;;  %v5477_v31 = vsel %vm4493_vm11, 1.0, %v6349_v44  ;;  %v3994_v27 = vshrl.u32 %v8209_v53, 4  ;;  %v3983_v11 = vshrl.u32 %v8220_v61, 4 }
 0x21e   : > { %v3973_v24 = vmul.u32 24, %v3972_v20  ;;  %v4005_v8 = vshrl.u32 %v8224_v49, 4  ;;  %v3684_v18 = vadd.s32 240, %v7532_v9  ;;  %v3682_v60 = vadd.s32 224, %v7532_v9 }
 0x21f   : > { %v3995_v52 = vmul.u32 24, %v3994_v27  ;;  %v3984_v36 = vmul.u32 24, %v3983_v11 }
 0x220   : > { %v3974_v0 = vsub.s32 %v3678_v56, %v3973_v24  ;;  %v8241_v12 = vmul.u32.u64.low 2863311531, %v3684_v18  ;;  %v8242_v56 = vmul.u32.u64.high 2863311531, %v3684_v18, %v8241_v12 }
 0x221   : > { %v3985_v13 = vsub.s32 %v3679_v32, %v3984_v36  ;;  %v8244_v62 = vmul.u32.u64.low 2863311531, %v3682_v60  ;;  %v8245_v53 = vmul.u32.u64.high 2863311531, %v3682_v60, %v8244_v62  ;;  %v3685_v32 = vadd.s32 248, %v7532_v9 }
 0x222   : > { %vm4254_vm4 = vcmp.ne.s32.totalorder %v3974_v0, 0  ;;  %vm4302_vm0 = vcmp.lt.s32.totalorder %v3974_v0, 0  ;;  %v4398_v34 = vadd.s32 24, %v3974_v0 }
 0x223   : > { %vm4255_vm6 = vcmp.ne.s32.totalorder %v3985_v13, 0  ;;  %vm4303_vm7 = vcmp.lt.s32.totalorder %v3985_v13, 0  ;;  %vm4350_vm12 = vmand %vm4302_vm0, %vm4254_vm4  ;;  %v4399_v22 = vadd.s32 24, %v3985_v13 }
 0x224   : > { %vm4351_vm5 = vmand %vm4303_vm7, %vm4255_vm6  ;;  %v4446_v10 = vsel %vm4350_vm12, %v4398_v34, %v3974_v0  ;;  %v8249_v4 = vmul.u32.u64.low 2863311531, %v3683_v25  ;;  %v8250_v17 = vmul.u32.u64.high 2863311531, %v3683_v25, %v8249_v4 }
 0x225   : > { %vm4494_vm1 = vcmp.lt.s32.totalorder %v4446_v10, 16  ;;  %v3688_v10 = vadd.s32 272, %v7532_v9 }
 0x22e   : > { %v5802_v1 = vpop.f32.mrb[20].mxu0 }
 0x22f   : > { %v3542_v28 = vpop.f32.mrb[21].mxu0  ;;  %v4636_v6 = vmul.f32 %v5802_v1, %v5476_v26 }
 0x230   : > { %v4634_v42 = vmul.f32 %v5474_v38, %v3542_v28  ;;  %v5803_v47 = vpop.f32.mrb[22].mxu0  ;;  %v5478_v38 = vsel %vm4494_vm1, 1.0, %v6349_v44 }
 0x231   : > { %v5662_v40 = vpack.c.bf16 %v5803_v47, %v5802_v1  ;;  %v3545_v16 = vpop.f32.mrb[23].mxu0  ;;  %v4637_v29 = vmul.f32 %v5803_v47, %v5477_v31  ;;  %v4741_v35 = vmul.f32 %v4636_v6, %v4636_v6 }
 0x232   : > { %v4682_v63 = vadd.f32 %v4681_v58, %v4634_v42  ;;  %v4739_v7 = vmul.f32 %v4634_v42, %v4634_v42  ;;  %v4635_v21 = vmul.f32 %v5475_v19, %v3545_v16  ;;  %v5657_v39 = vpack.c.bf16 %v3545_v16, %v3542_v28 }
 0x233   : > { %5734 = vst [vmem:[%s7834_s30 + $0x58] sm:$0xff] %v5662_v40   ;;  %v4742_v50 = vmul.f32 %v4637_v29, %v4637_v29  ;;  %v3996_v58 = vsub.s32 %v3680_v41, %v3995_v52  ;;  %v4447_v41 = vsel %vm4351_vm5, %v4399_v22, %v3985_v13 }
 0x234   : > { %v4786_v48 = vadd.f32 %v4785_v5, %v4739_v7  ;;  %v4683_v15 = vadd.f32 %v4682_v63, %v4635_v21  ;;  %v4740_v51 = vmul.f32 %v4635_v21, %v4635_v21  ;;  %5733 = vst [vmem:[%s7834_s30 + $0x50] sm:$0xff] %v5657_v39   ;;  %v4006_v5 = vmul.u32 24, %v4005_v8 }
 0x235   : > { %vm4256_vm14 = vcmp.ne.s32.totalorder %v3996_v58, 0  ;;  %vm4304_vm15 = vcmp.lt.s32.totalorder %v3996_v58, 0  ;;  %v4400_v30 = vadd.s32 24, %v3996_v58  ;;  %vm4495_vm10 = vcmp.lt.s32.totalorder %v4447_v41, 16 }
 0x236   : > { %v4684_v14 = vadd.f32 %v4683_v15, %v4636_v6  ;;  %v4787_v3 = vadd.f32 %v4786_v48, %v4740_v51  ;;  %v4007_v33 = vsub.s32 %v3681_v54, %v4006_v5  ;;  %vm8232_vm2 = vmand %vm4304_vm15, %vm4256_vm14  ;;  %v5479_v28 = vsel %vm4495_vm10, 1.0, %v6349_v44 }
 0x237   : > { %v4448_v46 = vsel %vm8232_vm2, %v4400_v30, %v3996_v58  ;;  %v8254_v19 = vmul.u32.u64.low 2863311531, %v3685_v32  ;;  %v8255_v55 = vmul.u32.u64.high 2863311531, %v3685_v32, %v8254_v19  ;;  %v4038_v7 = vshrl.u32 %v8242_v56, 4 }
 0x238   : > { %v4788_v43 = vadd.f32 %v4787_v3, %v4741_v35  ;;  %v4685_v2 = vadd.f32 %v4684_v14, %v4637_v29  ;;  %vm4257_vm3 = vcmp.ne.s32.totalorder %v4007_v33, 0  ;;  %vm4305_vm8 = vcmp.lt.s32.totalorder %v4007_v33, 0 }
 0x239   : > { %v4401_v59 = vadd.s32 24, %v4007_v33  ;;  %vm4353_vm13 = vmand %vm4305_vm8, %vm4257_vm3  ;;  %vm4496_vm9 = vcmp.lt.s32.totalorder %v4448_v46, 16  ;;  %v4016_v21 = vshrl.u32 %v8245_v53, 4  ;;  %v4027_v15 = vshrl.u32 %v8250_v17, 4 }
 0x23a   : > { %v4789_v37 = vadd.f32 %v4788_v43, %v4742_v50  ;;  %v5480_v1 = vsel %vm4496_vm9, 1.0, %v6349_v44  ;;  %v4039_v14 = vmul.u32 24, %v4038_v7  ;;  %v4049_v3 = vshrl.u32 %v8255_v55, 4 }
 0x23b   : > { %v4449_v45 = vsel %vm4353_vm13, %v4401_v59, %v4007_v33  ;;  %v4017_v43 = vmul.u32 24, %v4016_v21  ;;  %v3689_v41 = vadd.s32 280, %v7532_v9 }
 0x23c   : > { %vm4497_vm11 = vcmp.lt.s32.totalorder %v4449_v45, 16  ;;  %v4040_v8 = vsub.s32 %v3684_v18, %v4039_v14  ;;  %v4050_v36 = vmul.u32 24, %v4049_v3  ;;  %v3686_v18 = vadd.s32 256, %v7532_v9 }
 0x23d   : > { %v5481_v31 = vsel %vm4497_vm11, 1.0, %v6349_v44  ;;  %v8277_v4 = vmul.u32.u64.low 2863311531, %v3689_v41  ;;  %v8278_v17 = vmul.u32.u64.high 2863311531, %v3689_v41, %v8277_v4 }
 0x23e   : > { %vm4260_vm14 = vcmp.ne.s32.totalorder %v4040_v8, 0  ;;  %vm4308_vm15 = vcmp.lt.s32.totalorder %v4040_v8, 0  ;;  %v4051_v0 = vsub.s32 %v3685_v32, %v4050_v36  ;;  %v4404_v5 = vadd.s32 24, %v4040_v8 }
 0x23f   : > { %vm4356_vm7 = vmand %vm4308_vm15, %vm4260_vm14  ;;  %v8274_v53 = vmul.u32.u64.low 2863311531, %v3688_v10  ;;  %v8275_v32 = vmul.u32.u64.high 2863311531, %v3688_v10, %v8274_v53 }
 0x240   : > { %vm4261_vm3 = vcmp.ne.s32.totalorder %v4051_v0, 0  ;;  %vm4309_vm8 = vcmp.lt.s32.totalorder %v4051_v0, 0  ;;  %v4452_v57 = vsel %vm4356_vm7, %v4404_v5, %v4040_v8  ;;  %v4405_v30 = vadd.s32 24, %v4051_v0 }
 0x241   : > { %vm4357_vm13 = vmand %vm4309_vm8, %vm4261_vm3  ;;  %vm4500_vm9 = vcmp.lt.s32.totalorder %v4452_v57, 16 }
 0x242   : > { %v4453_v46 = vsel %vm4357_vm13, %v4405_v30, %v4051_v0  ;;  %v5484_v12 = vsel %vm4500_vm9, 1.0, %v6349_v44  ;;  %v3690_v30 = vadd.s32 288, %v7532_v9 }
 0x243   : > { %vm4501_vm11 = vcmp.lt.s32.totalorder %v4453_v46, 16  ;;  %v3691_v46 = vadd.s32 296, %v7532_v9 }
 0x244   : > { %v5485_v55 = vsel %vm4501_vm11, 1.0, %v6349_v44 }
 0x24e   : > { %v5806_v54 = vpop.f32.mrb[0].mxu1 }
 0x24f   : > { %v3558_v26 = vpop.f32.mrb[1].mxu1  ;;  %v4640_v47 = vmul.f32 %v5806_v54, %v5480_v1 }
 0x250   : > { %v4638_v61 = vmul.f32 %v5478_v38, %v3558_v26  ;;  %v5807_v42 = vpop.f32.mrb[2].mxu1 }
 0x251   : > { %v5672_v6 = vpack.c.bf16 %v5807_v42, %v5806_v54  ;;  %v3561_v40 = vpop.f32.mrb[3].mxu1  ;;  %v4641_v27 = vmul.f32 %v5807_v42, %v5481_v31  ;;  %v4745_v51 = vmul.f32 %v4640_v47, %v4640_v47 }
 0x252   : > { %v4686_v16 = vadd.f32 %v4685_v2, %v4638_v61  ;;  %v4743_v23 = vmul.f32 %v4638_v61, %v4638_v61  ;;  %v4639_v49 = vmul.f32 %v5479_v28, %v3561_v40  ;;  %v5667_v63 = vpack.c.bf16 %v3561_v40, %v3558_v26 }
 0x253   : > { %5736 = vst [vmem:[%s7834_s30 + $0x68] sm:$0xff] %v5672_v6   ;;  %v4746_v11 = vmul.f32 %v4641_v27, %v4641_v27  ;;  %v4028_v2 = vmul.u32 24, %v4027_v15 }
 0x254   : > { %v4790_v39 = vadd.f32 %v4789_v37, %v4743_v23  ;;  %v4687_v48 = vadd.f32 %v4686_v16, %v4639_v49  ;;  %v4744_v29 = vmul.f32 %v4639_v49, %v4639_v49  ;;  %5735 = vst [vmem:[%s7834_s30 + $0x60] sm:$0xff] %v5667_v63   ;;  %v4018_v37 = vsub.s32 %v3682_v60, %v4017_v43 }
 0x255   : > { %v4029_v58 = vsub.s32 %v3683_v25, %v4028_v2  ;;  %v8266_v59 = vmul.u32.u64.low 2863311531, %v3686_v18  ;;  %v8267_v60 = vmul.u32.u64.high 2863311531, %v3686_v18, %v8266_v59  ;;  %v3687_v25 = vadd.s32 264, %v7532_v9 }
 0x256   : > { %v4688_v20 = vadd.f32 %v4687_v48, %v4640_v47  ;;  %v4791_v35 = vadd.f32 %v4790_v39, %v4744_v29  ;;  %vm4258_vm4 = vcmp.ne.s32.totalorder %v4018_v37, 0  ;;  %vm4306_vm0 = vcmp.lt.s32.totalorder %v4018_v37, 0 }
 0x257   : > { %vm4259_vm2 = vcmp.ne.s32.totalorder %v4029_v58, 0  ;;  %vm4307_vm6 = vcmp.lt.s32.totalorder %v4029_v58, 0  ;;  %vm4354_vm12 = vmand %vm4306_vm0, %vm4258_vm4  ;;  %v4402_v13 = vadd.s32 24, %v4018_v37  ;;  %v4403_v33 = vadd.s32 24, %v4029_v58 }
 0x258   : > { %v4792_v50 = vadd.f32 %v4791_v35, %v4745_v51  ;;  %v4689_v52 = vadd.f32 %v4688_v20, %v4641_v27  ;;  %vm4355_vm5 = vmand %vm4307_vm6, %vm4259_vm2  ;;  %v8280_v54 = vmul.u32.u64.low 2863311531, %v3687_v25  ;;  %v8281_v1 = vmul.u32.u64.high 2863311531, %v3687_v25, %v8280_v54 }
 0x259   : > { %v4450_v34 = vsel %vm4354_vm12, %v4402_v13, %v4018_v37  ;;  %v4451_v22 = vsel %vm4355_vm5, %v4403_v33, %v4029_v58  ;;  %v4060_v16 = vshrl.u32 %v8267_v60, 4  ;;  %v4082_v48 = vshrl.u32 %v8275_v32, 4 }
 0x25a   : > { %v4793_v24 = vadd.f32 %v4792_v50, %v4746_v11  ;;  %vm4498_vm1 = vcmp.lt.s32.totalorder %v4450_v34, 16  ;;  %vm4499_vm10 = vcmp.lt.s32.totalorder %v4451_v22, 16  ;;  %v4093_v29 = vshrl.u32 %v8278_v17, 4 }
 0x25b   : > { %v5482_v56 = vsel %vm4498_vm1, 1.0, %v6349_v44  ;;  %v5483_v62 = vsel %vm4499_vm10, 1.0, %v6349_v44  ;;  %v4071_v15 = vshrl.u32 %v8281_v1, 4  ;;  %v4061_v35 = vmul.u32 24, %v4060_v16 }
 0x25c   : > { %v4083_v3 = vmul.u32 24, %v4082_v48  ;;  %v3692_v13 = vadd.s32 304, %v7532_v9  ;;  %v8302_v59 = vmul.u32.u64.low 2863311531, %v3690_v30  ;;  %v8303_v60 = vmul.u32.u64.high 2863311531, %v3690_v30, %v8302_v59 }
 0x25d   : > { %v4072_v50 = vmul.u32 24, %v4071_v15  ;;  %v4062_v43 = vsub.s32 %v3686_v18, %v4061_v35 }
 0x25e   : > { %v4084_v2 = vsub.s32 %v3688_v10, %v4083_v3  ;;  %v8297_v22 = vmul.u32.u64.low 2863311531, %v3692_v13  ;;  %v8298_v18 = vmul.u32.u64.high 2863311531, %v3692_v13, %v8297_v22 }
 0x25f   : > { %vm4262_vm14 = vcmp.ne.s32.totalorder %v4062_v43, 0  ;;  %vm4310_vm15 = vcmp.lt.s32.totalorder %v4062_v43, 0  ;;  %v4406_v37 = vadd.s32 24, %v4062_v43  ;;  %v3697_v22 = vadd.s32 344, %v7532_v9 }
 0x260   : > { %vm4264_vm4 = vcmp.ne.s32.totalorder %v4084_v2, 0  ;;  %vm4312_vm0 = vcmp.lt.s32.totalorder %v4084_v2, 0  ;;  %vm4358_vm2 = vmand %vm4310_vm15, %vm4262_vm14  ;;  %v4408_v36 = vadd.s32 24, %v4084_v2 }
 0x261   : > { %vm4360_vm8 = vmand %vm4312_vm0, %vm4264_vm4  ;;  %v4454_v0 = vsel %vm4358_vm2, %v4406_v37, %v4062_v43 }
 0x262   : > { %v4456_v33 = vsel %vm4360_vm8, %v4408_v36, %v4084_v2  ;;  %vm4502_vm9 = vcmp.lt.s32.totalorder %v4454_v0, 16  ;;  %v3696_v0 = vadd.s32 336, %v7532_v9 }
 0x263   : > { %vm4504_vm1 = vcmp.lt.s32.totalorder %v4456_v33, 16  ;;  %v5486_v10 = vsel %vm4502_vm9, 1.0, %v6349_v44 }
 0x26e   : > { %v5810_v45 = vpop.f32.mrb[4].mxu1 }
 0x26f   : > { %v3574_v38 = vpop.f32.mrb[5].mxu1  ;;  %v4644_v19 = vmul.f32 %v5810_v45, %v5484_v12  ;;  %v5488_v12 = vsel %vm4504_vm1, 1.0, %v6349_v44 }
 0x270   : > { %v4642_v26 = vmul.f32 %v5482_v56, %v3574_v38  ;;  %v5811_v28 = vpop.f32.mrb[6].mxu1 }
 0x271   : > { %v5682_v61 = vpack.c.bf16 %v5811_v28, %v5810_v45  ;;  %v3577_v42 = vpop.f32.mrb[7].mxu1  ;;  %v4645_v49 = vmul.f32 %v5811_v28, %v5485_v55  ;;  %v4749_v21 = vmul.f32 %v4644_v19, %v4644_v19 }
 0x272   : > { %v4690_v47 = vadd.f32 %v4689_v52, %v4642_v26  ;;  %v4747_v31 = vmul.f32 %v4642_v26, %v4642_v26  ;;  %v4643_v6 = vmul.f32 %v5483_v62, %v3577_v42  ;;  %v5677_v40 = vpack.c.bf16 %v3577_v42, %v3574_v38 }
 0x273   : > { %5738 = vst [vmem:[%s7834_s30 + $0x78] sm:$0xff] %v5682_v61   ;;  %v4750_v51 = vmul.f32 %v4645_v49, %v4645_v49  ;;  %v4094_v52 = vmul.u32 24, %v4093_v29  ;;  %v8308_v62 = vmul.u32.u64.low 2863311531, %v3691_v46  ;;  %v8309_v53 = vmul.u32.u64.high 2863311531, %v3691_v46, %v8308_v62 }
 0x274   : > { %v4794_v23 = vadd.f32 %v4793_v24, %v4747_v31  ;;  %v4691_v63 = vadd.f32 %v4690_v47, %v4643_v6  ;;  %v4748_v7 = vmul.f32 %v4643_v6, %v4643_v6  ;;  %5737 = vst [vmem:[%s7834_s30 + $0x70] sm:$0xff] %v5677_v40   ;;  %v4073_v24 = vsub.s32 %v3687_v25, %v4072_v50 }
 0x275   : > { %v4095_v8 = vsub.s32 %v3689_v41, %v4094_v52  ;;  %v3693_v41 = vadd.s32 312, %v7532_v9  ;;  %v4126_v47 = vshrl.u32 %v8298_v18, 4 }
 0x276   : > { %v4692_v39 = vadd.f32 %v4691_v63, %v4644_v19  ;;  %v4795_v27 = vadd.f32 %v4794_v23, %v4748_v7  ;;  %vm4263_vm6 = vcmp.ne.s32.totalorder %v4073_v24, 0  ;;  %vm4311_vm7 = vcmp.lt.s32.totalorder %v4073_v24, 0 }
 0x277   : > { %vm4265_vm12 = vcmp.ne.s32.totalorder %v4095_v8, 0  ;;  %vm4313_vm3 = vcmp.lt.s32.totalorder %v4095_v8, 0  ;;  %v4407_v58 = vadd.s32 24, %v4073_v24  ;;  %v4409_v5 = vadd.s32 24, %v4095_v8  ;;  %vm4359_vm5 = vmand %vm4311_vm7, %vm4263_vm6 }
 0x278   : > { %v4796_v20 = vadd.f32 %v4795_v27, %v4749_v21  ;;  %v4693_v14 = vadd.f32 %v4692_v39, %v4645_v49  ;;  %vm4361_vm13 = vmand %vm4313_vm3, %vm4265_vm12  ;;  %v8312_v26 = vmul.u32.u64.low 2863311531, %v3693_v41  ;;  %v8313_v28 = vmul.u32.u64.high 2863311531, %v3693_v41, %v8312_v26 }
 0x279   : > { %v4455_v57 = vsel %vm4359_vm5, %v4407_v58, %v4073_v24  ;;  %v4457_v34 = vsel %vm4361_vm13, %v4409_v5, %v4095_v8  ;;  %v4104_v23 = vshrl.u32 %v8303_v60, 4  ;;  %v4115_v21 = vshrl.u32 %v8309_v53, 4 }
 0x27a   : > { %v4797_v11 = vadd.f32 %v4796_v20, %v4750_v51  ;;  %vm4503_vm10 = vcmp.lt.s32.totalorder %v4455_v57, 16  ;;  %vm4505_vm11 = vcmp.lt.s32.totalorder %v4457_v34, 16  ;;  %v4127_v48 = vmul.u32 24, %v4126_v47 }
 0x27b   : > { %v5487_v45 = vsel %vm4503_vm10, 1.0, %v6349_v44  ;;  %v5489_v4 = vsel %vm4505_vm11, 1.0, %v6349_v44  ;;  %v4105_v15 = vmul.u32 24, %v4104_v23  ;;  %v4137_v51 = vshrl.u32 %v8313_v28, 4 }
 0x27c   : > { %v4116_v35 = vmul.u32 24, %v4115_v21  ;;  %v3695_v34 = vadd.s32 328, %v7532_v9 }
 0x27d   : > { %v4106_v3 = vsub.s32 %v3690_v30, %v4105_v15  ;;  %v8329_v57 = vmul.u32.u64.low 2863311531, %v3696_v0  ;;  %v8330_v30 = vmul.u32.u64.high 2863311531, %v3696_v0, %v8329_v57 }
 0x27e   : > { %v4117_v50 = vsub.s32 %v3691_v46, %v4116_v35 }
 0x27f   : > { %vm4266_vm4 = vcmp.ne.s32.totalorder %v4106_v3, 0  ;;  %vm4314_vm0 = vcmp.lt.s32.totalorder %v4106_v3, 0  ;;  %v4410_v24 = vadd.s32 24, %v4106_v3 }
 0x280   : > { %vm4267_vm6 = vcmp.ne.s32.totalorder %v4117_v50, 0  ;;  %vm4315_vm7 = vcmp.lt.s32.totalorder %v4117_v50, 0  ;;  %vm4362_vm12 = vmand %vm4314_vm0, %vm4266_vm4  ;;  %v4411_v8 = vadd.s32 24, %v4117_v50 }
 0x281   : > { %vm4363_vm5 = vmand %vm4315_vm7, %vm4267_vm6  ;;  %v4458_v36 = vsel %vm4362_vm12, %v4410_v24, %v4106_v3  ;;  %v3698_v24 = vadd.s32 352, %v7532_v9 }
 0x282   : > { %v4459_v5 = vsel %vm4363_vm5, %v4411_v8, %v4117_v50  ;;  %vm4506_vm1 = vcmp.lt.s32.totalorder %v4458_v36, 16 }
 0x283   : > { %vm4507_vm10 = vcmp.lt.s32.totalorder %v4459_v5, 16  ;;  %v5490_v18 = vsel %vm4506_vm1, 1.0, %v6349_v44  ;;  %v3699_v5 = vadd.s32 360, %v7532_v9 }
 0x28e   : > { %v5814_v25 = vpop.f32.mrb[8].mxu1 }
 0x28f   : > { %v3590_v56 = vpop.f32.mrb[9].mxu1  ;;  %v4648_v17 = vmul.f32 %v5814_v25, %v5488_v12 }
 0x290   : > { %v4646_v32 = vmul.f32 %v5486_v10, %v3590_v56  ;;  %v5815_v38 = vpop.f32.mrb[10].mxu1 }
 0x291   : > { %v5692_v54 = vpack.c.bf16 %v5815_v38, %v5814_v25  ;;  %v3593_v1 = vpop.f32.mrb[11].mxu1  ;;  %v4649_v6 = vmul.f32 %v5815_v38, %v5489_v4  ;;  %v4753_v49 = vmul.f32 %v4648_v17, %v4648_v17  ;;  %v5491_v25 = vsel %vm4507_vm10, 1.0, %v6349_v44 }
 0x292   : > { %v4694_v19 = vadd.f32 %v4693_v14, %v4646_v32  ;;  %v4751_v55 = vmul.f32 %v4646_v32, %v4646_v32  ;;  %v4647_v61 = vmul.f32 %v5487_v45, %v3593_v1  ;;  %v5687_v42 = vpack.c.bf16 %v3593_v1, %v3590_v56 }
 0x293   : > { %5740 = vst [vmem:[%s7834_s30 + $0x88] sm:$0xff] %v5692_v54   ;;  %v4754_v39 = vmul.f32 %v4649_v6, %v4649_v6  ;;  %v4128_v14 = vsub.s32 %v3692_v13, %v4127_v48  ;;  %v3694_v13 = vadd.s32 320, %v7532_v9 }
 0x294   : > { %v4798_v31 = vadd.f32 %v4797_v11, %v4751_v55  ;;  %v4695_v40 = vadd.f32 %v4694_v19, %v4647_v61  ;;  %v4752_v16 = vmul.f32 %v4647_v61, %v4647_v61  ;;  %5739 = vst [vmem:[%s7834_s30 + $0x80] sm:$0xff] %v5687_v42   ;;  %v4138_v11 = vmul.u32 24, %v4137_v51 }
 0x295   : > { %vm4268_vm14 = vcmp.ne.s32.totalorder %v4128_v14, 0  ;;  %vm4316_vm15 = vcmp.lt.s32.totalorder %v4128_v14, 0  ;;  %v4412_v2 = vadd.s32 24, %v4128_v14  ;;  %v4170_v55 = vshrl.u32 %v8330_v30, 4 }
 0x296   : > { %v4696_v63 = vadd.f32 %v4695_v40, %v4648_v17  ;;  %v4799_v7 = vadd.f32 %v4798_v31, %v4752_v16  ;;  %v4139_v43 = vsub.s32 %v3693_v41, %v4138_v11  ;;  %vm8321_vm2 = vmand %vm4316_vm15, %vm4268_vm14  ;;  %v3701_v30 = vadd.s32 376, %v7532_v9 }
 0x297   : > { %v4460_v37 = vsel %vm8321_vm2, %v4412_v2, %v4128_v14  ;;  %v8335_v46 = vmul.u32.u64.low 2863311531, %v3694_v13  ;;  %v8336_v10 = vmul.u32.u64.high 2863311531, %v3694_v13, %v8335_v46 }
 0x298   : > { %v4800_v27 = vadd.f32 %v4799_v7, %v4753_v49  ;;  %v4697_v29 = vadd.f32 %v4696_v63, %v4649_v6  ;;  %vm4269_vm3 = vcmp.ne.s32.totalorder %v4139_v43, 0  ;;  %vm4317_vm8 = vcmp.lt.s32.totalorder %v4139_v43, 0 }
 0x299   : > { %v4413_v58 = vadd.s32 24, %v4139_v43  ;;  %vm4365_vm13 = vmand %vm4317_vm8, %vm4269_vm3  ;;  %vm4508_vm9 = vcmp.lt.s32.totalorder %v4460_v37, 16  ;;  %v8340_v12 = vmul.u32.u64.low 2863311531, %v3695_v34  ;;  %v8341_v56 = vmul.u32.u64.high 2863311531, %v3695_v34, %v8340_v12 }
 0x29a   : > { %v4801_v20 = vadd.f32 %v4800_v27, %v4754_v39  ;;  %v5492_v60 = vsel %vm4508_vm9, 1.0, %v6349_v44  ;;  %v8343_v53 = vmul.u32.u64.low 2863311531, %v3697_v22  ;;  %v8344_v32 = vmul.u32.u64.high 2863311531, %v3697_v22, %v8343_v53 }
 0x29b   : > { %v4461_v33 = vsel %vm4365_vm13, %v4413_v58, %v4139_v43  ;;  %v4148_v6 = vshrl.u32 %v8336_v10, 4  ;;  %v4171_v49 = vmul.u32 24, %v4170_v55  ;;  %v4159_v63 = vshrl.u32 %v8341_v56, 4 }
 0x29c   : > { %vm4509_vm11 = vcmp.lt.s32.totalorder %v4461_v33, 16  ;;  %v4181_v27 = vshrl.u32 %v8344_v32, 4  ;;  %v8372_v33 = vmul.u32.u64.low 2863311531, %v3698_v24  ;;  %v8373_v57 = vmul.u32.u64.high 2863311531, %v3698_v24, %v8372_v33 }
 0x29d   : > { %v5493_v4 = vsel %vm4509_vm11, 1.0, %v6349_v44  ;;  %v4149_v48 = vmul.u32 24, %v4148_v6  ;;  %v4160_v15 = vmul.u32 24, %v4159_v63  ;;  %v4172_v51 = vsub.s32 %v3696_v0, %v4171_v49 }
 0x29e   : > { %v3700_v0 = vadd.s32 368, %v7532_v9  ;;  %v8381_v46 = vmul.u32.u64.low 2863311531, %v3699_v5  ;;  %v8382_v10 = vmul.u32.u64.high 2863311531, %v3699_v5, %v8381_v46 }
 0x29f   : > { %v4150_v35 = vsub.s32 %v3694_v13, %v4149_v48  ;;  %v4161_v14 = vsub.s32 %v3695_v34, %v4160_v15  ;;  %vm4272_vm14 = vcmp.ne.s32.totalorder %v4172_v51, 0  ;;  %vm4320_vm15 = vcmp.lt.s32.totalorder %v4172_v51, 0 }
 0x2a0   : > { %vm8353_vm2 = vmand %vm4320_vm15, %vm4272_vm14  ;;  %v4416_v50 = vadd.s32 24, %v4172_v51  ;;  %v4203_v55 = vshrl.u32 %v8382_v10, 4 }
 0x2a1   : > { %vm4270_vm4 = vcmp.ne.s32.totalorder %v4150_v35, 0  ;;  %vm4318_vm0 = vcmp.lt.s32.totalorder %v4150_v35, 0  ;;  %v4414_v43 = vadd.s32 24, %v4150_v35  ;;  %vm4271_vm6 = vcmp.ne.s32.totalorder %v4161_v14, 0 }
 0x2a2   : > { %vm4319_vm7 = vcmp.lt.s32.totalorder %v4161_v14, 0  ;;  %vm8357_vm12 = vmand %vm4318_vm0, %vm4270_vm4  ;;  %v4415_v2 = vadd.s32 24, %v4161_v14  ;;  %v4464_v37 = vsel %vm8353_vm2, %v4416_v50, %v4172_v51 }
 0x2a3   : > { %vm4367_vm5 = vmand %vm4319_vm7, %vm4271_vm6  ;;  %v4462_v36 = vsel %vm8357_vm12, %v4414_v43, %v4150_v35  ;;  %vm4512_vm9 = vcmp.lt.s32.totalorder %v4464_v37, 16 }
 0x2a4   : > { %v4463_v13 = vsel %vm4367_vm5, %v4415_v2, %v4161_v14  ;;  %vm4510_vm1 = vcmp.lt.s32.totalorder %v4462_v36, 16  ;;  %v5496_v9 = vsel %vm4512_vm9, 1.0, %v6349_v44 }
 0x2a5   : > { %vm4511_vm10 = vcmp.lt.s32.totalorder %v4463_v13, 16 }
 0x2a6   : > { %v5495_v56 = vsel %vm4511_vm10, 1.0, %v6349_v44 }
 0x2ae   : > { %v5818_v59 = vpop.f32.mrb[12].mxu1 }
 0x2af   : > { %v3606_v41 = vpop.f32.mrb[13].mxu1  ;;  %v4652_v38 = vmul.f32 %v5818_v59, %v5492_v60 }
 0x2b0   : > { %v4650_v45 = vmul.f32 %v5490_v18, %v3606_v41  ;;  %v5819_v62 = vpop.f32.mrb[14].mxu1 }
 0x2b1   : > { %v5702_v17 = vpack.c.bf16 %v5819_v62, %v5818_v59  ;;  %v3609_v54 = vpop.f32.mrb[15].mxu1  ;;  %v4653_v42 = vmul.f32 %v5819_v62, %v5493_v4  ;;  %v4757_v40 = vmul.f32 %v4652_v38, %v4652_v38  ;;  %v5494_v59 = vsel %vm4510_vm1, 1.0, %v6349_v44 }
 0x2b2   : > { %v4698_v1 = vadd.f32 %v4697_v29, %v4650_v45  ;;  %v4755_v26 = vmul.f32 %v4650_v45, %v4650_v45  ;;  %v4651_v28 = vmul.f32 %v5491_v25, %v3609_v54  ;;  %v5697_v19 = vpack.c.bf16 %v3609_v54, %v3606_v41 }
 0x2b3   : > { %5742 = vst [vmem:[%s7834_s30 + $0x98] sm:$0xff] %v5702_v17   ;;  %v4758_v7 = vmul.f32 %v4653_v42, %v4653_v42  ;;  %v8385_v60 = vmul.u32.u64.low 2863311531, %v3701_v30  ;;  %v8386_v41 = vmul.u32.u64.high 2863311531, %v3701_v30, %v8385_v60  ;;  %v4192_v17 = vshrl.u32 %v8373_v57, 4 }
 0x2b4   : > { %v4802_v61 = vadd.f32 %v4801_v20, %v4755_v26  ;;  %v4699_v47 = vadd.f32 %v4698_v1, %v4651_v28  ;;  %v4756_v31 = vmul.f32 %v4651_v28, %v4651_v28  ;;  %5741 = vst [vmem:[%s7834_s30 + $0x90] sm:$0xff] %v5697_v19   ;;  %v4182_v20 = vmul.u32 24, %v4181_v27 }
 0x2b5   : > { %v4225_v6 = vshrl.u32 %v8386_v41, 4  ;;  %v4193_v49 = vmul.u32 24, %v4192_v17  ;;  %v4204_v27 = vmul.u32 24, %v4203_v55 }
 0x2b6   : > { %v4700_v16 = vadd.f32 %v4699_v47, %v4652_v38  ;;  %v4803_v23 = vadd.f32 %v4802_v61, %v4756_v31  ;;  %v4183_v3 = vsub.s32 %v3697_v22, %v4182_v20 }
 0x2b7   : > { %v8378_v22 = vmul.u32.u64.low 2863311531, %v3700_v0  ;;  %v8379_v18 = vmul.u32.u64.high 2863311531, %v3700_v0, %v8378_v22  ;;  %v4194_v48 = vsub.s32 %v3698_v24, %v4193_v49  ;;  %v4226_v51 = vmul.u32 24, %v4225_v6 }
 0x2b8   : > { %v4804_v21 = vadd.f32 %v4803_v23, %v4757_v40  ;;  %v4701_v39 = vadd.f32 %v4700_v16, %v4653_v42  ;;  %vm4273_vm3 = vcmp.ne.s32.totalorder %v4183_v3, 0  ;;  %vm4321_vm8 = vcmp.lt.s32.totalorder %v4183_v3, 0 }
 0x2b9   : > { %v4417_v8 = vadd.s32 24, %v4183_v3  ;;  %vm8366_vm13 = vmand %vm4321_vm8, %vm4273_vm3  ;;  %v4214_v19 = vshrl.u32 %v8379_v18, 4  ;;  %vm4274_vm14 = vcmp.ne.s32.totalorder %v4194_v48, 0  ;;  %vm4322_vm15 = vcmp.lt.s32.totalorder %v4194_v48, 0 }
 0x2ba   : > { %v4805_v29 = vadd.f32 %v4804_v21, %v4758_v7  ;;  %v4227_v35 = vsub.s32 %v3701_v30, %v4226_v51  ;;  %v4418_v14 = vadd.s32 24, %v4194_v48  ;;  %vm4370_vm7 = vmand %vm4322_vm15, %vm4274_vm14 }
 0x2bb   : > { %v4465_v34 = vsel %vm8366_vm13, %v4417_v8, %v4183_v3  ;;  %v4215_v63 = vmul.u32 24, %v4214_v19 }
 0x2bc   : > { %vm4513_vm11 = vcmp.lt.s32.totalorder %v4465_v34, 16  ;;  %vm4277_vm3 = vcmp.ne.s32.totalorder %v4227_v35, 0  ;;  %vm4325_vm8 = vcmp.lt.s32.totalorder %v4227_v35, 0  ;;  %v4466_v50 = vsel %vm4370_vm7, %v4418_v14, %v4194_v48 }
 0x2bd   : > { %v5497_v32 = vsel %vm4513_vm11, 1.0, %v6349_v44  ;;  %v4216_v20 = vsub.s32 %v3700_v0, %v4215_v63  ;;  %v4421_v43 = vadd.s32 24, %v4227_v35  ;;  %vm4373_vm13 = vmand %vm4325_vm8, %vm4277_vm3  ;;  %vm4514_vm9 = vcmp.lt.s32.totalorder %v4466_v50, 16 }
 0x2be   : > { %v5498_v8 = vsel %vm4514_vm9, 1.0, %v6349_v44 }
 0x2bf   : > { %vm4276_vm4 = vcmp.ne.s32.totalorder %v4216_v20, 0  ;;  %vm4324_vm0 = vcmp.lt.s32.totalorder %v4216_v20, 0  ;;  %v4420_v3 = vadd.s32 24, %v4216_v20  ;;  %v4469_v24 = vsel %vm4373_vm13, %v4421_v43, %v4227_v35 }
 0x2c0   : > { %vm4372_vm12 = vmand %vm4324_vm0, %vm4276_vm4  ;;  %vm4517_vm11 = vcmp.lt.s32.totalorder %v4469_v24, 16 }
 0x2c1   : > { %v4468_v52 = vsel %vm4372_vm12, %v4420_v3, %v4216_v20  ;;  %v5501_v57 = vsel %vm4517_vm11, 1.0, %v6349_v44 }
 0x2c2   : > { %vm4516_vm1 = vcmp.lt.s32.totalorder %v4468_v52, 16 }
 0x2c3   : > { %v5500_v36 = vsel %vm4516_vm1, 1.0, %v6349_v44 }
 0x2ce   : > { %v5822_v25 = vpop.f32.mrb[16].mxu1 }
 0x2cf   : > { %v3622_v12 = vpop.f32.mrb[17].mxu1  ;;  %v4656_v53 = vmul.f32 %v5822_v25, %v5496_v9 }
 0x2d0   : > { %v4654_v45 = vmul.f32 %v5494_v59, %v3622_v12  ;;  %v5823_v62 = vpop.f32.mrb[18].mxu1 }
 0x2d1   : > { %v5712_v38 = vpack.c.bf16 %v5823_v62, %v5822_v25  ;;  %v3625_v4 = vpop.f32.mrb[19].mxu1  ;;  %v4657_v42 = vmul.f32 %v5823_v62, %v5497_v32  ;;  %v4761_v40 = vmul.f32 %v4656_v53, %v4656_v53 }
 0x2d2   : > { %v4702_v54 = vadd.f32 %v4701_v39, %v4654_v45  ;;  %v4759_v1 = vmul.f32 %v4654_v45, %v4654_v45  ;;  %v4655_v26 = vmul.f32 %v5495_v56, %v3625_v4  ;;  %v5707_v28 = vpack.c.bf16 %v3625_v4, %v3622_v12 }
 0x2d3   : > { %5744 = vst [vmem:[%s7834_s30 + $0xa8] sm:$0xff] %v5712_v38   ;;  %v4762_v7 = vmul.f32 %v4657_v42, %v4657_v42 }
 0x2d4   : > { %v4806_v61 = vadd.f32 %v4805_v29, %v4759_v1  ;;  %v4703_v47 = vadd.f32 %v4702_v54, %v4655_v26  ;;  %v4760_v31 = vmul.f32 %v4655_v26, %v4655_v26  ;;  %5743 = vst [vmem:[%s7834_s30 + $0xa0] sm:$0xff] %v5707_v28   ;;  %v4205_v29 = vsub.s32 %v3699_v5, %v4204_v27 }
 0x2d6   : > { %v4704_v16 = vadd.f32 %v4703_v47, %v4656_v53  ;;  %v4807_v23 = vadd.f32 %v4806_v61, %v4760_v31  ;;  %vm4275_vm2 = vcmp.ne.s32.totalorder %v4205_v29, 0  ;;  %vm4323_vm6 = vcmp.lt.s32.totalorder %v4205_v29, 0 }
 0x2d7   : > { %v4419_v11 = vadd.s32 24, %v4205_v29  ;;  %vm4371_vm5 = vmand %vm4323_vm6, %vm4275_vm2 }
 0x2d8   : > { %v4808_v21 = vadd.f32 %v4807_v23, %v4761_v40  ;;  %v4705_v39 = vadd.f32 %v4704_v16, %v4657_v42 }
 0x2d9   : > { %v4467_v2 = vsel %vm4371_vm5, %v4419_v11, %v4205_v29 }
 0x2da   : > { %v4809_v15 = vadd.f32 %v4808_v21, %v4762_v7  ;;  %vm4515_vm10 = vcmp.lt.s32.totalorder %v4467_v2, 16 }
 0x2db   : > { %v5499_v0 = vsel %vm4515_vm10, 1.0, %v6349_v44 }
 0x2eb   : > { %v5826_v37 = vpop.f32.mrb[20].mxu1 }
 0x2ec   : > { %v3638_v58 = vpop.f32.mrb[21].mxu1  ;;  %v4660_v33 = vmul.f32 %v5826_v37, %v5500_v36 }
 0x2ed   : > { %v4658_v5 = vmul.f32 %v5498_v8, %v3638_v58  ;;  %v5827_v13 = vpop.f32.mrb[22].mxu1 }
 0x2ee   : > { %v5722_v30 = vpack.c.bf16 %v5827_v13, %v5826_v37  ;;  %v3641_v34 = vpop.f32.mrb[23].mxu1  ;;  %v4661_v44 = vmul.f32 %v5827_v13, %v5501_v57 }
 0x2ef   : > { %v4706_v22 = vadd.f32 %v4705_v39, %v4658_v5  ;;  %v4763_v18 = vmul.f32 %v4658_v5, %v4658_v5  ;;  %v4659_v46 = vmul.f32 %v5499_v0, %v3641_v34  ;;  %v5717_v10 = vpack.c.bf16 %v3641_v34, %v3638_v58 }
 0x2f0   : > { %5746 = vst [vmem:[%s7834_s30 + $0xb8] sm:$0xff] %v5722_v30  }
 0x2f1   : > { %v4810_v59 = vadd.f32 %v4809_v15, %v4763_v18  ;;  %v4707_v60 = vadd.f32 %v4706_v22, %v4659_v46  ;;  %v4764_v41 = vmul.f32 %v4659_v46, %v4659_v46  ;;  %5745 = vst [vmem:[%s7834_s30 + $0xb0] sm:$0xff] %v5717_v10  }
 0x2f2   : > { %6242 = shalt.err (!%p6239_p5)
}
 0x2f3   : > { %s6243_s27 = scalar_lea.hbm %s8408_s11, 3072  ;;  %s6247_s4 = scalar_lea.hbm %s8496_s2, 6144 }
 0x2f4   : > { %p6244_p6 = scmp.ne.s32.totalorder %s8408_s11, %s6243_s27  ;;  %p6248_p10 = scmp.lt.u32.totalorder %s8408_s11, %s8496_s2 }
 0x2f5   : > { %p6249_p11 = scmp.lt.u32.totalorder %s6247_s4, %s6243_s27  ;;  %p6251_p13 = scmp.lt.u32.totalorder %s6243_s27, %s8408_s11 }
 0x2f6   : > { %p6245_p7 = pnand %p6244_p6, %p6413_p4 }
 0x2f7   : > { %p6250_p12 = por %p6249_p11, %p6248_p10 }
 0x2f8   : > { %p6246_p9 = pneg %p6245_p7 }
 0x2f9   : > { %p6252_p0 = por %p6251_p13, %p6250_p12 }
 0x2fb   : > { %p6253_p1 = pnand %p6252_p0, %p6246_p9 }
 0x2fd   : > { %6256 = shalt.err (!%p6253_p1)
}
 0x2fe   : > { %s6351_s10 = smov 64   ;;  %v4765_v25 = vmul.f32 %v4660_v33, %v4660_v33  ;;  %v4708_v9 = vadd.f32 %v4707_v60, %v4660_v33  ;;  %v4811_v12 = vadd.f32 %v4810_v59, %v4764_v41  ;;  %v4766_v56 = vmul.f32 %v4661_v44, %v4661_v44  ;;  %v4662_v55 = vld [vmem:[%s8291_s5] sm:$0x1]  ;;  %v4718_v47 = vld [vmem:[%s8291_s5 + $0x1] sm:$0x1]  ;;  %s5068_s21 = scalar_lea.sflag [#allocation6], %s7760_s28 }
 0x2ff   : > { %5934 = dma.vmem_to_hbm [thread:$0]  (%p6413_p4), %s8403_s8, 3072, %s8408_s11, %s5063_s18, %s6351_s10, %s6351_s10, %s6344_s7  }
 0x300   : > { %v4709_v45 = vadd.f32 %v4708_v9, %v4661_v44  ;;  %v4812_v62 = vadd.f32 %v4811_v12, %v4765_v25  ;;  %s5552_s7 = sshll.u32 %s6331_s15, 7  ;;  %s5098_s8 = sshll.u32 %s8291_s5, 4  ;;  %s8447_s8 = int_to_ptr.vmem [resolvable:$true] %s5098_s8 }
 0x301   : > { %s8445_s19 = scalar_lea.hbm %s8497_s3, %s5552_s7  ;;  %s6257_s23 = scalar_lea.vmem %s8447_s8, 128 }
 0x302   : > { %v4710_v53 = vrot.slane %v4709_v45, 4  ;;  %v4813_v32 = vadd.f32 %v4812_v62, %v4766_v56  ;;  %p6258_p2 = scmp.ne.s32.totalorder %s8447_s8, %s6257_s23  ;;  %s6352_s15 = smov [#allocation5]  }
 0x303   : > { %s6261_s26 = sshll.u32 %s6352_s15, 4  ;;  %s6262_s26 = int_to_ptr.vmem [resolvable:$false] %s6261_s26 }
 0x304   : > { %v4711_v38 = vadd.f32 %v4710_v53, %v4709_v45  ;;  %v4814_v4 = vrot.slane %v4813_v32, 4  ;;  %p6259_p3 = pnand %p6258_p2, %p6413_p4  ;;  %s6263_s27 = scalar_lea.vmem %s6262_s26, 256 }
 0x305   : > { %p6264_p6 = scmp.lt.s32.totalorder %s8447_s8, %s6262_s26  ;;  %p6265_p7 = scmp.lt.s32.totalorder %s6263_s27, %s6257_s23 }
 0x306   : > { %v4712_v17 = vrot.slane %v4711_v38, 2  ;;  %v4815_v54 = vadd.f32 %v4814_v4, %v4813_v32  ;;  %p6260_p5 = pneg %p6259_p3 }
 0x307   : > { %p6266_p9 = por %p6265_p7, %p6264_p6 }
 0x308   : > { %v4713_v1 = vadd.f32 %v4712_v17, %v4711_v38  ;;  %v4816_v26 = vrot.slane %v4815_v54, 2 }
 0x309   : > { %p6267_p10 = pnand %p6266_p9, %p6260_p5 }
 0x30a   : > { %v4714_v28 = vrot.slane %v4713_v1, 1  ;;  %v4817_v19 = vadd.f32 %v4816_v26, %v4815_v54 }
 0x30c   : > { %v4715_v61 = vadd.f32 %v4714_v28, %v4713_v1  ;;  %v4818_v42 = vrot.slane %v4817_v19, 1 }
 0x30e   : > { %v4819_v31 = vadd.f32 %v4818_v42, %v4817_v19  ;;  %v4716_v6 = vadd.f32 %v4715_v61, %v4662_v55 }
 0x310   : > { %4717 = vst [vmem:[%s8291_s5] sm:$0x1] %v4716_v6  ;;  %v4820_v40 = vadd.f32 %v4819_v31, %v4718_v47 }
 0x312   : > { %4821 = vst [vmem:[%s8291_s5 + $0x1] sm:$0x1] %v4820_v40 }
 0x313   : > { %6270 = shalt.err (!%p6267_p10)
}
 0x314   : > { %s6271_s28 = scalar_lea.hbm %s8445_s19, 128  ;;  %s6275_s30 = scalar_lea.hbm %s8497_s3, 256 }
 0x315   : > { %p6272_p11 = scmp.ne.s32.totalorder %s8445_s19, %s6271_s28  ;;  %p6276_p0 = scmp.lt.u32.totalorder %s8445_s19, %s8497_s3 }
 0x316   : > { %p6277_p1 = scmp.lt.u32.totalorder %s6275_s30, %s6271_s28  ;;  %p6279_p3 = scmp.lt.u32.totalorder %s6271_s28, %s8445_s19 }
 0x317   : > { %p6273_p12 = pnand %p6272_p11, %p6413_p4 }
 0x318   : > { %p6278_p2 = por %p6277_p1, %p6276_p0 }
 0x319   : > { %p6274_p13 = pneg %p6273_p12 }
 0x31a   : > { %p6280_p5 = por %p6279_p3, %p6278_p2 }
 0x31c   : > { %p6281_p6 = pnand %p6280_p5, %p6274_p13 }
 0x31e   : > { %6284 = shalt.err (!%p6281_p6)
}
 0x31f   : > { %5935 = dma.vmem_to_hbm [thread:$0]  (%p6413_p4), %s8447_s8, 128, %s8445_s19, %s5068_s21  }
 0x320 PF: > { %p5945_p7 = scmp.ge.s32.totalorder %s6339_s17, 2  ;;  %s5110_s9 = sand.u32 1, %s6319_s12  }
 0x321   : > { %s5111_s10 = scalar_lea.sflag [#allocation4], %s5110_s9 }
 0x322   : > { %p5939_p9 = pnand %p5945_p7, %p6420_p8 }
 0x324   : > { %6310 = dma.done.wait (!%p5939_p9), %s5111_s10, 3072  }
 0x325   : > { %6312 = vsyncadd (!%p5939_p9), %s5111_s10, 4294964224  ;;  %s5120_s7 = scalar_lea.sflag [#allocation6], %s5110_s9 }
 0x326   : > { %6314 = dma.done.wait (!%p5939_p9), %s5120_s7, 128  }
 0x327   : > { %6316 = vsyncadd (!%p5939_p9), %s5120_s7, 4294967168  ;;  %s20_s17 = sadd.s32 1, %s6339_s17   ;;  %s8594_s12 = smov %s6323_s13 }
 0x328   : > { %p17_p10 = scmp.ge.s32.totalorder %s20_s17, 4   ;;  %s8595_s13 = smov %s6327_s14 }
 0x329   : > { %s8596_s14 = smov %s6426_s25  ;;  %s8597_s15 = smov %s6335_s16 }
 0x32a   : > { %s8598_s16 = smov %s8600_s20  ;;  %19 = sbr.rel (!%p17_p10) target bundleno = 6 (0x6), region = 84 }
 0x331   :  { %5125 = vsyncpa [#allocation4], 1 }
 0x332   :  { %5127 = vsyncpa [#allocation4 + $0x1], 1 }
 0x333   :  { %5128 = vsyncpa [#allocation6], 1 }
 0x334   :  { %5130 = vsyncpa [#allocation6 + $0x1], 1 }

</bundles_post_ra>
